<compile_context>
chip_gen: v7x
topology: tpu7x:2x2x1
jax: 0.10.0
libtpu: 0.0.40
codegen_flags: <defaults>
</compile_context>

<pallas_src>
import functools

import jax
import jax.numpy as jnp
from jax import lax
from jax.experimental import pallas as pl
from jax.experimental.pallas import tpu as pltpu


def _layernorm(v, w, b, eps):
    mu = jnp.mean(v, axis=-1, keepdims=True)
    var = jnp.mean((v - mu) ** 2, axis=-1, keepdims=True)
    return (v - mu) * lax.rsqrt(var + eps) * w + b


def _gelu_exact(x):
    # PyTorch F.gelu default: exact erf formulation.
    return 0.5 * x * (1.0 + lax.erf(x * 0.7071067811865476))


def _fused_layers_kernel(
    x_ref, small_ref, b1_ref, wqkv_ref, wo_ref, w1_ref, w2_ref, o_ref,
    *, depth, scale, eps, hidden, dh_pad,
):
    """All `depth` layers in one invocation; all weights are VMEM-resident."""
    x = x_ref[...].astype(jnp.float32)                          # (B, D)

    # Python loop: static ref indices, fully unrolled (depth is small).  For
    # very deep models switch to lax.fori_loop with dynamic ref[l] indexing.
    for l in range(depth):
        sm = small_ref[l]                                       # (8, D) f32
        ln1w, ln1b = sm[0:1, :], sm[1:2, :]
        bo = sm[2:3, :]
        ln2w, ln2b = sm[3:4, :], sm[4:5, :]
        b2 = sm[5:6, :]
        b1 = b1_ref[l]                                          # (1, 2*hidden)

        # ---- PreNorm(Residual(Attention)):  Attention(LN(x)) + LN(x) ----
        h = _layernorm(x, ln1w, ln1b, eps)                      # (B, D) f32
        qkv = jnp.dot(h.astype(jnp.bfloat16), wqkv_ref[l],      # bf16 x bf16 MXU
                      preferred_element_type=jnp.float32)       # (B, 3*dh_pad)
        q = qkv[:, 0:dh_pad]                  # lane-aligned slots (pad cols = 0)
        k = qkv[:, dh_pad:2 * dh_pad]
        v = qkv[:, 2 * dh_pad:3 * dh_pad]

        sim = lax.dot_general(q, k, (((1,), (1,)), ((), ())),
                              preferred_element_type=jnp.float32) * scale
        sim = sim - jnp.max(sim, axis=-1, keepdims=True)
        e = jnp.exp(sim)
        attn = e * pl.reciprocal(jnp.sum(e, axis=-1, keepdims=True), approx=True)
        av = jnp.dot(attn, v, preferred_element_type=jnp.float32)  # (B, dh_pad)

        attn_out = (
            jnp.dot(av.astype(jnp.bfloat16), wo_ref[l],
                    preferred_element_type=jnp.float32)
            + bo
            + h                               # residual adds the NORMED input
        )

        # ---- PreNorm(Residual(FeedForward-GEGLU)):  FF(LN(y)) + LN(y) ----
        h2 = _layernorm(attn_out, ln2w, ln2b, eps)
        ag = (jnp.dot(h2.astype(jnp.bfloat16), w1_ref[l],
                      preferred_element_type=jnp.float32)
              + b1)                                             # (B, 2*hidden)
        a = ag[:, :hidden]
        g = ag[:, hidden:]
        ge = a * _gelu_exact(g)
        x = (jnp.dot(ge.astype(jnp.bfloat16), w2_ref[l],
                     preferred_element_type=jnp.float32)
             + b2
             + h2)                            # residual adds the NORMED input

    o_ref[...] = x.astype(o_ref.dtype)


def rowcol_transformer_forward(x, packed, *, eps=1e-5):
    """'col'-style forward: x (batch, n, f); attention feature dim is n*f."""
    batch, n, f = x.shape
    D = n * f
    depth = packed["wqkv"].shape[0]
    dh_pad = packed["wo"].shape[1]
    hidden = packed["w2"].shape[1]

    # rearrange 'b n d -> 1 b (n d)': attention sequence axis = batch.
    xf = x.reshape(batch, D).astype(jnp.float32)
    scale = float(batch) ** (-0.5)

    args = (xf, packed["small"], packed["b1"], packed["wqkv"], packed["wo"],
            packed["w1"], packed["w2"])

    # Everything (x + all layers' weights) is staged resident in VMEM.
    total_bytes = sum(a.size * a.dtype.itemsize for a in args) + xf.size * 4
    assert total_bytes < 24 * 1024 * 1024, (
        "stacked weights too large for the VMEM-resident variant; "
        "use a grid=(depth,) streamed pipeline instead")

    kernel = functools.partial(
        _fused_layers_kernel, depth=depth, scale=scale, eps=eps,
        hidden=hidden, dh_pad=dh_pad)

    vmem = pl.BlockSpec(memory_space=pltpu.MemorySpace.VMEM)
    out = pl.pallas_call(
        kernel,
        out_shape=jax.ShapeDtypeStruct((batch, D), jnp.float32),
        in_specs=[vmem] * len(args),
        out_specs=vmem,
        compiler_params=pltpu.CompilerParams(
            vmem_limit_bytes=32 * 1024 * 1024,   # fits v5e/v6e/v7x
        ),
    )(*args)

    # rearrange back '1 b (n d) -> b n d', then the module's final slice.
    return out.reshape(batch, n, f)[:, 0:1, :]


def init_params(key, D, depth, dim_head=64, mult=4):
    """Per-layer params in their natural (torch-like math) layout, all f32."""
    def lin_w(k, fan_in, shape):
        bound = 1.0 / (fan_in ** 0.5)
        return jax.random.uniform(k, shape, jnp.float32, -bound, bound)

    hidden = D * mult
    layers = []
    for i in range(depth):
        ks = jax.random.split(jax.random.fold_in(key, i), 8)
        layers.append(dict(
            ln1w=jnp.ones((D,), jnp.float32),
            ln1b=jnp.zeros((D,), jnp.float32),
            wqkv=lin_w(ks[0], D, (D, 3 * dim_head)),       # to_qkv (no bias)
            wo=lin_w(ks[1], dim_head, (dim_head, D)),      # to_out weight
            bo=lin_w(ks[2], dim_head, (D,)),               # to_out bias
            ln2w=jnp.ones((D,), jnp.float32),
            ln2b=jnp.zeros((D,), jnp.float32),
            w1=lin_w(ks[3], D, (D, 2 * hidden)),           # FF first linear
            b1=lin_w(ks[4], D, (2 * hidden,)),
            w2=lin_w(ks[5], hidden, (hidden, D)),          # FF second linear
            b2=lin_w(ks[6], hidden, (D,)),
        ))
    return layers


def pack_params(layers):
    """Kernel layout: depth-stacked, bf16 big mats, lane-aligned q/k/v slots,
    small f32 params fused into a single (depth, 8, D) slab."""
    depth = len(layers)
    D = layers[0]["wqkv"].shape[0]
    dim_head = layers[0]["wo"].shape[0]
    hidden2 = layers[0]["w1"].shape[1]
    dh_pad = ((dim_head + 127) // 128) * 128

    small = jnp.zeros((depth, 8, D), jnp.float32)
    wqkv = jnp.zeros((depth, D, 3 * dh_pad), jnp.float32)
    wo = jnp.zeros((depth, dh_pad, D), jnp.float32)
    b1 = jnp.zeros((depth, 1, hidden2), jnp.float32)
    w1 = jnp.zeros((depth, D, hidden2), jnp.float32)
    w2 = jnp.zeros((depth, hidden2 // 2, D), jnp.float32)

    for l, p in enumerate(layers):
        small = (small.at[l, 0].set(p["ln1w"]).at[l, 1].set(p["ln1b"])
                      .at[l, 2].set(p["bo"]).at[l, 3].set(p["ln2w"])
                      .at[l, 4].set(p["ln2b"]).at[l, 5].set(p["b2"]))
        for c in range(3):   # q/k/v each in its own 128-lane-aligned slot
            wqkv = wqkv.at[l, :, c * dh_pad:c * dh_pad + dim_head].set(
                p["wqkv"][:, c * dim_head:(c + 1) * dim_head])
        wo = wo.at[l, :dim_head, :].set(p["wo"])
        b1 = b1.at[l, 0].set(p["b1"])
        w1 = w1.at[l].set(p["w1"])
        w2 = w2.at[l].set(p["w2"])

    return dict(
        small=small, b1=b1,
        wqkv=wqkv.astype(jnp.bfloat16), wo=wo.astype(jnp.bfloat16),
        w1=w1.astype(jnp.bfloat16), w2=w2.astype(jnp.bfloat16))


def reference_forward(x, layers, *, eps=1e-5):
    """Pure-JAX reference emulating the kernel's bf16 weight/operand numerics."""
    batch, n, f = x.shape
    D = n * f
    h = x.reshape(batch, D).astype(jnp.float32)
    scale = float(batch) ** (-0.5)
    q16 = lambda a: a.astype(jnp.bfloat16).astype(jnp.float32)

    def ln(v, w, b):
        mu = v.mean(-1, keepdims=True)
        var = ((v - mu) ** 2).mean(-1, keepdims=True)
        return (v - mu) / jnp.sqrt(var + eps) * w + b

    for p in layers:
        xn = ln(h, p["ln1w"], p["ln1b"])
        qkv = q16(xn) @ q16(p["wqkv"])
        q, k, v = jnp.split(qkv, 3, axis=-1)
        sim = (q @ k.T) * scale
        attn = jax.nn.softmax(sim, axis=-1)
        av = attn @ v
        y = q16(av) @ q16(p["wo"]) + p["bo"] + xn
        yn = ln(y, p["ln2w"], p["ln2b"])
        ag = q16(yn) @ q16(p["w1"]) + p["b1"]
        a, g = jnp.split(ag, 2, axis=-1)
        ge = a * _gelu_exact(g)
        h = q16(ge) @ q16(p["w2"]) + p["b2"] + yn
    return h.reshape(batch, n, f)[:, 0:1, :]


if __name__ == "__main__":
    # Module config: dim=32, nfeats=8, depth=2, style='col' -> D = dim*nfeats = 256.
    batch, nfeats, dim, depth = 2, 8, 32, 2
    D = nfeats * dim

    key = jax.random.PRNGKey(0)
    kx, kp = jax.random.split(key)
    x = jax.random.normal(kx, (batch, nfeats, dim), jnp.float32)

    layers = init_params(kp, D, depth)      # natural f32 params
    packed = pack_params(layers)            # kernel layout (bf16, padded, fused)

    out = jax.block_until_ready(rowcol_transformer_forward(x, packed))
    assert out.shape == (batch, 1, dim), out.shape
    assert bool(jnp.all(jnp.isfinite(out)))

    ref = reference_forward(x, layers)
    assert bool(jnp.allclose(out, ref, rtol=5e-2, atol=5e-2)), (
        float(jnp.max(jnp.abs(out - ref))))
    print("KERNEL_OK")
</pallas_src>

<mosaic_0001>
module attributes {stable_mosaic.version = 11 : i64} {
  func.func @_fused_layers_kernel(%arg0: memref<2x256xf32, #tpu.memory_space<vmem>>, %arg1: memref<2x8x256xf32, #tpu.memory_space<vmem>>, %arg2: memref<2x1x2048xf32, #tpu.memory_space<vmem>>, %arg3: memref<2x256x384xbf16, #tpu.memory_space<vmem>>, %arg4: memref<2x128x256xbf16, #tpu.memory_space<vmem>>, %arg5: memref<2x256x2048xbf16, #tpu.memory_space<vmem>>, %arg6: memref<2x1024x256xbf16, #tpu.memory_space<vmem>>, %arg7: memref<2x256xf32, #tpu.memory_space<vmem>>) attributes {dimension_semantics = [], scalar_prefetch = 0 : i64, scratch_operands = 0 : i64, tpu.core_type = #tpu.core_type<tc>} {
    %c0 = arith.constant 0 : index
    %c0_0 = arith.constant 0 : index
    %0 = vector.load %arg0[%c0, %c0_0] : memref<2x256xf32, #tpu.memory_space<vmem>>, vector<2x256xf32>
    %c0_1 = arith.constant 0 : index
    %c0_2 = arith.constant 0 : index
    %c0_3 = arith.constant 0 : index
    %1 = vector.load %arg1[%c0_1, %c0_2, %c0_3] : memref<2x8x256xf32, #tpu.memory_space<vmem>>, vector<1x8x256xf32>
    %2 = vector.shape_cast %1 : vector<1x8x256xf32> to vector<8x256xf32>
    %3 = vector.extract_strided_slice %2 {offsets = [0, 0], sizes = [1, 256], strides = [1, 1]} : vector<8x256xf32> to vector<1x256xf32>
    %4 = vector.extract_strided_slice %2 {offsets = [1, 0], sizes = [1, 256], strides = [1, 1]} : vector<8x256xf32> to vector<1x256xf32>
    %5 = vector.extract_strided_slice %2 {offsets = [2, 0], sizes = [1, 256], strides = [1, 1]} : vector<8x256xf32> to vector<1x256xf32>
    %6 = vector.extract_strided_slice %2 {offsets = [3, 0], sizes = [1, 256], strides = [1, 1]} : vector<8x256xf32> to vector<1x256xf32>
    %7 = vector.extract_strided_slice %2 {offsets = [4, 0], sizes = [1, 256], strides = [1, 1]} : vector<8x256xf32> to vector<1x256xf32>
    %8 = vector.extract_strided_slice %2 {offsets = [5, 0], sizes = [1, 256], strides = [1, 1]} : vector<8x256xf32> to vector<1x256xf32>
    %c0_4 = arith.constant 0 : index
    %c0_5 = arith.constant 0 : index
    %c0_6 = arith.constant 0 : index
    %9 = vector.load %arg2[%c0_4, %c0_5, %c0_6] : memref<2x1x2048xf32, #tpu.memory_space<vmem>>, vector<1x1x2048xf32>
    %10 = vector.shape_cast %9 : vector<1x1x2048xf32> to vector<1x2048xf32>
    %cst = arith.constant dense<0.000000e+00> : vector<2xf32>
    %11 = vector.multi_reduction <add>, %0, %cst [1] : vector<2x256xf32> to vector<2xf32>
    %12 = vector.shape_cast %11 : vector<2xf32> to vector<2x1xf32>
    %cst_7 = arith.constant 2.560000e+02 : f32
    %13 = vector.broadcast %cst_7 : f32 to vector<2x1xf32>
    %14 = arith.divf %12, %13 : vector<2x1xf32>
    %15 = vector.broadcast %14 : vector<2x1xf32> to vector<2x256xf32>
    %16 = arith.subf %0, %15 : vector<2x256xf32>
    %17 = arith.mulf %16, %16 : vector<2x256xf32>
    %cst_8 = arith.constant dense<0.000000e+00> : vector<2xf32>
    %18 = vector.multi_reduction <add>, %17, %cst_8 [1] : vector<2x256xf32> to vector<2xf32>
    %19 = vector.shape_cast %18 : vector<2xf32> to vector<2x1xf32>
    %cst_9 = arith.constant 2.560000e+02 : f32
    %20 = vector.broadcast %cst_9 : f32 to vector<2x1xf32>
    %21 = arith.divf %19, %20 : vector<2x1xf32>
    %22 = vector.broadcast %14 : vector<2x1xf32> to vector<2x256xf32>
    %23 = arith.subf %0, %22 : vector<2x256xf32>
    %cst_10 = arith.constant 9.99999974E-6 : f32
    %24 = vector.broadcast %cst_10 : f32 to vector<2x1xf32>
    %25 = arith.addf %21, %24 : vector<2x1xf32>
    %26 = math.rsqrt %25 : vector<2x1xf32>
    %27 = vector.broadcast %26 : vector<2x1xf32> to vector<2x256xf32>
    %28 = arith.mulf %23, %27 : vector<2x256xf32>
    %29 = vector.broadcast %3 : vector<1x256xf32> to vector<2x256xf32>
    %30 = arith.mulf %28, %29 : vector<2x256xf32>
    %31 = vector.broadcast %4 : vector<1x256xf32> to vector<2x256xf32>
    %32 = arith.addf %30, %31 : vector<2x256xf32>
    %33 = arith.truncf %32 : vector<2x256xf32> to vector<2x256xbf16>
    %c0_11 = arith.constant 0 : index
    %c0_12 = arith.constant 0 : index
    %c0_13 = arith.constant 0 : index
    %34 = vector.load %arg3[%c0_11, %c0_12, %c0_13] : memref<2x256x384xbf16, #tpu.memory_space<vmem>>, vector<1x256x384xbf16>
    %35 = vector.shape_cast %34 : vector<1x256x384xbf16> to vector<256x384xbf16>
    %cst_14 = arith.constant dense<0.000000e+00> : vector<2x384xf32>
    %36 = tpu.matmul %33, %35, %cst_14 {dimension_numbers = #tpu.dot_dimension_numbers<[1], [0], [0], [1], [0, 0, 1, 1], [], []>} : vector<2x256xbf16>, vector<256x384xbf16>, vector<2x384xf32> -> vector<2x384xf32>
    %37 = vector.extract_strided_slice %36 {offsets = [0, 0], sizes = [2, 128], strides = [1, 1]} : vector<2x384xf32> to vector<2x128xf32>
    %38 = vector.extract_strided_slice %36 {offsets = [0, 128], sizes = [2, 128], strides = [1, 1]} : vector<2x384xf32> to vector<2x128xf32>
    %39 = vector.extract_strided_slice %36 {offsets = [0, 256], sizes = [2, 128], strides = [1, 1]} : vector<2x384xf32> to vector<2x128xf32>
    %cst_15 = arith.constant dense<0.000000e+00> : vector<2x2xf32>
    %40 = tpu.matmul %37, %38, %cst_15 {dimension_numbers = #tpu.dot_dimension_numbers<[1], [1], [0], [0], [0, 0, 1, 0], [], []>} : vector<2x128xf32>, vector<2x128xf32>, vector<2x2xf32> -> vector<2x2xf32>
    %cst_16 = arith.constant 0.707106769 : f32
    %41 = vector.broadcast %cst_16 : f32 to vector<2x2xf32>
    %42 = arith.mulf %40, %41 : vector<2x2xf32>
    %cst_17 = arith.constant dense<0xFF800000> : vector<2xf32>
    %43 = vector.multi_reduction <maximumf>, %42, %cst_17 [1] : vector<2x2xf32> to vector<2xf32>
    %44 = vector.shape_cast %43 : vector<2xf32> to vector<2x1xf32>
    %45 = vector.broadcast %44 : vector<2x1xf32> to vector<2x2xf32>
    %46 = arith.subf %42, %45 : vector<2x2xf32>
    %47 = math.exp %46 : vector<2x2xf32>
    %cst_18 = arith.constant dense<0.000000e+00> : vector<2xf32>
    %48 = vector.multi_reduction <add>, %47, %cst_18 [1] : vector<2x2xf32> to vector<2xf32>
    %49 = vector.shape_cast %48 : vector<2xf32> to vector<2x1xf32>
    %50 = tpu.reciprocal %49 {approx = true} : vector<2x1xf32> -> vector<2x1xf32>
    %51 = vector.broadcast %50 : vector<2x1xf32> to vector<2x2xf32>
    %52 = arith.mulf %47, %51 : vector<2x2xf32>
    %cst_19 = arith.constant dense<0.000000e+00> : vector<2x128xf32>
    %53 = tpu.matmul %52, %39, %cst_19 {dimension_numbers = #tpu.dot_dimension_numbers<[1], [0], [0], [1], [0, 0, 1, 1], [], []>} : vector<2x2xf32>, vector<2x128xf32>, vector<2x128xf32> -> vector<2x128xf32>
    %54 = arith.truncf %53 : vector<2x128xf32> to vector<2x128xbf16>
    %c0_20 = arith.constant 0 : index
    %c0_21 = arith.constant 0 : index
    %c0_22 = arith.constant 0 : index
    %55 = vector.load %arg4[%c0_20, %c0_21, %c0_22] : memref<2x128x256xbf16, #tpu.memory_space<vmem>>, vector<1x128x256xbf16>
    %56 = vector.shape_cast %55 : vector<1x128x256xbf16> to vector<128x256xbf16>
    %cst_23 = arith.constant dense<0.000000e+00> : vector<2x256xf32>
    %57 = tpu.matmul %54, %56, %cst_23 {dimension_numbers = #tpu.dot_dimension_numbers<[1], [0], [0], [1], [0, 0, 1, 1], [], []>} : vector<2x128xbf16>, vector<128x256xbf16>, vector<2x256xf32> -> vector<2x256xf32>
    %58 = vector.broadcast %5 : vector<1x256xf32> to vector<2x256xf32>
    %59 = arith.addf %57, %58 : vector<2x256xf32>
    %60 = arith.addf %59, %32 : vector<2x256xf32>
    %cst_24 = arith.constant dense<0.000000e+00> : vector<2xf32>
    %61 = vector.multi_reduction <add>, %60, %cst_24 [1] : vector<2x256xf32> to vector<2xf32>
    %62 = vector.shape_cast %61 : vector<2xf32> to vector<2x1xf32>
    %cst_25 = arith.constant 2.560000e+02 : f32
    %63 = vector.broadcast %cst_25 : f32 to vector<2x1xf32>
    %64 = arith.divf %62, %63 : vector<2x1xf32>
    %65 = vector.broadcast %64 : vector<2x1xf32> to vector<2x256xf32>
    %66 = arith.subf %60, %65 : vector<2x256xf32>
    %67 = arith.mulf %66, %66 : vector<2x256xf32>
    %cst_26 = arith.constant dense<0.000000e+00> : vector<2xf32>
    %68 = vector.multi_reduction <add>, %67, %cst_26 [1] : vector<2x256xf32> to vector<2xf32>
    %69 = vector.shape_cast %68 : vector<2xf32> to vector<2x1xf32>
    %cst_27 = arith.constant 2.560000e+02 : f32
    %70 = vector.broadcast %cst_27 : f32 to vector<2x1xf32>
    %71 = arith.divf %69, %70 : vector<2x1xf32>
    %72 = vector.broadcast %64 : vector<2x1xf32> to vector<2x256xf32>
    %73 = arith.subf %60, %72 : vector<2x256xf32>
    %cst_28 = arith.constant 9.99999974E-6 : f32
    %74 = vector.broadcast %cst_28 : f32 to vector<2x1xf32>
    %75 = arith.addf %71, %74 : vector<2x1xf32>
    %76 = math.rsqrt %75 : vector<2x1xf32>
    %77 = vector.broadcast %76 : vector<2x1xf32> to vector<2x256xf32>
    %78 = arith.mulf %73, %77 : vector<2x256xf32>
    %79 = vector.broadcast %6 : vector<1x256xf32> to vector<2x256xf32>
    %80 = arith.mulf %78, %79 : vector<2x256xf32>
    %81 = vector.broadcast %7 : vector<1x256xf32> to vector<2x256xf32>
    %82 = arith.addf %80, %81 : vector<2x256xf32>
    %83 = arith.truncf %82 : vector<2x256xf32> to vector<2x256xbf16>
    %c0_29 = arith.constant 0 : index
    %c0_30 = arith.constant 0 : index
    %c0_31 = arith.constant 0 : index
    %84 = vector.load %arg5[%c0_29, %c0_30, %c0_31] : memref<2x256x2048xbf16, #tpu.memory_space<vmem>>, vector<1x256x2048xbf16>
    %85 = vector.shape_cast %84 : vector<1x256x2048xbf16> to vector<256x2048xbf16>
    %cst_32 = arith.constant dense<0.000000e+00> : vector<2x2048xf32>
    %86 = tpu.matmul %83, %85, %cst_32 {dimension_numbers = #tpu.dot_dimension_numbers<[1], [0], [0], [1], [0, 0, 1, 1], [], []>} : vector<2x256xbf16>, vector<256x2048xbf16>, vector<2x2048xf32> -> vector<2x2048xf32>
    %87 = vector.broadcast %10 : vector<1x2048xf32> to vector<2x2048xf32>
    %88 = arith.addf %86, %87 : vector<2x2048xf32>
    %89 = vector.extract_strided_slice %88 {offsets = [0, 0], sizes = [2, 1024], strides = [1, 1]} : vector<2x2048xf32> to vector<2x1024xf32>
    %90 = vector.extract_strided_slice %88 {offsets = [0, 1024], sizes = [2, 1024], strides = [1, 1]} : vector<2x2048xf32> to vector<2x1024xf32>
    %cst_33 = arith.constant 5.000000e-01 : f32
    %91 = vector.broadcast %cst_33 : f32 to vector<2x1024xf32>
    %92 = arith.mulf %91, %90 : vector<2x1024xf32>
    %cst_34 = arith.constant 0.707106769 : f32
    %93 = vector.broadcast %cst_34 : f32 to vector<2x1024xf32>
    %94 = arith.mulf %90, %93 : vector<2x1024xf32>
    %95 = math.erf %94 : vector<2x1024xf32>
    %cst_35 = arith.constant 1.000000e+00 : f32
    %96 = vector.broadcast %cst_35 : f32 to vector<2x1024xf32>
    %97 = arith.addf %96, %95 : vector<2x1024xf32>
    %98 = arith.mulf %92, %97 : vector<2x1024xf32>
    %99 = arith.mulf %89, %98 : vector<2x1024xf32>
    %100 = arith.truncf %99 : vector<2x1024xf32> to vector<2x1024xbf16>
    %c0_36 = arith.constant 0 : index
    %c0_37 = arith.constant 0 : index
    %c0_38 = arith.constant 0 : index
    %101 = vector.load %arg6[%c0_36, %c0_37, %c0_38] : memref<2x1024x256xbf16, #tpu.memory_space<vmem>>, vector<1x1024x256xbf16>
    %102 = vector.shape_cast %101 : vector<1x1024x256xbf16> to vector<1024x256xbf16>
    %cst_39 = arith.constant dense<0.000000e+00> : vector<2x256xf32>
    %103 = tpu.matmul %100, %102, %cst_39 {dimension_numbers = #tpu.dot_dimension_numbers<[1], [0], [0], [1], [0, 0, 1, 1], [], []>} : vector<2x1024xbf16>, vector<1024x256xbf16>, vector<2x256xf32> -> vector<2x256xf32>
    %104 = vector.broadcast %8 : vector<1x256xf32> to vector<2x256xf32>
    %105 = arith.addf %103, %104 : vector<2x256xf32>
    %106 = arith.addf %105, %82 : vector<2x256xf32>
    %c1 = arith.constant 1 : index
    %c0_40 = arith.constant 0 : index
    %c0_41 = arith.constant 0 : index
    %107 = vector.load %arg1[%c1, %c0_40, %c0_41] : memref<2x8x256xf32, #tpu.memory_space<vmem>>, vector<1x8x256xf32>
    %108 = vector.shape_cast %107 : vector<1x8x256xf32> to vector<8x256xf32>
    %109 = vector.extract_strided_slice %108 {offsets = [0, 0], sizes = [1, 256], strides = [1, 1]} : vector<8x256xf32> to vector<1x256xf32>
    %110 = vector.extract_strided_slice %108 {offsets = [1, 0], sizes = [1, 256], strides = [1, 1]} : vector<8x256xf32> to vector<1x256xf32>
    %111 = vector.extract_strided_slice %108 {offsets = [2, 0], sizes = [1, 256], strides = [1, 1]} : vector<8x256xf32> to vector<1x256xf32>
    %112 = vector.extract_strided_slice %108 {offsets = [3, 0], sizes = [1, 256], strides = [1, 1]} : vector<8x256xf32> to vector<1x256xf32>
    %113 = vector.extract_strided_slice %108 {offsets = [4, 0], sizes = [1, 256], strides = [1, 1]} : vector<8x256xf32> to vector<1x256xf32>
    %114 = vector.extract_strided_slice %108 {offsets = [5, 0], sizes = [1, 256], strides = [1, 1]} : vector<8x256xf32> to vector<1x256xf32>
    %c1_42 = arith.constant 1 : index
    %c0_43 = arith.constant 0 : index
    %c0_44 = arith.constant 0 : index
    %115 = vector.load %arg2[%c1_42, %c0_43, %c0_44] : memref<2x1x2048xf32, #tpu.memory_space<vmem>>, vector<1x1x2048xf32>
    %116 = vector.shape_cast %115 : vector<1x1x2048xf32> to vector<1x2048xf32>
    %cst_45 = arith.constant dense<0.000000e+00> : vector<2xf32>
    %117 = vector.multi_reduction <add>, %106, %cst_45 [1] : vector<2x256xf32> to vector<2xf32>
    %118 = vector.shape_cast %117 : vector<2xf32> to vector<2x1xf32>
    %cst_46 = arith.constant 2.560000e+02 : f32
    %119 = vector.broadcast %cst_46 : f32 to vector<2x1xf32>
    %120 = arith.divf %118, %119 : vector<2x1xf32>
    %121 = vector.broadcast %120 : vector<2x1xf32> to vector<2x256xf32>
    %122 = arith.subf %106, %121 : vector<2x256xf32>
    %123 = arith.mulf %122, %122 : vector<2x256xf32>
    %cst_47 = arith.constant dense<0.000000e+00> : vector<2xf32>
    %124 = vector.multi_reduction <add>, %123, %cst_47 [1] : vector<2x256xf32> to vector<2xf32>
    %125 = vector.shape_cast %124 : vector<2xf32> to vector<2x1xf32>
    %cst_48 = arith.constant 2.560000e+02 : f32
    %126 = vector.broadcast %cst_48 : f32 to vector<2x1xf32>
    %127 = arith.divf %125, %126 : vector<2x1xf32>
    %128 = vector.broadcast %120 : vector<2x1xf32> to vector<2x256xf32>
    %129 = arith.subf %106, %128 : vector<2x256xf32>
    %cst_49 = arith.constant 9.99999974E-6 : f32
    %130 = vector.broadcast %cst_49 : f32 to vector<2x1xf32>
    %131 = arith.addf %127, %130 : vector<2x1xf32>
    %132 = math.rsqrt %131 : vector<2x1xf32>
    %133 = vector.broadcast %132 : vector<2x1xf32> to vector<2x256xf32>
    %134 = arith.mulf %129, %133 : vector<2x256xf32>
    %135 = vector.broadcast %109 : vector<1x256xf32> to vector<2x256xf32>
    %136 = arith.mulf %134, %135 : vector<2x256xf32>
    %137 = vector.broadcast %110 : vector<1x256xf32> to vector<2x256xf32>
    %138 = arith.addf %136, %137 : vector<2x256xf32>
    %139 = arith.truncf %138 : vector<2x256xf32> to vector<2x256xbf16>
    %c1_50 = arith.constant 1 : index
    %c0_51 = arith.constant 0 : index
    %c0_52 = arith.constant 0 : index
    %140 = vector.load %arg3[%c1_50, %c0_51, %c0_52] : memref<2x256x384xbf16, #tpu.memory_space<vmem>>, vector<1x256x384xbf16>
    %141 = vector.shape_cast %140 : vector<1x256x384xbf16> to vector<256x384xbf16>
    %cst_53 = arith.constant dense<0.000000e+00> : vector<2x384xf32>
    %142 = tpu.matmul %139, %141, %cst_53 {dimension_numbers = #tpu.dot_dimension_numbers<[1], [0], [0], [1], [0, 0, 1, 1], [], []>} : vector<2x256xbf16>, vector<256x384xbf16>, vector<2x384xf32> -> vector<2x384xf32>
    %143 = vector.extract_strided_slice %142 {offsets = [0, 0], sizes = [2, 128], strides = [1, 1]} : vector<2x384xf32> to vector<2x128xf32>
    %144 = vector.extract_strided_slice %142 {offsets = [0, 128], sizes = [2, 128], strides = [1, 1]} : vector<2x384xf32> to vector<2x128xf32>
    %145 = vector.extract_strided_slice %142 {offsets = [0, 256], sizes = [2, 128], strides = [1, 1]} : vector<2x384xf32> to vector<2x128xf32>
    %cst_54 = arith.constant dense<0.000000e+00> : vector<2x2xf32>
    %146 = tpu.matmul %143, %144, %cst_54 {dimension_numbers = #tpu.dot_dimension_numbers<[1], [1], [0], [0], [0, 0, 1, 0], [], []>} : vector<2x128xf32>, vector<2x128xf32>, vector<2x2xf32> -> vector<2x2xf32>
    %cst_55 = arith.constant 0.707106769 : f32
    %147 = vector.broadcast %cst_55 : f32 to vector<2x2xf32>
    %148 = arith.mulf %146, %147 : vector<2x2xf32>
    %cst_56 = arith.constant dense<0xFF800000> : vector<2xf32>
    %149 = vector.multi_reduction <maximumf>, %148, %cst_56 [1] : vector<2x2xf32> to vector<2xf32>
    %150 = vector.shape_cast %149 : vector<2xf32> to vector<2x1xf32>
    %151 = vector.broadcast %150 : vector<2x1xf32> to vector<2x2xf32>
    %152 = arith.subf %148, %151 : vector<2x2xf32>
    %153 = math.exp %152 : vector<2x2xf32>
    %cst_57 = arith.constant dense<0.000000e+00> : vector<2xf32>
    %154 = vector.multi_reduction <add>, %153, %cst_57 [1] : vector<2x2xf32> to vector<2xf32>
    %155 = vector.shape_cast %154 : vector<2xf32> to vector<2x1xf32>
    %156 = tpu.reciprocal %155 {approx = true} : vector<2x1xf32> -> vector<2x1xf32>
    %157 = vector.broadcast %156 : vector<2x1xf32> to vector<2x2xf32>
    %158 = arith.mulf %153, %157 : vector<2x2xf32>
    %cst_58 = arith.constant dense<0.000000e+00> : vector<2x128xf32>
    %159 = tpu.matmul %158, %145, %cst_58 {dimension_numbers = #tpu.dot_dimension_numbers<[1], [0], [0], [1], [0, 0, 1, 1], [], []>} : vector<2x2xf32>, vector<2x128xf32>, vector<2x128xf32> -> vector<2x128xf32>
    %160 = arith.truncf %159 : vector<2x128xf32> to vector<2x128xbf16>
    %c1_59 = arith.constant 1 : index
    %c0_60 = arith.constant 0 : index
    %c0_61 = arith.constant 0 : index
    %161 = vector.load %arg4[%c1_59, %c0_60, %c0_61] : memref<2x128x256xbf16, #tpu.memory_space<vmem>>, vector<1x128x256xbf16>
    %162 = vector.shape_cast %161 : vector<1x128x256xbf16> to vector<128x256xbf16>
    %cst_62 = arith.constant dense<0.000000e+00> : vector<2x256xf32>
    %163 = tpu.matmul %160, %162, %cst_62 {dimension_numbers = #tpu.dot_dimension_numbers<[1], [0], [0], [1], [0, 0, 1, 1], [], []>} : vector<2x128xbf16>, vector<128x256xbf16>, vector<2x256xf32> -> vector<2x256xf32>
    %164 = vector.broadcast %111 : vector<1x256xf32> to vector<2x256xf32>
    %165 = arith.addf %163, %164 : vector<2x256xf32>
    %166 = arith.addf %165, %138 : vector<2x256xf32>
    %cst_63 = arith.constant dense<0.000000e+00> : vector<2xf32>
    %167 = vector.multi_reduction <add>, %166, %cst_63 [1] : vector<2x256xf32> to vector<2xf32>
    %168 = vector.shape_cast %167 : vector<2xf32> to vector<2x1xf32>
    %cst_64 = arith.constant 2.560000e+02 : f32
    %169 = vector.broadcast %cst_64 : f32 to vector<2x1xf32>
    %170 = arith.divf %168, %169 : vector<2x1xf32>
    %171 = vector.broadcast %170 : vector<2x1xf32> to vector<2x256xf32>
    %172 = arith.subf %166, %171 : vector<2x256xf32>
    %173 = arith.mulf %172, %172 : vector<2x256xf32>
    %cst_65 = arith.constant dense<0.000000e+00> : vector<2xf32>
    %174 = vector.multi_reduction <add>, %173, %cst_65 [1] : vector<2x256xf32> to vector<2xf32>
    %175 = vector.shape_cast %174 : vector<2xf32> to vector<2x1xf32>
    %cst_66 = arith.constant 2.560000e+02 : f32
    %176 = vector.broadcast %cst_66 : f32 to vector<2x1xf32>
    %177 = arith.divf %175, %176 : vector<2x1xf32>
    %178 = vector.broadcast %170 : vector<2x1xf32> to vector<2x256xf32>
    %179 = arith.subf %166, %178 : vector<2x256xf32>
    %cst_67 = arith.constant 9.99999974E-6 : f32
    %180 = vector.broadcast %cst_67 : f32 to vector<2x1xf32>
    %181 = arith.addf %177, %180 : vector<2x1xf32>
    %182 = math.rsqrt %181 : vector<2x1xf32>
    %183 = vector.broadcast %182 : vector<2x1xf32> to vector<2x256xf32>
    %184 = arith.mulf %179, %183 : vector<2x256xf32>
    %185 = vector.broadcast %112 : vector<1x256xf32> to vector<2x256xf32>
    %186 = arith.mulf %184, %185 : vector<2x256xf32>
    %187 = vector.broadcast %113 : vector<1x256xf32> to vector<2x256xf32>
    %188 = arith.addf %186, %187 : vector<2x256xf32>
    %189 = arith.truncf %188 : vector<2x256xf32> to vector<2x256xbf16>
    %c1_68 = arith.constant 1 : index
    %c0_69 = arith.constant 0 : index
    %c0_70 = arith.constant 0 : index
    %190 = vector.load %arg5[%c1_68, %c0_69, %c0_70] : memref<2x256x2048xbf16, #tpu.memory_space<vmem>>, vector<1x256x2048xbf16>
    %191 = vector.shape_cast %190 : vector<1x256x2048xbf16> to vector<256x2048xbf16>
    %cst_71 = arith.constant dense<0.000000e+00> : vector<2x2048xf32>
    %192 = tpu.matmul %189, %191, %cst_71 {dimension_numbers = #tpu.dot_dimension_numbers<[1], [0], [0], [1], [0, 0, 1, 1], [], []>} : vector<2x256xbf16>, vector<256x2048xbf16>, vector<2x2048xf32> -> vector<2x2048xf32>
    %193 = vector.broadcast %116 : vector<1x2048xf32> to vector<2x2048xf32>
    %194 = arith.addf %192, %193 : vector<2x2048xf32>
    %195 = vector.extract_strided_slice %194 {offsets = [0, 0], sizes = [2, 1024], strides = [1, 1]} : vector<2x2048xf32> to vector<2x1024xf32>
    %196 = vector.extract_strided_slice %194 {offsets = [0, 1024], sizes = [2, 1024], strides = [1, 1]} : vector<2x2048xf32> to vector<2x1024xf32>
    %cst_72 = arith.constant 5.000000e-01 : f32
    %197 = vector.broadcast %cst_72 : f32 to vector<2x1024xf32>
    %198 = arith.mulf %197, %196 : vector<2x1024xf32>
    %cst_73 = arith.constant 0.707106769 : f32
    %199 = vector.broadcast %cst_73 : f32 to vector<2x1024xf32>
    %200 = arith.mulf %196, %199 : vector<2x1024xf32>
    %201 = math.erf %200 : vector<2x1024xf32>
    %cst_74 = arith.constant 1.000000e+00 : f32
    %202 = vector.broadcast %cst_74 : f32 to vector<2x1024xf32>
    %203 = arith.addf %202, %201 : vector<2x1024xf32>
    %204 = arith.mulf %198, %203 : vector<2x1024xf32>
    %205 = arith.mulf %195, %204 : vector<2x1024xf32>
    %206 = arith.truncf %205 : vector<2x1024xf32> to vector<2x1024xbf16>
    %c1_75 = arith.constant 1 : index
    %c0_76 = arith.constant 0 : index
    %c0_77 = arith.constant 0 : index
    %207 = vector.load %arg6[%c1_75, %c0_76, %c0_77] : memref<2x1024x256xbf16, #tpu.memory_space<vmem>>, vector<1x1024x256xbf16>
    %208 = vector.shape_cast %207 : vector<1x1024x256xbf16> to vector<1024x256xbf16>
    %cst_78 = arith.constant dense<0.000000e+00> : vector<2x256xf32>
    %209 = tpu.matmul %206, %208, %cst_78 {dimension_numbers = #tpu.dot_dimension_numbers<[1], [0], [0], [1], [0, 0, 1, 1], [], []>} : vector<2x1024xbf16>, vector<1024x256xbf16>, vector<2x256xf32> -> vector<2x256xf32>
    %210 = vector.broadcast %114 : vector<1x256xf32> to vector<2x256xf32>
    %211 = arith.addf %209, %210 : vector<2x256xf32>
    %212 = arith.addf %211, %188 : vector<2x256xf32>
    %c0_79 = arith.constant 0 : index
    %c0_80 = arith.constant 0 : index
    %213 = vector.load %arg7[%c0_79, %c0_80] : memref<2x256xf32, #tpu.memory_space<vmem>>, vector<2x256xf32>
    tpu.vector_store %arg7[%c0_79, %c0_80], %212 {strides = array<i32>} : memref<2x256xf32, #tpu.memory_space<vmem>>, vector<2x256xf32>,
    return
  }
}

</mosaic_0001>

<bundles_post_ra>
// kernel: tpu_custom_call.1
= control target key start
LH: loop header
LB: loop body
LE: loop exit
PB: predicated region body
PF: predicated region fallthrough
CT: control target
= control target key end

     0   :  { %12 = vsyncpa [#allocation3], 0  ;;  %s10045_s0 = inlined_call_operand.hbm [shape: f32[2,256], index: 0, kind: input, shape index: {}]   ;;  %s10046_s1 = inlined_call_operand.hbm [shape: f32[2,8,256], index: 1, kind: input, shape index: {}]   ;;  %s10047_s2 = inlined_call_operand.hbm [shape: f32[2,1,2048], index: 2, kind: input, shape index: {}]   ;;  %s10048_s3 = inlined_call_operand.hbm [shape: bf16[2,256,384], index: 3, kind: input, shape index: {}]   ;;  %s10049_s4 = inlined_call_operand.hbm [shape: bf16[2,128,256], index: 4, kind: input, shape index: {}]   ;;  %s10050_s5 = inlined_call_operand.hbm [shape: bf16[2,256,2048], index: 5, kind: input, shape index: {}]   ;;  %s10051_s6 = inlined_call_operand.hbm [shape: bf16[2,1024,256], index: 6, kind: input, shape index: {}]   ;;  %s10052_s7 = inlined_call_operand.hbm [shape: f32[2,256], index: 7, kind: output, shape index: {}]  }
   0x1   :  { %13 = vsyncpa [#allocation6], 0 }
   0x2   :  { %14 = vsyncpa [#allocation9], 0 }
   0x3   :  { %15 = vsyncpa [#allocation12], 0 }
   0x4   :  { %16 = vsyncpa [#allocation4], 0  ;;  %s9500_s24 = smov [#allocation5]   ;;  %s9314_s28 = scalar_lea.hbm %s10046_s1, 512 }
   0x5   :  { %s32_s25 = sshll.u32 %s9500_s24, 4  ;;  %p9315_p0 = scmp.ne.s32.totalorder %s10046_s1, %s9314_s28  ;;  %s33_s25 = int_to_ptr.vmem [resolvable:$true] %s32_s25 }
   0x6   :  { %p9318_p1 = scmp.lt.u32.totalorder %s9314_s28, %s10046_s1 }
   0x8   :  { %p9320_p2 = pnand %p9318_p1, %p9315_p0 }
   0xa   :  { %9323 = shalt.err (!%p9320_p2)
}
   0xb   :  { %s9324_s10 = scalar_lea.vmem %s33_s25, 512  ;;  %p9329_p4 = scmp.lt.s32.totalorder %s33_s25, %s33_s25 }
   0xc   :  { %p9325_p3 = scmp.ne.s32.totalorder %s33_s25, %s9324_s10  ;;  %p9330_p5 = scmp.lt.s32.totalorder %s9324_s10, %s9324_s10 }
   0xe   :  { %p9331_p6 = por %p9330_p5, %p9329_p4 }
  0x10   :  { %p9332_p7 = pnand %p9331_p6, %p9325_p3 }
  0x12   :  { %9335 = shalt.err (!%p9332_p7)
}
  0x13   :  { %s9501_s11 = smov 256   ;;  %s9502_s12 = smov 16  }
  0x14   :  { %38 = dma.hbm_to_vmem [thread:$0]  %s10046_s1, 512, %s33_s25, [#allocation6], %s9501_s11, %s9501_s11, %s9502_s12  }
  0x15   :  { %s9503_s15 = smov [#allocation8]   ;;  %s9336_s19 = scalar_lea.hbm %s10048_s3, 12288 }
  0x16   :  { %s56_s16 = sshll.u32 %s9503_s15, 4  ;;  %p9337_p8 = scmp.ne.s32.totalorder %s10048_s3, %s9336_s19  ;;  %s57_s16 = int_to_ptr.vmem [resolvable:$true] %s56_s16 }
  0x17   :  { %p9340_p9 = scmp.lt.u32.totalorder %s9336_s19, %s10048_s3 }
  0x19   :  { %p9342_p10 = pnand %p9340_p9, %p9337_p8 }
  0x1b   :  { %9345 = shalt.err (!%p9342_p10)
}
  0x1c   :  { %s9346_s24 = scalar_lea.vmem %s57_s16, 12288  ;;  %p9351_p12 = scmp.lt.s32.totalorder %s57_s16, %s57_s16 }
  0x1d   :  { %p9347_p11 = scmp.ne.s32.totalorder %s57_s16, %s9346_s24  ;;  %p9352_p13 = scmp.lt.s32.totalorder %s9346_s24, %s9346_s24 }
  0x1f   :  { %p9353_p0 = por %p9352_p13, %p9351_p12 }
  0x21   :  { %p9354_p1 = pnand %p9353_p0, %p9347_p11 }
  0x23   :  { %9357 = shalt.err (!%p9354_p1)
}
  0x24   :  { %s9504_s1 = smov 192   ;;  %s9505_s25 = smov 12  }
  0x25   :  { %62 = dma.hbm_to_vmem [thread:$0]  %s10048_s3, 12288, %s57_s16, [#allocation9], %s9504_s1, %s9504_s1, %s9505_s25  }
  0x26   :  { %s9506_s28 = smov [#allocation11]   ;;  %s9358_s9 = scalar_lea.hbm %s10050_s5, 65536 }
  0x27   :  { %s80_s29 = sshll.u32 %s9506_s28, 4  ;;  %p9359_p2 = scmp.ne.s32.totalorder %s10050_s5, %s9358_s9  ;;  %s81_s29 = int_to_ptr.vmem [resolvable:$true] %s80_s29 }
  0x28   :  { %p9362_p3 = scmp.lt.u32.totalorder %s9358_s9, %s10050_s5 }
  0x2a   :  { %p9364_p4 = pnand %p9362_p3, %p9359_p2 }
  0x2c   :  { %9367 = shalt.err (!%p9364_p4)
}
  0x2d   :  { %s9368_s17 = scalar_lea.vmem %s81_s29, 65536  ;;  %p9373_p6 = scmp.lt.s32.totalorder %s81_s29, %s81_s29 }
  0x2e   :  { %p9369_p5 = scmp.ne.s32.totalorder %s81_s29, %s9368_s17  ;;  %p9374_p7 = scmp.lt.s32.totalorder %s9368_s17, %s9368_s17 }
  0x30   :  { %p9375_p8 = por %p9374_p7, %p9373_p6 }
  0x32   :  { %p9376_p9 = pnand %p9375_p8, %p9369_p5 }
  0x34   :  { %9379 = shalt.err (!%p9376_p9)
}
  0x35   :  { %s9507_s3 = smov 1024   ;;  %s9508_s16 = smov 64  }
  0x36   :  { %86 = dma.hbm_to_vmem [thread:$0]  %s10050_s5, 65536, %s81_s29, [#allocation12], %s9507_s3, %s9507_s3, %s9508_s16  }
  0x37   :  { %s9509_s20 = smov [#allocation2]   ;;  %s9510_s22 = smov [#allocation7]  }
  0x38   :  { %s23_s21 = sshll.u32 %s9509_s20, 4  ;;  %s44_s23 = sshll.u32 %s9510_s22, 4  ;;  %s24_s21 = int_to_ptr.vmem [resolvable:$true] %s23_s21  ;;  %s45_s23 = int_to_ptr.vmem [resolvable:$true] %s44_s23 }
  0x39   :  { %s9380_s25 = scalar_lea.hbm %s10045_s0, 64 }
  0x3a   :  { %p9381_p10 = scmp.ne.s32.totalorder %s10045_s0, %s9380_s25  ;;  %p9384_p11 = scmp.lt.u32.totalorder %s9380_s25, %s10045_s0 }
  0x3c   :  { %p9386_p12 = pnand %p9384_p11, %p9381_p10 }
  0x3e   :  { %9389 = shalt.err (!%p9386_p12)
}
  0x3f   :  { %s9390_s5 = scalar_lea.vmem %s24_s21, 64  ;;  %p9395_p0 = scmp.lt.s32.totalorder %s24_s21, %s24_s21 }
  0x40   :  { %p9391_p13 = scmp.ne.s32.totalorder %s24_s21, %s9390_s5  ;;  %p9396_p1 = scmp.lt.s32.totalorder %s9390_s5, %s9390_s5 }
  0x42   :  { %p9397_p2 = por %p9396_p1, %p9395_p0 }
  0x44   :  { %p9398_p3 = pnand %p9397_p2, %p9391_p13 }
  0x46   :  { %9401 = shalt.err (!%p9398_p3)
}
  0x47   :  { %26 = dma.hbm_to_vmem [thread:$0]  %s10045_s0, 64, %s24_s21, [#allocation3]  }
  0x48   :  { %s9402_s13 = scalar_lea.hbm %s10047_s2, 512 }
  0x49   :  { %p9403_p4 = scmp.ne.s32.totalorder %s10047_s2, %s9402_s13  ;;  %p9406_p5 = scmp.lt.u32.totalorder %s9402_s13, %s10047_s2 }
  0x4b   :  { %p9408_p6 = pnand %p9406_p5, %p9403_p4 }
  0x4d   :  { %9411 = shalt.err (!%p9408_p6)
}
  0x4e   :  { %s9412_s16 = scalar_lea.vmem %s45_s23, 512  ;;  %p9417_p8 = scmp.lt.s32.totalorder %s45_s23, %s45_s23 }
  0x4f   :  { %p9413_p7 = scmp.ne.s32.totalorder %s45_s23, %s9412_s16  ;;  %p9418_p9 = scmp.lt.s32.totalorder %s9412_s16, %s9412_s16 }
  0x51   :  { %p9419_p10 = por %p9418_p9, %p9417_p8 }
  0x53   :  { %p9420_p11 = pnand %p9419_p10, %p9413_p7 }
  0x55   :  { %9423 = shalt.err (!%p9420_p11)
}
  0x56   :  { %50 = dma.hbm_to_vmem [thread:$0]  %s10047_s2, 512, %s45_s23, [#allocation6], %s9501_s11, %s9501_s11, %s9502_s12  }
  0x57   :  { %s9511_s19 = smov [#allocation10]   ;;  %s9424_s24 = scalar_lea.hbm %s10049_s4, 4096 }
  0x58   :  { %s68_s20 = sshll.u32 %s9511_s19, 4  ;;  %p9425_p12 = scmp.ne.s32.totalorder %s10049_s4, %s9424_s24  ;;  %s69_s20 = int_to_ptr.vmem [resolvable:$true] %s68_s20 }
  0x59   :  { %p9428_p13 = scmp.lt.u32.totalorder %s9424_s24, %s10049_s4 }
  0x5b   :  { %p9430_p0 = pnand %p9428_p13, %p9425_p12 }
  0x5d   :  { %9433 = shalt.err (!%p9430_p0)
}
  0x5e   :  { %s9434_s28 = scalar_lea.vmem %s69_s20, 4096  ;;  %p9439_p2 = scmp.lt.s32.totalorder %s69_s20, %s69_s20 }
  0x5f   :  { %p9435_p1 = scmp.ne.s32.totalorder %s69_s20, %s9434_s28  ;;  %p9440_p3 = scmp.lt.s32.totalorder %s9434_s28, %s9434_s28 }
  0x61   :  { %p9441_p4 = por %p9440_p3, %p9439_p2 }
  0x63   :  { %p9442_p5 = pnand %p9441_p4, %p9435_p1 }
  0x65   :  { %9445 = shalt.err (!%p9442_p5)
}
  0x66   :  { %s9512_s2 = smov 128   ;;  %s9513_s11 = smov 8  }
  0x67   :  { %74 = dma.hbm_to_vmem [thread:$0]  %s10049_s4, 4096, %s69_s20, [#allocation9], %s9512_s2, %s9512_s2, %s9513_s11  }
  0x68   :  { %s9514_s30 = smov [#allocation13]   ;;  %s9446_s9 = scalar_lea.hbm %s10051_s6, 32768 }
  0x69   :  { %s92_s5 = sshll.u32 %s9514_s30, 4  ;;  %p9447_p6 = scmp.ne.s32.totalorder %s10051_s6, %s9446_s9  ;;  %s93_s5 = int_to_ptr.vmem [resolvable:$true] %s92_s5 }
  0x6a   :  { %p9450_p7 = scmp.lt.u32.totalorder %s9446_s9, %s10051_s6 }
  0x6c   :  { %p9452_p8 = pnand %p9450_p7, %p9447_p6 }
  0x6e   :  { %9455 = shalt.err (!%p9452_p8)
}
  0x6f   :  { %s9456_s17 = scalar_lea.vmem %s93_s5, 32768  ;;  %p9461_p10 = scmp.lt.s32.totalorder %s93_s5, %s93_s5 }
  0x70   :  { %p9457_p9 = scmp.ne.s32.totalorder %s93_s5, %s9456_s17  ;;  %p9462_p11 = scmp.lt.s32.totalorder %s9456_s17, %s9456_s17 }
  0x72   :  { %p9463_p12 = por %p9462_p11, %p9461_p10 }
  0x74   :  { %p9464_p13 = pnand %p9463_p12, %p9457_p9 }
  0x76   :  { %9467 = shalt.err (!%p9464_p13)
}
  0x77   :  { %98 = dma.hbm_to_vmem [thread:$0]  %s10051_s6, 32768, %s93_s5, [#allocation12], %s9512_s2, %s9512_s2, %s9513_s11  }
  0x78   :  { %9490 = dma.done.wait [#allocation3], 64  }
  0x79   :  { %9491 = vsyncadd [#allocation3], 4294967232 }
  0x7a   :  { %9492 = dma.done.wait [#allocation6], 1024  }
  0x7b   :  { %9493 = vsyncadd [#allocation6], 4294966272 }
  0x7c   :  { %9494 = dma.done.wait [#allocation9], 16384  }
  0x7d   :  { %9495 = vsyncadd [#allocation9], 4294950912 }
  0x7e   :  { %9496 = dma.done.wait [#allocation12], 98304  }
  0x7f   :  { %9497 = vsyncadd [#allocation12], 4294868992  ;;  %v130_v0 = vlaneseq  ;;  %v9515_v1 = vmov 1983009808   ;;  %v121_v6 = vld [vmem:[#allocation2] sm:$0xf] }
  0x80   :  { %v128_v2 = vunpack.c.l.s4 %v9515_v1  ;;  %vm137_vm0 = vcmask 1041408   ;;  %v8702_v12 = vld [vmem:[#allocation8 + $0x4] ss:$12 sps:$4 sm:$0xff]   ;;  %v8704_v13 = vld [vmem:[#allocation8] ss:$12 sps:$4 sm:$0xff]   ;;  %vm9518_vm1 = vmmov 0  }
  0x81   :  { %v9651_v3 = vshrl.u32 %v130_v0, 7  ;;  %v8705_v14 = vld [vmem:[#allocation8 + $0x1c] ss:$12 sps:$4 sm:$0xff]   ;;  %558 = vmatprep.subr.bf16.mxu0 %v8702_v12  ;;  %v8707_v15 = vld [vmem:[#allocation8 + $0x18] ss:$12 sps:$4 sm:$0xff]   ;;  %vm710_vm2 = vcmask 9216  }
  0x82   :  { %v129_v4 = vunpack.c.0.s8 %v128_v2  ;;  %559 = vmatpush1.bf16.msra.mxu0 %v8704_v13  ;;  %v8708_v16 = vld [vmem:[#allocation8 + $0x34] ss:$12 sps:$4 sm:$0xff]   ;;  %v8710_v17 = vld [vmem:[#allocation8 + $0x30] ss:$12 sps:$4 sm:$0xff]   ;;  %v8711_v19 = vld [vmem:[#allocation8 + $0x4c] ss:$12 sps:$4 sm:$0xff]  }
  0x83   :  { %560 = vmatprep.subr.bf16.mxu0 %v8705_v14  ;;  %v8728_v18 = vld [vmem:[#allocation8 + $0xc8] ss:$12 sps:$4 sm:$0xff]   ;;  %v8714_v22 = vld [vmem:[#allocation8 + $0x64] ss:$12 sps:$4 sm:$0xff]   ;;  %v8716_v23 = vld [vmem:[#allocation8 + $0x60] ss:$12 sps:$4 sm:$0xff]  }
  0x84   :  { %v9654_v5 = vsub.s32 %v129_v4, %v9651_v3  ;;  %v8730_v20 = vld [vmem:[#allocation8 + $0x8] ss:$12 sps:$4 sm:$0xff]   ;;  %8609 = vmatprep.subr.bf16.mxu1 %v8728_v18  ;;  %v8719_v25 = vld [vmem:[#allocation8 + $0x78] ss:$12 sps:$4 sm:$0xff]   ;;  %v8722_v27 = vld [vmem:[#allocation8 + $0x90] ss:$12 sps:$4 sm:$0xff]  }
  0x85   :  { %8610 = vmatpush3.bf16.msra.mxu1 %v8730_v20  ;;  %v8713_v21 = vld [vmem:[#allocation8 + $0x48] ss:$12 sps:$4 sm:$0xff]   ;;  %v8723_v28 = vld [vmem:[#allocation8 + $0xac] ss:$12 sps:$4 sm:$0xff]   ;;  %v8726_v30 = vld [vmem:[#allocation8 + $0xc4] ss:$12 sps:$4 sm:$0xff]  }
  0x86   :  { %v133_v7 = vrot.slane %v121_v6, %v9654_v5  ;;  %561 = vmatpush1.bf16.msra.mxu0 %v8707_v15  ;;  %v8717_v24 = vld [vmem:[#allocation8 + $0x7c] ss:$12 sps:$4 sm:$0xff]   ;;  %v8720_v26 = vld [vmem:[#allocation8 + $0x94] ss:$12 sps:$4 sm:$0xff]   ;;  %v9516_v32 = vmov 269488144  }
  0x87   :  { %562 = vmatprep.subr.bf16.mxu0 %v8708_v16  ;;  %v8725_v29 = vld [vmem:[#allocation8 + $0xa8] ss:$12 sps:$4 sm:$0xff]   ;;  %v8729_v31 = vld [vmem:[#allocation8 + $0xc0] ss:$12 sps:$4 sm:$0xff]   ;;  %v147_v33 = vunpack.c.l.s4 %v9516_v32  ;;  %v8734_v48 = vld [vmem:[#allocation8 + $0xd8] ss:$12 sps:$4 sm:$0xff]  }
  0x88   :  { %v134_v8 = vcombine.high %v133_v7, %v133_v7  ;;  %v138_v9 = vsel %vm137_vm0, %v133_v7, 0.0  ;;  %v8731_v46 = vld [vmem:[#allocation8 + $0xdc] ss:$12 sps:$4 sm:$0xff]   ;;  %v8733_v47 = vld [vmem:[#allocation8 + $0xe0] ss:$12 sps:$4 sm:$0xff]   ;;  %v9671_v15 = vsub.s32 0, %v9651_v3 }
  0x89   :  { %v148_v34 = vunpack.c.0.s8 %v147_v33  ;;  %v8735_v49 = vld [vmem:[#allocation8 + $0x20] ss:$12 sps:$4 sm:$0xff]   ;;  %8611 = vmatprep.subr.bf16.mxu1 %v8733_v47  ;;  %v8738_v51 = vld [vmem:[#allocation8 + $0xf8] ss:$12 sps:$4 sm:$0xff]   ;;  %v8739_v52 = vld [vmem:[#allocation8 + $0xf0] ss:$12 sps:$4 sm:$0xff]  }
  0x8a   :  { %v139_v10 = vsel %vm137_vm0, %v134_v8, 0.0  ;;  %563 = vmatpush1.bf16.msra.mxu0 %v8710_v17  ;;  %8612 = vmatpush3.bf16.msra.mxu1 %v8735_v49  ;;  %v8736_v50 = vld [vmem:[#allocation8 + $0xf4] ss:$12 sps:$4 sm:$0xff]   ;;  %v8740_v53 = vld [vmem:[#allocation8 + $0x38] ss:$12 sps:$4 sm:$0xff]   ;;  %v9675_v17 = vld [vmem:[#allocation5 + $0x8] sm:$0xff] }
  0x8b   :  { %v140_v11 = vadd.f32 %v139_v10, %v138_v9  ;;  %564 = vmatprep.subr.bf16.mxu0 %v8711_v19  ;;  %v9660_v35 = vsub.s32 %v148_v34, %v9651_v3  ;;  %8613 = vmatprep.subr.bf16.mxu1 %v8738_v51  ;;  %v8741_v54 = vld [vmem:[#allocation8 + $0x10c] ss:$12 sps:$4 sm:$0xff]   ;;  %v8743_v55 = vld [vmem:[#allocation8 + $0x110] ss:$12 sps:$4 sm:$0xff]   ;;  %v8744_v56 = vld [vmem:[#allocation8 + $0x108] ss:$12 sps:$4 sm:$0xff]   ;;  %v192_v20 = vrot.slane %v9675_v17, %v9671_v15 }
  0x8c   :  { %v8745_v57 = vld [vmem:[#allocation8 + $0x50] ss:$12 sps:$4 sm:$0xff]   ;;  %v8748_v59 = vld [vmem:[#allocation8 + $0x128] ss:$12 sps:$4 sm:$0xff]   ;;  %v8749_v60 = vld [vmem:[#allocation8 + $0x120] ss:$12 sps:$4 sm:$0xff]  }
  0x8d   :  { %141 = vadd.xlane.f32.xlu0 %v140_v11  ;;  %v8746_v58 = vld [vmem:[#allocation8 + $0x124] ss:$12 sps:$4 sm:$0xff]   ;;  %v8750_v61 = vld [vmem:[#allocation8 + $0x68] ss:$12 sps:$4 sm:$0xff]   ;;  %v8753_v63 = vld [vmem:[#allocation8 + $0x140] ss:$12 sps:$4 sm:$0xff]  }
  0x8e   :  { %565 = vmatpush1.bf16.msra.mxu0 %v8713_v21  ;;  %8614 = vmatpush3.bf16.msra.mxu1 %v8740_v53  ;;  %v8751_v62 = vld [vmem:[#allocation8 + $0x13c] ss:$12 sps:$4 sm:$0xff]   ;;  %v8754_v0 = vld [vmem:[#allocation8 + $0x138] ss:$12 sps:$4 sm:$0xff]   ;;  %v8755_v1 = vld [vmem:[#allocation8 + $0x80] ss:$12 sps:$4 sm:$0xff]  }
  0x8f   :  { %566 = vmatprep.subr.bf16.mxu0 %v8714_v22  ;;  %8615 = vmatprep.subr.bf16.mxu1 %v8743_v55  ;;  %v8756_v2 = vld [vmem:[#allocation8 + $0x154] ss:$12 sps:$4 sm:$0xff]   ;;  %v8758_v4 = vld [vmem:[#allocation8 + $0x158] ss:$12 sps:$4 sm:$0xff]   ;;  %v8763_v9 = vld [vmem:[#allocation8 + $0x170] ss:$12 sps:$4 sm:$0xff]  }
  0x90   :  { %v8760_v7 = vld [vmem:[#allocation8 + $0x98] ss:$12 sps:$4 sm:$0xff]   ;;  %v8764_v10 = vld [vmem:[#allocation8 + $0x168] ss:$12 sps:$4 sm:$0xff]   ;;  %v8765_v11 = vld [vmem:[#allocation8 + $0xb0] ss:$12 sps:$4 sm:$0xff]  }
  0x91   :  { %v8761_v8 = vld [vmem:[#allocation8 + $0x16c] ss:$12 sps:$4 sm:$0xff]   ;;  %v9673_v16 = vld [vmem:[#allocation5] sm:$0xff]  ;;  %v9678_v18 = vsub.s32 1, %v9651_v3  ;;  %vm722_vm3 = vcmask 15360   ;;  %s9520_s6 = smov [#allocation14]  }
  0x92   :  { %567 = vmatpush1.bf16.msra.mxu0 %v8716_v23  ;;  %8616 = vmatpush3.bf16.msra.mxu1 %v8745_v57  ;;  %v188_v19 = vrot.slane %v9673_v16, %v9671_v15  ;;  %v8768_v55 = vld [vmem:[#allocation10 + $0x4] ss:$8 sps:$4 sm:$0xff]   ;;  %v8769_v57 = vld [vmem:[#allocation10 + $0x10] ss:$8 sps:$4 sm:$0xff]   ;;  %s7696_s16 = sshll.u32 %s9520_s6, 4  ;;  %s7697_s16 = int_to_ptr.vmem [resolvable:$true] %s7696_s16 }
  0x93   :  { %568 = vmatprep.subr.bf16.mxu0 %v8717_v24  ;;  %8617 = vmatprep.subr.bf16.mxu1 %v8748_v59  ;;  %v208_v21 = vrot.slane %v9673_v16, %v9678_v18  ;;  %v212_v22 = vrot.slane %v9675_v17, %v9678_v18  ;;  %v8772_v59 = vld [vmem:[#allocation10 + $0x20] ss:$8 sps:$4 sm:$0xff]   ;;  %s9468_s0 = scalar_lea.vmem %s7697_s16, 64  ;;  %p9473_p1 = scmp.lt.s32.totalorder %s7697_s16, %s7697_s16 }
  0x94   :  { %v195_v23 = vcombine.low %v188_v19, %v192_v20  ;;  %v9715_v19 = vsub.s32 2, %v9651_v3  ;;  %p9469_p0 = scmp.ne.s32.totalorder %s7697_s16, %s9468_s0  ;;  %p9474_p2 = scmp.lt.s32.totalorder %s9468_s0, %s9468_s0 }
  0x95   :  { %v215_v24 = vcombine.low %v208_v21, %v212_v22 }
  0x96   :  { %569 = vmatpush1.bf16.msra.mxu0 %v8719_v25  ;;  %8618 = vmatpush3.bf16.msra.mxu1 %v8750_v61  ;;  %v8775_v61 = vld [vmem:[#allocation10 + $0x30] ss:$8 sps:$4 sm:$0xff]   ;;  %v819_v20 = vrot.slane %v9673_v16, %v9715_v19  ;;  %v823_v21 = vrot.slane %v9675_v17, %v9715_v19  ;;  %p9475_p3 = por %p9474_p2, %p9473_p1 }
  0x97   :  { %570 = vmatprep.subr.bf16.mxu0 %v8720_v26  ;;  %8619 = vmatprep.subr.bf16.mxu1 %v8753_v63  ;;  %v8778_v63 = vld [vmem:[#allocation10 + $0x40] ss:$8 sps:$4 sm:$0xff]  }
  0x98   :  { %p9476_p4 = pnand %p9475_p3, %p9469_p0 }
  0x9a   :  { %571 = vmatpush1.bf16.msra.mxu0 %v8722_v27  ;;  %8620 = vmatpush3.bf16.msra.mxu1 %v8755_v1  ;;  %v202_v27 = vrot.slane %v195_v23, %v9654_v5  ;;  %v8781_v1 = vld [vmem:[#allocation10 + $0x50] ss:$8 sps:$4 sm:$0xff]  }
  0x9b   :  { %572 = vmatprep.subr.bf16.mxu0 %v8723_v28  ;;  %8621 = vmatprep.subr.bf16.mxu1 %v8758_v4  ;;  %v8784_v4 = vld [vmem:[#allocation10 + $0x60] ss:$8 sps:$4 sm:$0xff]  }
  0x9e   :  { %573 = vmatpush1.bf16.msra.mxu0 %v8725_v29  ;;  %8622 = vmatpush3.bf16.msra.mxu1 %v8760_v7  ;;  %v222_v29 = vrot.slane %v215_v24, %v9654_v5  ;;  %v8787_v7 = vld [vmem:[#allocation10 + $0x70] ss:$8 sps:$4 sm:$0xff]  }
  0x9f   :  { %574 = vmatprep.subr.bf16.mxu0 %v8726_v30  ;;  %8623 = vmatprep.subr.bf16.mxu1 %v8763_v9 }
  0xa2   :  { %575 = vmatpush1.bf16.msra.mxu0 %v8729_v31  ;;  %8624 = vmatpush3.bf16.msra.mxu1 %v8765_v11  ;;  %v9519_v11 = vmov 0  }
  0xa3   :  { %576 = vmatprep.subr.bf16.mxu0 %v8731_v46  ;;  %904 = vmatprep.subr.bf16.mxu1 %v8768_v55  ;;  %v1037_v55 = vld [vmem:[#allocation11 + $0x180] sm:$0xff] }
  0xa6   :  { %577 = vmatpush1.bf16.msra.mxu0 %v8734_v48 }
  0xa7   :  { %578 = vmatprep.subr.bf16.mxu0 %v8736_v50 }
  0xaa   :  { %579 = vmatpush1.bf16.msra.mxu0 %v8739_v52 }
  0xab   :  { %580 = vmatprep.subr.bf16.mxu0 %v8741_v54  ;;  %v8766_v54 = vld [vmem:[#allocation10] ss:$8 sps:$4 sm:$0xff]  }
  0xae   :  { %581 = vmatpush1.bf16.msra.mxu0 %v8744_v56  ;;  %v8771_v56 = vld [vmem:[#allocation10 + $0x14] ss:$8 sps:$4 sm:$0xff]  }
  0xaf   :  { %582 = vmatprep.subr.bf16.mxu0 %v8746_v58  ;;  %v8774_v58 = vld [vmem:[#allocation10 + $0x24] ss:$8 sps:$4 sm:$0xff]  }
  0xb2   :  { %583 = vmatpush1.bf16.msra.mxu0 %v8749_v60  ;;  %v8777_v60 = vld [vmem:[#allocation10 + $0x34] ss:$8 sps:$4 sm:$0xff]  }
  0xb3   :  { %584 = vmatprep.subr.bf16.mxu0 %v8751_v62  ;;  %v8780_v62 = vld [vmem:[#allocation10 + $0x44] ss:$8 sps:$4 sm:$0xff]  }
  0xb6   :  { %585 = vmatpush1.bf16.msra.mxu0 %v8754_v0  ;;  %v8783_v0 = vld [vmem:[#allocation10 + $0x54] ss:$8 sps:$4 sm:$0xff]  }
  0xb7   :  { %586 = vmatprep.subr.bf16.mxu0 %v8756_v2  ;;  %v8786_v2 = vld [vmem:[#allocation10 + $0x64] ss:$8 sps:$4 sm:$0xff]  }
 0x11a   :  { %v142_v36 = vpop.xlane.xlu0 %141 }
 0x11b   :  { %v144_v37 = vmul.f32 0.00390625, %v142_v36  ;;  %v9517_v36 = vmov 0.0  }
 0x11d   :  { %v152_v38 = vrot.slane %v144_v37, %v9660_v35 }
 0x11f   :  { %v9663_v39 = vsub.f32 %v121_v6, %v152_v38  ;;  %v8759_v6 = vld [vmem:[#allocation8 + $0x150] ss:$12 sps:$4 sm:$0xff]  }
 0x120   :  { %587 = vmatpush1.bf16.msra.mxu0 %v8759_v6  ;;  %v8789_v6 = vld [vmem:[#allocation10 + $0x74] ss:$8 sps:$4 sm:$0xff]  }
 0x121   :  { %v155_v40 = vmul.f32 %v9663_v39, %v9663_v39  ;;  %588 = vmatprep.subr.bf16.mxu0 %v8761_v8 }
 0x123   :  { %v163_v41 = vrot.slane %v155_v40, %v9654_v5 }
 0x124   :  { %589 = vmatpush1.bf16.msra.mxu0 %v8764_v10 }
 0x125   :  { %v164_v42 = vcombine.high %v163_v41, %v163_v41  ;;  %v167_v43 = vsel %vm137_vm0, %v163_v41, 0.0  ;;  %8661 = vmatprep.subr.mxu0 %v9517_v36 }
 0x127   :  { %v168_v44 = vsel %vm137_vm0, %v164_v42, 0.0 }
 0x128   :  { %v169_v45 = vadd.f32 %v168_v44, %v167_v43 }
 0x12a   :  { %170 = vadd.xlane.f32.xlu0 %v169_v45 }
 0x1b7   :  { %v171_v12 = vpop.xlane.xlu0 %170 }
 0x1b8   :  { %v172_v13 = vmul.f32 0.00390625, %v171_v12 }
 0x1ba   :  { %v173_v14 = vadd.f32 1e-05, %v172_v13 }
 0x1bc   :  { %9262 = vrsqrt.f32 %v173_v14 }
 0x1c6   :  { %v9263_v25 = vpop.eup %9262 }
 0x1c7   :  { %v182_v26 = vrot.slane %v9263_v25, %v9660_v35 }
 0x1c9   :  { %v184_v28 = vmul.f32 %v182_v26, %v9663_v39 }
 0x1cb   :  { %v204_v30 = vmul.f32 %v202_v27, %v184_v28 }
 0x1cd   :  { %v224_v31 = vadd.f32 %v222_v29, %v204_v30 }
 0x1cf   :  { %v9693_v32 = vrot.slane %v224_v31, %v9654_v5 }
 0x1d1   :  { %v9697_v33 = vcombine.high %v9693_v32, %v9693_v32  ;;  %v236_v35 = vpack.c.bf16 %v9693_v32, %v9693_v32 }
 0x1d3   :  { %v237_v34 = vpack.c.bf16 %v9697_v33, %v9697_v33 }
 0x1d5   :  { %590 = vmatprep.mubr.bf16.mxu0 %v237_v34  ;;  %631 = vmatprep.mubr.bf16.mxu1 %v237_v34 }
 0x1d6   :  { %591 = vmatmul.mubr.bf16.vlgmr.msra.gmra.mrb[0].mxu0 %v236_v35  ;;  %632 = vmatmul.mubr.bf16.vlgmr.msra.gmra.mrb[0].mxu1 %v236_v35  ;;  %v989_v35 = vld [vmem:[#allocation11] sm:$0xff] }
 0x1d7   :  { %8663 = vmatprep.mubr.msk.f32.mxu0 %vm9518_vm1, %v9517_v36  ;;  %905 = vmatpush1.bf16.msra.mxu1 %v8766_v54 }
 0x1d8   :  { %906 = vmatprep.subr.bf16.mxu1 %v8771_v56  ;;  %936 = vmatprep.mubr.bf16.mxu1 %v9519_v11  ;;  %v1045_v56 = vld [vmem:[#allocation11 + $0x1c0] sm:$0xff] }
 0x1db   :  { %907 = vmatpush1.bf16.msra.mxu1 %v8769_v57  ;;  %v1038_v57 = vld [vmem:[#allocation11 + $0x188] sm:$0xff] }
 0x1dc   :  { %908 = vmatprep.subr.bf16.mxu1 %v8774_v58  ;;  %v1046_v58 = vld [vmem:[#allocation11 + $0x1c8] sm:$0xff] }
 0x1df   :  { %909 = vmatpush1.bf16.msra.mxu1 %v8772_v59 }
 0x1e0   :  { %910 = vmatprep.subr.bf16.mxu1 %v8777_v60 }
 0x1e3   :  { %911 = vmatpush1.bf16.msra.mxu1 %v8775_v61  ;;  %v7823_v61 = vcombine.high %v1037_v55, %v1045_v56 }
 0x1e4   :  { %912 = vmatprep.subr.bf16.mxu1 %v8780_v62  ;;  %v7825_v62 = vcombine.high %v1038_v57, %v1046_v58 }
 0x1e7   :  { %913 = vmatpush1.bf16.msra.mxu1 %v8778_v63  ;;  %v1053_v63 = vld [vmem:[#allocation11 + $0x200] sm:$0xff] }
 0x1e8   :  { %914 = vmatprep.subr.bf16.mxu1 %v8783_v0  ;;  %v1061_v0 = vld [vmem:[#allocation11 + $0x240] sm:$0xff] }
 0x1eb   :  { %915 = vmatpush1.bf16.msra.mxu1 %v8781_v1  ;;  %v1054_v1 = vld [vmem:[#allocation11 + $0x208] sm:$0xff] }
 0x1ec   :  { %916 = vmatprep.subr.bf16.mxu1 %v8786_v2  ;;  %v1062_v2 = vld [vmem:[#allocation11 + $0x248] sm:$0xff] }
 0x1ef   :  { %917 = vmatpush1.bf16.msra.mxu1 %v8784_v4  ;;  %v7822_v4 = vcombine.low %v1037_v55, %v1045_v56 }
 0x1f0   :  { %918 = vmatprep.subr.bf16.mxu1 %v8789_v6  ;;  %v7824_v6 = vcombine.low %v1038_v57, %v1046_v58  ;;  %v1149_v57 = vld [vmem:[#allocation11 + $0x500] sm:$0xff] }
 0x1f1   :  { %v1157_v58 = vld [vmem:[#allocation11 + $0x540] sm:$0xff] }
 0x1f3   :  { %919 = vmatpush1.bf16.msra.mxu1 %v8787_v7  ;;  %v7839_v7 = vcombine.high %v1053_v63, %v1061_v0 }
 0x2a9   :  { %v592_v5 = vpop.f32.mrb[0].mxu0  ;;  %v8625_v37 = vpop.f32.mrb[0].mxu1 }
 0x2aa   :  { %v594_v38 = vpop.f32.mrb[1].mxu0  ;;  %v8626_v39 = vpop.f32.mrb[1].mxu1 }
 0x2ab   :  { %v8627_v40 = vadd.f32 %v8626_v39, %v8625_v37  ;;  %v596_v41 = vpop.f32.mrb[2].mxu0  ;;  %v8628_v42 = vpop.f32.mrb[2].mxu1  ;;  %8662 = vmatpush3.xpose.msra.mxu0 %v594_v38  ;;  %v990_v37 = vld [vmem:[#allocation11 + $0x8] sm:$0xff] }
 0x2ac   :  { %v597_v43 = vpop.f32.mrb[3].mxu0  ;;  %v8629_v44 = vpop.f32.mrb[3].mxu1  ;;  %8666 = vmatprep.subr.mxu0 %v9517_v36  ;;  %v1013_v41 = vld [vmem:[#allocation11 + $0xc0] sm:$0xff] }
 0x2ad   :  { %v1006_v44 = vld [vmem:[#allocation11 + $0x88] sm:$0xff] }
 0x2ae   :  { %8664 = vmatmul.mubr.f32.vlgmr.msra.gmra.mrb[4].mxu0 %v592_v5  ;;  %v997_v5 = vld [vmem:[#allocation11 + $0x40] sm:$0xff] }
 0x2af   :  { %8667 = vmatpush3.msk.msra.mxu0 %vm137_vm0, %v8627_v40  ;;  %8668 = vmatprep.mubr.msk.f32.mxu0 %vm9518_vm1, %v9517_v36  ;;  %v7774_v38 = vcombine.low %v989_v35, %v997_v5  ;;  %v7775_v39 = vcombine.high %v989_v35, %v997_v5  ;;  %v998_v40 = vld [vmem:[#allocation11 + $0x48] sm:$0xff]  ;;  %v1101_v35 = vld [vmem:[#allocation11 + $0x380] sm:$0xff] }
 0x2b0   :  { %v7776_v42 = vcombine.low %v990_v37, %v998_v40  ;;  %v7777_v43 = vcombine.high %v990_v37, %v998_v40  ;;  %v1109_v5 = vld [vmem:[#allocation11 + $0x3c0] sm:$0xff]  ;;  %v1102_v37 = vld [vmem:[#allocation11 + $0x388] sm:$0xff] }
 0x2b1   :  { %2607 = vmatprep.subr.bf16.mxu0 %v7775_v39 }
 0x2b2   :  { %2648 = vmatprep.subr.bf16.mxu1 %v7777_v43  ;;  %v1125_v43 = vld [vmem:[#allocation11 + $0x440] sm:$0xff] }
 0x381   :  { %v705_v45 = vpop.f32.mrb[4].mxu0 }
 0x382   :  { %v709_v46 = vmul.f32 0.70710677, %v705_v45  ;;  %v8665_v47 = vpop.f32.mrb[5].mxu0  ;;  %v1014_v45 = vld [vmem:[#allocation11 + $0xc8] sm:$0xff] }
 0x383   :  { %v7793_v47 = vcombine.high %v1006_v44, %v1014_v45 }
 0x384   :  { %v711_v48 = vsel %vm710_vm2, %v709_v46, -inf }
 0x385   :  { %712 = vmax.xlane.f32.xlu1 %v711_v48  ;;  %v1029_v48 = vld [vmem:[#allocation11 + $0x140] sm:$0xff] }
 0x412   :  { %v713_v49 = vpop.xlane.xlu1 %712 }
 0x413   :  { %v714_v50 = vsub.f32 %v709_v46, %v713_v49  ;;  %v1021_v46 = vld [vmem:[#allocation11 + $0x100] sm:$0xff]  ;;  %v1022_v49 = vld [vmem:[#allocation11 + $0x108] sm:$0xff] }
 0x414   :  { %v7806_v59 = vcombine.low %v1021_v46, %v1029_v48 }
 0x415   :  { %v715_v51 = vmul.f32 1.442695, %v714_v50  ;;  %v1030_v50 = vld [vmem:[#allocation11 + $0x148] sm:$0xff] }
 0x416   :  { %v7809_v54 = vcombine.high %v1022_v49, %v1030_v50  ;;  %v7808_v60 = vcombine.low %v1022_v49, %v1030_v50  ;;  %v1133_v49 = vld [vmem:[#allocation11 + $0x480] sm:$0xff] }
 0x417   :  { %9264 = vpow2.f32 %v715_v51  ;;  %v1141_v50 = vld [vmem:[#allocation11 + $0x4c0] sm:$0xff] }
 0x418   :  { %v7919_v55 = vcombine.high %v1133_v49, %v1141_v50 }
 0x421   :  { %v9265_v52 = vpop.eup %9264 }
 0x422   :  { %v717_v53 = vsel %vm710_vm2, %v9265_v52, 0.0 }
 0x423   :  { %718 = vadd.xlane.f32.xlu1 %v717_v53  ;;  %v7807_v53 = vcombine.high %v1021_v46, %v1029_v48 }
 0x4b0   :  { %v719_v8 = vpop.xlane.xlu1 %718 }
 0x4b1   :  { %9266 = vrcp.f32 %v719_v8  ;;  %v7841_v8 = vcombine.high %v1054_v1, %v1062_v2 }
 0x4bb   :  { %v9267_v9 = vpop.eup %9266 }
 0x4bc   :  { %v721_v10 = vmul.f32 %v9267_v9, %v9265_v52  ;;  %v7792_v52 = vcombine.low %v1006_v44, %v1014_v45  ;;  %v1069_v9 = vld [vmem:[#allocation11 + $0x280] sm:$0xff]  ;;  %v1126_v44 = vld [vmem:[#allocation11 + $0x448] sm:$0xff]  ;;  %v7886_v45 = vcombine.low %v1101_v35, %v1109_v5 }
 0x4be   :  { %8669 = vmatmul.mubr.msk.f32.vlgmr.msra.gmra.mrb[6].mxu0 %vm722_vm3, %v721_v10  ;;  %v1077_v10 = vld [vmem:[#allocation11 + $0x2c0] sm:$0xff] }
 0x4bf   :  { %2608 = vmatpush1.bf16.msra.mxu0 %v7774_v38  ;;  %v1110_v38 = vld [vmem:[#allocation11 + $0x3c8] sm:$0xff] }
 0x4c0   :  { %v7888_v46 = vcombine.low %v1102_v37, %v1110_v38 }
 0x591   :  { %v795_v12 = vpop.f32.mrb[6].mxu0 }
 0x592   :  { %v799_v13 = vpack.c.bf16 %v795_v12, %v795_v12  ;;  %v8670_v14 = vpop.f32.mrb[7].mxu0  ;;  %v1070_v12 = vld [vmem:[#allocation11 + $0x288] sm:$0xff] }
 0x593   :  { %v7838_v14 = vcombine.low %v1053_v63, %v1061_v0  ;;  %v7935_v63 = vcombine.high %v1149_v57, %v1157_v58 }
 0x594   :  { %937 = vmatmul.mubr.bf16.vlgmr.msra.gmra.mrb[4].mxu1 %v799_v13  ;;  %v1078_v13 = vld [vmem:[#allocation11 + $0x2c8] sm:$0xff] }
 0x595   :  { %2649 = vmatpush1.bf16.msra.mxu1 %v7776_v42  ;;  %v1117_v42 = vld [vmem:[#allocation11 + $0x400] sm:$0xff] }
 0x596   :  { %2650 = vmatprep.subr.bf16.mxu1 %v7793_v47  ;;  %v7903_v47 = vcombine.high %v1117_v42, %v1125_v43 }
 0x599   :  { %2651 = vmatpush1.bf16.msra.mxu1 %v7792_v52  ;;  %v1142_v52 = vld [vmem:[#allocation11 + $0x4c8] sm:$0xff] }
 0x59a   :  { %2652 = vmatprep.subr.bf16.mxu1 %v7809_v54 }
 0x59d   :  { %2653 = vmatpush1.bf16.msra.mxu1 %v7808_v60  ;;  %v1158_v60 = vld [vmem:[#allocation11 + $0x548] sm:$0xff] }
 0x59e   :  { %2654 = vmatprep.subr.bf16.mxu1 %v7825_v62 }
 0x5a1   :  { %2655 = vmatpush1.bf16.msra.mxu1 %v7824_v6 }
 0x5a2   :  { %2656 = vmatprep.subr.bf16.mxu1 %v7841_v8 }
 0x667   :  { %v938_v22 = vpop.f32.mrb[4].mxu1 }
 0x668   :  { %v939_v23 = vadd.f32 %v938_v22, %v819_v20  ;;  %v940_v24 = vpop.f32.mrb[5].mxu1  ;;  %v7840_v20 = vcombine.low %v1054_v1, %v1062_v2  ;;  %v7857_v22 = vcombine.high %v1070_v12, %v1078_v13  ;;  %v7934_v1 = vcombine.low %v1149_v57, %v1157_v58 }
 0x669   :  { %v941_v25 = vadd.f32 %v940_v24, %v823_v21  ;;  %v942_v26 = vpop.f32.mrb[6].mxu1  ;;  %v7855_v21 = vcombine.high %v1069_v9, %v1077_v10  ;;  %v1093_v24 = vld [vmem:[#allocation11 + $0x340] sm:$0xff] }
 0x66a   :  { %v9722_v27 = vadd.f32 %v939_v23, %v9693_v32  ;;  %v943_v28 = vpop.f32.mrb[7].mxu1  ;;  %v1005_v32 = vld [vmem:[#allocation11 + $0x80] sm:$0xff]  ;;  %v1094_v26 = vld [vmem:[#allocation11 + $0x348] sm:$0xff]  ;;  %2657 = vmatpush1.bf16.msra.mxu1 %v7840_v20 }
 0x66b   :  { %v9725_v29 = vadd.f32 %v941_v25, %v9697_v33  ;;  %v7791_v33 = vcombine.high %v1005_v32, %v1013_v41  ;;  %v7790_v51 = vcombine.low %v1005_v32, %v1013_v41  ;;  %v1085_v23 = vld [vmem:[#allocation11 + $0x300] sm:$0xff]  ;;  %v1086_v25 = vld [vmem:[#allocation11 + $0x308] sm:$0xff]  ;;  %v7854_v28 = vcombine.low %v1069_v9, %v1077_v10  ;;  %2658 = vmatprep.subr.bf16.mxu1 %v7857_v22 }
 0x66c   :  { %v947_v30 = vsel %vm137_vm0, %v9722_v27, 0.0  ;;  %v7870_v39 = vcombine.low %v1085_v23, %v1093_v24  ;;  %v7872_v40 = vcombine.low %v1086_v25, %v1094_v26  ;;  %v7887_v32 = vcombine.high %v1101_v35, %v1109_v5  ;;  %v1165_v20 = vld [vmem:[#allocation11 + $0x580] sm:$0xff]  ;;  %v1166_v22 = vld [vmem:[#allocation11 + $0x588] sm:$0xff] }
 0x66d   :  { %v948_v31 = vsel %vm137_vm0, %v9725_v29, 0.0  ;;  %2609 = vmatprep.subr.bf16.mxu0 %v7791_v33  ;;  %v7889_v41 = vcombine.high %v1102_v37, %v1110_v38  ;;  %v1118_v33 = vld [vmem:[#allocation11 + $0x408] sm:$0xff]  ;;  %v1197_v38 = vld [vmem:[#allocation11 + $0x680] sm:$0xff] }
 0x66e   :  { %v949_v34 = vadd.f32 %v948_v31, %v947_v30  ;;  %2610 = vmatpush1.bf16.msra.mxu0 %v7790_v51  ;;  %v7856_v30 = vcombine.low %v1070_v12, %v1078_v13  ;;  %v7871_v31 = vcombine.high %v1085_v23, %v1093_v24  ;;  %v7905_v48 = vcombine.high %v1118_v33, %v1126_v44  ;;  %v1134_v51 = vld [vmem:[#allocation11 + $0x488] sm:$0xff] }
 0x66f   :  { %2611 = vmatprep.subr.bf16.mxu0 %v7807_v53  ;;  %v7902_v53 = vcombine.low %v1117_v42, %v1125_v43  ;;  %v7904_v54 = vcombine.low %v1118_v33, %v1126_v44  ;;  %v7921_v56 = vcombine.high %v1134_v51, %v1142_v52  ;;  %v7920_v62 = vcombine.low %v1134_v51, %v1142_v52  ;;  %v1174_v23 = vld [vmem:[#allocation11 + $0x5c8] sm:$0xff]  ;;  %v1213_v44 = vld [vmem:[#allocation11 + $0x700] sm:$0xff] }
 0x670   :  { %950 = vadd.xlane.f32.xlu0 %v949_v34  ;;  %v7873_v34 = vcombine.high %v1086_v25, %v1094_v26  ;;  %2659 = vmatpush1.bf16.msra.mxu1 %v7856_v30  ;;  %v7953_v25 = vcombine.high %v1166_v22, %v1174_v23  ;;  %v1181_v26 = vld [vmem:[#allocation11 + $0x600] sm:$0xff]  ;;  %v1182_v30 = vld [vmem:[#allocation11 + $0x608] sm:$0xff] }
 0x671   :  { %v1229_v52 = vld [vmem:[#allocation11 + $0x780] sm:$0xff] }
 0x672   :  { %2612 = vmatpush1.bf16.msra.mxu0 %v7806_v59  ;;  %2660 = vmatprep.subr.bf16.mxu1 %v7873_v34  ;;  %v1150_v59 = vld [vmem:[#allocation11 + $0x508] sm:$0xff] }
 0x673   :  { %2613 = vmatprep.subr.bf16.mxu0 %v7823_v61  ;;  %v7918_v61 = vcombine.low %v1133_v49, %v1141_v50  ;;  %v7937_v0 = vcombine.high %v1150_v59, %v1158_v60  ;;  %v7936_v2 = vcombine.low %v1150_v59, %v1158_v60  ;;  %v1190_v34 = vld [vmem:[#allocation11 + $0x648] sm:$0xff]  ;;  %v991_v60 = vld [vmem:[#allocation11 + $0x10] sm:$0xff] }
 0x674   :  { %2661 = vmatpush1.bf16.msra.mxu1 %v7872_v40  ;;  %v7968_v5 = vcombine.low %v1182_v30, %v1190_v34  ;;  %v7969_v37 = vcombine.high %v1182_v30, %v1190_v34  ;;  %v1198_v40 = vld [vmem:[#allocation11 + $0x688] sm:$0xff]  ;;  %v1007_v30 = vld [vmem:[#allocation11 + $0x90] sm:$0xff]  ;;  %v1008_v34 = vld [vmem:[#allocation11 + $0x98] sm:$0xff] }
 0x675   :  { %2662 = vmatprep.subr.bf16.mxu1 %v7889_v41  ;;  %v1206_v41 = vld [vmem:[#allocation11 + $0x6c8] sm:$0xff] }
 0x676   :  { %2614 = vmatpush1.bf16.msra.mxu0 %v7822_v4  ;;  %v7984_v43 = vcombine.low %v1198_v40, %v1206_v41  ;;  %v7985_v33 = vcombine.high %v1198_v40, %v1206_v41 }
 0x677   :  { %2615 = vmatprep.subr.bf16.mxu0 %v7839_v7 }
 0x678   :  { %2663 = vmatpush1.bf16.msra.mxu1 %v7888_v46  ;;  %v1214_v46 = vld [vmem:[#allocation11 + $0x708] sm:$0xff] }
 0x679   :  { %2664 = vmatprep.subr.bf16.mxu1 %v7905_v48  ;;  %v1222_v48 = vld [vmem:[#allocation11 + $0x748] sm:$0xff] }
 0x67a   :  { %2616 = vmatpush1.bf16.msra.mxu0 %v7838_v14  ;;  %v8000_v50 = vcombine.low %v1214_v46, %v1222_v48  ;;  %v8001_v51 = vcombine.high %v1214_v46, %v1222_v48 }
 0x67b   :  { %2617 = vmatprep.subr.bf16.mxu0 %v7855_v21  ;;  %v1173_v21 = vld [vmem:[#allocation11 + $0x5c0] sm:$0xff] }
 0x67c   :  { %2665 = vmatpush1.bf16.msra.mxu1 %v7904_v54  ;;  %v7950_v24 = vcombine.low %v1165_v20, %v1173_v21  ;;  %v1230_v54 = vld [vmem:[#allocation11 + $0x788] sm:$0xff] }
 0x67d   :  { %2666 = vmatprep.subr.bf16.mxu1 %v7921_v56  ;;  %v1238_v56 = vld [vmem:[#allocation11 + $0x7c8] sm:$0xff] }
 0x67e   :  { %2618 = vmatpush1.bf16.msra.mxu0 %v7854_v28  ;;  %v1189_v28 = vld [vmem:[#allocation11 + $0x640] sm:$0xff]  ;;  %v8016_v58 = vcombine.low %v1230_v54, %v1238_v56  ;;  %v8017_v59 = vcombine.high %v1230_v54, %v1238_v56 }
 0x67f   :  { %2619 = vmatprep.subr.bf16.mxu0 %v7871_v31  ;;  %v7967_v31 = vcombine.high %v1181_v26, %v1189_v28  ;;  %v7966_v35 = vcombine.low %v1181_v26, %v1189_v28 }
 0x680   :  { %2667 = vmatpush1.bf16.msra.mxu1 %v7920_v62  ;;  %v992_v62 = vld [vmem:[#allocation11 + $0x18] sm:$0xff] }
 0x681   :  { %2668 = vmatprep.subr.bf16.mxu1 %v7937_v0  ;;  %v1000_v0 = vld [vmem:[#allocation11 + $0x58] sm:$0xff] }
 0x682   :  { %2620 = vmatpush1.bf16.msra.mxu0 %v7870_v39  ;;  %v1205_v39 = vld [vmem:[#allocation11 + $0x6c0] sm:$0xff] }
 0x683   :  { %2621 = vmatprep.subr.bf16.mxu0 %v7887_v32  ;;  %v7983_v32 = vcombine.high %v1197_v38, %v1205_v39  ;;  %v7982_v42 = vcombine.low %v1197_v38, %v1205_v39  ;;  %v1024_v38 = vld [vmem:[#allocation11 + $0x118] sm:$0xff] }
 0x684   :  { %2669 = vmatpush1.bf16.msra.mxu1 %v7936_v2  ;;  %v7780_v2 = vcombine.low %v992_v62, %v1000_v0  ;;  %v1032_v39 = vld [vmem:[#allocation11 + $0x158] sm:$0xff] }
 0x685   :  { %2670 = vmatprep.subr.bf16.mxu1 %v7953_v25 }
 0x686   :  { %2622 = vmatpush1.bf16.msra.mxu0 %v7886_v45  ;;  %v1221_v45 = vld [vmem:[#allocation11 + $0x740] sm:$0xff] }
 0x687   :  { %2623 = vmatprep.subr.bf16.mxu0 %v7903_v47  ;;  %v7999_v47 = vcombine.high %v1213_v44, %v1221_v45  ;;  %v7998_v49 = vcombine.low %v1213_v44, %v1221_v45  ;;  %v1040_v44 = vld [vmem:[#allocation11 + $0x198] sm:$0xff] }
 0x688   :  { %v1048_v45 = vld [vmem:[#allocation11 + $0x1d8] sm:$0xff] }
 0x68a   :  { %2624 = vmatpush1.bf16.msra.mxu0 %v7902_v53  ;;  %v1237_v53 = vld [vmem:[#allocation11 + $0x7c0] sm:$0xff] }
 0x68b   :  { %2625 = vmatprep.subr.bf16.mxu0 %v7919_v55  ;;  %v8015_v55 = vcombine.high %v1229_v52, %v1237_v53  ;;  %v8014_v57 = vcombine.low %v1229_v52, %v1237_v53  ;;  %v1056_v52 = vld [vmem:[#allocation11 + $0x218] sm:$0xff] }
 0x68c   :  { %v1064_v53 = vld [vmem:[#allocation11 + $0x258] sm:$0xff] }
 0x68e   :  { %2626 = vmatpush1.bf16.msra.mxu0 %v7918_v61  ;;  %v999_v61 = vld [vmem:[#allocation11 + $0x50] sm:$0xff] }
 0x68f   :  { %2627 = vmatprep.subr.bf16.mxu0 %v7935_v63  ;;  %v7779_v63 = vcombine.high %v991_v60, %v999_v61 }
 0x692   :  { %2628 = vmatpush1.bf16.msra.mxu0 %v7934_v1  ;;  %v7778_v1 = vcombine.low %v991_v60, %v999_v61  ;;  %v1072_v60 = vld [vmem:[#allocation11 + $0x298] sm:$0xff] }
 0x693   :  { %v1080_v61 = vld [vmem:[#allocation11 + $0x2d8] sm:$0xff] }
 0x6fd   :  { %v951_v4 = vpop.xlane.xlu0 %950 }
 0x6fe   :  { %v952_v6 = vmul.f32 0.00390625, %v951_v4  ;;  %v7781_v4 = vcombine.high %v992_v62, %v1000_v0 }
 0x700   :  { %v9732_v7 = vsub.f32 %v9722_v27, %v952_v6  ;;  %v9735_v8 = vsub.f32 %v9725_v29, %v952_v6  ;;  %v7951_v27 = vcombine.high %v1165_v20, %v1173_v21  ;;  %v7952_v29 = vcombine.low %v1166_v22, %v1174_v23 }
 0x702   :  { %v955_v9 = vmul.f32 %v9732_v7, %v9732_v7  ;;  %v956_v10 = vmul.f32 %v9735_v8, %v9735_v8  ;;  %2629 = vmatprep.subr.bf16.mxu0 %v7951_v27  ;;  %2671 = vmatpush1.bf16.msra.mxu1 %v7952_v29 }
 0x703   :  { %2630 = vmatpush1.bf16.msra.mxu0 %v7950_v24  ;;  %2672 = vmatprep.subr.bf16.mxu1 %v7969_v37  ;;  %v1031_v37 = vld [vmem:[#allocation11 + $0x150] sm:$0xff] }
 0x704   :  { %v957_v12 = vsel %vm137_vm0, %v955_v9, 0.0  ;;  %v958_v13 = vsel %vm137_vm0, %v956_v10, 0.0  ;;  %2631 = vmatprep.subr.bf16.mxu0 %v7967_v31  ;;  %v1015_v31 = vld [vmem:[#allocation11 + $0xd0] sm:$0xff] }
 0x705   :  { %v959_v14 = vadd.f32 %v958_v13, %v957_v12  ;;  %v9744_v12 = vsub.s32 3, %v9651_v3  ;;  %v9747_v13 = vsub.s32 4, %v9651_v3  ;;  %v7794_v40 = vcombine.low %v1007_v30, %v1015_v31 }
 0x706   :  { %2673 = vmatpush1.bf16.msra.mxu1 %v7968_v5 }
 0x707   :  { %960 = vadd.xlane.f32.xlu1 %v959_v14  ;;  %2632 = vmatpush1.bf16.msra.mxu0 %v7966_v35  ;;  %v970_v14 = vrot.slane %v9673_v16, %v9744_v12  ;;  %v974_v20 = vrot.slane %v9675_v17, %v9744_v12  ;;  %v980_v22 = vrot.slane %v9673_v16, %v9747_v13  ;;  %v1016_v35 = vld [vmem:[#allocation11 + $0xd8] sm:$0xff] }
 0x708   :  { %2633 = vmatprep.subr.bf16.mxu0 %v7983_v32  ;;  %2674 = vmatprep.subr.bf16.mxu1 %v7985_v33  ;;  %v984_v27 = vrot.slane %v9675_v17, %v9747_v13  ;;  %v7797_v5 = vcombine.high %v1008_v34, %v1016_v35  ;;  %v7796_v32 = vcombine.low %v1008_v34, %v1016_v35  ;;  %v1047_v33 = vld [vmem:[#allocation11 + $0x1d0] sm:$0xff] }
 0x709   :  { %v1119_v34 = vld [vmem:[#allocation11 + $0x410] sm:$0xff] }
 0x70a   :  { %2675 = vmatpush1.bf16.msra.mxu1 %v7984_v43  ;;  %v1039_v43 = vld [vmem:[#allocation11 + $0x190] sm:$0xff] }
 0x70b   :  { %2634 = vmatpush1.bf16.msra.mxu0 %v7982_v42  ;;  %2676 = vmatprep.subr.bf16.mxu1 %v8001_v51  ;;  %v7813_v42 = vcombine.high %v1024_v38, %v1032_v39  ;;  %v7827_v48 = vcombine.high %v1039_v43, %v1047_v33  ;;  %v1063_v51 = vld [vmem:[#allocation11 + $0x250] sm:$0xff]  ;;  %v7826_v54 = vcombine.low %v1039_v43, %v1047_v33 }
 0x70c   :  { %2635 = vmatprep.subr.bf16.mxu0 %v7999_v47  ;;  %v7812_v47 = vcombine.low %v1024_v38, %v1032_v39  ;;  %v1127_v35 = vld [vmem:[#allocation11 + $0x450] sm:$0xff] }
 0x70d   :  { %v7907_v38 = vcombine.high %v1119_v34, %v1127_v35  ;;  %v7906_v43 = vcombine.low %v1119_v34, %v1127_v35 }
 0x70e   :  { %2677 = vmatpush1.bf16.msra.mxu1 %v8000_v50  ;;  %v1055_v50 = vld [vmem:[#allocation11 + $0x210] sm:$0xff] }
 0x70f   :  { %2636 = vmatpush1.bf16.msra.mxu0 %v7998_v49  ;;  %2678 = vmatprep.subr.bf16.mxu1 %v8017_v59  ;;  %v7829_v49 = vcombine.high %v1040_v44, %v1048_v45  ;;  %v7843_v56 = vcombine.high %v1055_v50, %v1063_v51  ;;  %v1079_v59 = vld [vmem:[#allocation11 + $0x2d0] sm:$0xff]  ;;  %v7842_v62 = vcombine.low %v1055_v50, %v1063_v51 }
 0x710   :  { %2637 = vmatprep.subr.bf16.mxu0 %v8015_v55  ;;  %v7828_v55 = vcombine.low %v1040_v44, %v1048_v45 }
 0x712   :  { %2679 = vmatpush1.bf16.msra.mxu1 %v8016_v58  ;;  %v1071_v58 = vld [vmem:[#allocation11 + $0x290] sm:$0xff] }
 0x713   :  { %2638 = vmatpush1.bf16.msra.mxu0 %v8014_v57  ;;  %2730 = vmatprep.subr.bf16.mxu1 %v7781_v4  ;;  %v7845_v57 = vcombine.high %v1056_v52, %v1064_v53  ;;  %v7859_v0 = vcombine.high %v1071_v58, %v1079_v59  ;;  %v1095_v4 = vld [vmem:[#allocation11 + $0x350] sm:$0xff] }
 0x714   :  { %2689 = vmatprep.subr.bf16.mxu0 %v7779_v63  ;;  %v7844_v63 = vcombine.low %v1056_v52, %v1064_v53 }
 0x794   :  { %v961_v6 = vpop.xlane.xlu1 %960 }
 0x795   :  { %v962_v9 = vmul.f32 0.00390625, %v961_v6  ;;  %v1088_v6 = vld [vmem:[#allocation11 + $0x318] sm:$0xff] }
 0x797   :  { %v963_v10 = vadd.f32 1e-05, %v962_v9  ;;  %v1096_v9 = vld [vmem:[#allocation11 + $0x358] sm:$0xff] }
 0x799   :  { %9268 = vrsqrt.f32 %v963_v10  ;;  %v7858_v10 = vcombine.low %v1071_v58, %v1079_v59 }
 0x7a3   :  { %v9269_v21 = vpop.eup %9268 }
 0x7a4   :  { %v965_v23 = vmul.f32 %v9269_v21, %v9732_v7  ;;  %v966_v24 = vmul.f32 %v9269_v21, %v9735_v8  ;;  %v1023_v7 = vld [vmem:[#allocation11 + $0x110] sm:$0xff]  ;;  %v7795_v8 = vcombine.high %v1007_v30, %v1015_v31  ;;  %v7877_v21 = vcombine.high %v1088_v6, %v1096_v9 }
 0x7a5   :  { %v7811_v41 = vcombine.high %v1023_v7, %v1031_v37  ;;  %v7810_v46 = vcombine.low %v1023_v7, %v1031_v37  ;;  %v1120_v7 = vld [vmem:[#allocation11 + $0x418] sm:$0xff] }
 0x7a6   :  { %v975_v29 = vmul.f32 %v970_v14, %v965_v23  ;;  %v976_v25 = vmul.f32 %v974_v20, %v966_v24  ;;  %v7860_v14 = vcombine.low %v1072_v60, %v1080_v61  ;;  %v1104_v23 = vld [vmem:[#allocation11 + $0x398] sm:$0xff] }
 0x7a7   :  { %v1112_v24 = vld [vmem:[#allocation11 + $0x3d8] sm:$0xff] }
 0x7a8   :  { %v9759_v26 = vadd.f32 %v980_v22, %v975_v29  ;;  %v9761_v28 = vadd.f32 %v984_v27, %v976_v25  ;;  %v1103_v22 = vld [vmem:[#allocation11 + $0x390] sm:$0xff]  ;;  %v7876_v25 = vcombine.low %v1088_v6, %v1096_v9  ;;  %v7893_v31 = vcombine.high %v1104_v23, %v1112_v24 }
 0x7a9   :  { %v1111_v27 = vld [vmem:[#allocation11 + $0x3d0] sm:$0xff]  ;;  %v7892_v37 = vcombine.low %v1104_v23, %v1112_v24 }
 0x7aa   :  { %v9765_v16 = vpack.c.bf16 %v9759_v26, %v9759_v26  ;;  %v9769_v17 = vpack.c.bf16 %v9761_v28, %v9761_v28  ;;  %v7891_v30 = vcombine.high %v1103_v22, %v1111_v27 }
 0x7ac   :  { %2639 = vmatprep.mubr.bf16.mxu0 %v9769_v17  ;;  %2680 = vmatprep.mubr.bf16.mxu1 %v9769_v17 }
 0x7ad   :  { %2640 = vmatmul.mubr.bf16.vlgmr.msra.gmra.mrb[8].mxu0 %v9765_v16  ;;  %2681 = vmatmul.mubr.bf16.vlgmr.msra.gmra.mrb[8].mxu1 %v9765_v16 }
 0x7ae   :  { %2690 = vmatpush1.bf16.msra.mxu0 %v7778_v1  ;;  %2731 = vmatpush1.bf16.msra.mxu1 %v7780_v2  ;;  %v7861_v1 = vcombine.high %v1072_v60, %v1080_v61  ;;  %v1087_v2 = vld [vmem:[#allocation11 + $0x310] sm:$0xff] }
 0x7af   :  { %2721 = vmatprep.mubr.bf16.mxu0 %v9769_v17  ;;  %2762 = vmatprep.mubr.bf16.mxu1 %v9769_v17  ;;  %v7875_v20 = vcombine.high %v1087_v2, %v1095_v4  ;;  %v7874_v29 = vcombine.low %v1087_v2, %v1095_v4 }
 0x7b0   :  { %2691 = vmatprep.subr.bf16.mxu0 %v7795_v8  ;;  %2732 = vmatprep.subr.bf16.mxu1 %v7797_v5  ;;  %v1128_v8 = vld [vmem:[#allocation11 + $0x458] sm:$0xff]  ;;  %v7890_v5 = vcombine.low %v1103_v22, %v1111_v27 }
 0x7b1   :  { %v7909_v39 = vcombine.high %v1120_v7, %v1128_v8  ;;  %v7908_v33 = vcombine.low %v1120_v7, %v1128_v8 }
 0x7b2   :  { %2692 = vmatpush1.bf16.msra.mxu0 %v7794_v40  ;;  %2733 = vmatpush1.bf16.msra.mxu1 %v7796_v32  ;;  %v1135_v40 = vld [vmem:[#allocation11 + $0x490] sm:$0xff] }
 0x7b3   :  { %2693 = vmatprep.subr.bf16.mxu0 %v7811_v41  ;;  %2734 = vmatprep.subr.bf16.mxu1 %v7813_v42  ;;  %v1143_v32 = vld [vmem:[#allocation11 + $0x4d0] sm:$0xff]  ;;  %v1136_v41 = vld [vmem:[#allocation11 + $0x498] sm:$0xff] }
 0x7b4   :  { %v1144_v42 = vld [vmem:[#allocation11 + $0x4d8] sm:$0xff]  ;;  %v7923_v44 = vcombine.high %v1135_v40, %v1143_v32  ;;  %v7922_v50 = vcombine.low %v1135_v40, %v1143_v32 }
 0x7b5   :  { %v7925_v45 = vcombine.high %v1136_v41, %v1144_v42  ;;  %v7924_v51 = vcombine.low %v1136_v41, %v1144_v42 }
 0x7b6   :  { %2694 = vmatpush1.bf16.msra.mxu0 %v7810_v46  ;;  %2735 = vmatpush1.bf16.msra.mxu1 %v7812_v47  ;;  %v1151_v46 = vld [vmem:[#allocation11 + $0x510] sm:$0xff] }
 0x7b7   :  { %2695 = vmatprep.subr.bf16.mxu0 %v7827_v48  ;;  %2736 = vmatprep.subr.bf16.mxu1 %v7829_v49  ;;  %v1159_v47 = vld [vmem:[#allocation11 + $0x550] sm:$0xff]  ;;  %v1152_v48 = vld [vmem:[#allocation11 + $0x518] sm:$0xff] }
 0x7b8   :  { %v1160_v49 = vld [vmem:[#allocation11 + $0x558] sm:$0xff]  ;;  %v7939_v52 = vcombine.high %v1151_v46, %v1159_v47  ;;  %v7938_v58 = vcombine.low %v1151_v46, %v1159_v47 }
 0x7b9   :  { %v7941_v53 = vcombine.high %v1152_v48, %v1160_v49  ;;  %v7940_v59 = vcombine.low %v1152_v48, %v1160_v49 }
 0x7ba   :  { %2696 = vmatpush1.bf16.msra.mxu0 %v7826_v54  ;;  %2737 = vmatpush1.bf16.msra.mxu1 %v7828_v55  ;;  %v1167_v54 = vld [vmem:[#allocation11 + $0x590] sm:$0xff] }
 0x7bb   :  { %2697 = vmatprep.subr.bf16.mxu0 %v7843_v56  ;;  %2738 = vmatprep.subr.bf16.mxu1 %v7845_v57  ;;  %v1175_v55 = vld [vmem:[#allocation11 + $0x5d0] sm:$0xff]  ;;  %v1168_v56 = vld [vmem:[#allocation11 + $0x598] sm:$0xff] }
 0x7bc   :  { %v1176_v57 = vld [vmem:[#allocation11 + $0x5d8] sm:$0xff]  ;;  %v7955_v60 = vcombine.high %v1167_v54, %v1175_v55  ;;  %v7954_v2 = vcombine.low %v1167_v54, %v1175_v55 }
 0x7bd   :  { %v7957_v61 = vcombine.high %v1168_v56, %v1176_v57  ;;  %v7956_v4 = vcombine.low %v1168_v56, %v1176_v57 }
 0x7be   :  { %2698 = vmatpush1.bf16.msra.mxu0 %v7842_v62  ;;  %2739 = vmatpush1.bf16.msra.mxu1 %v7844_v63  ;;  %v1183_v62 = vld [vmem:[#allocation11 + $0x610] sm:$0xff] }
 0x7bf   :  { %2699 = vmatprep.subr.bf16.mxu0 %v7859_v0  ;;  %2740 = vmatprep.subr.bf16.mxu1 %v7861_v1  ;;  %v1191_v63 = vld [vmem:[#allocation11 + $0x650] sm:$0xff]  ;;  %v1184_v0 = vld [vmem:[#allocation11 + $0x618] sm:$0xff] }
 0x7c0   :  { %v1192_v1 = vld [vmem:[#allocation11 + $0x658] sm:$0xff]  ;;  %v7971_v6 = vcombine.high %v1183_v62, %v1191_v63  ;;  %v7970_v22 = vcombine.low %v1183_v62, %v1191_v63 }
 0x7c1   :  { %v7973_v9 = vcombine.high %v1184_v0, %v1192_v1  ;;  %v7972_v27 = vcombine.low %v1184_v0, %v1192_v1 }
 0x7c2   :  { %2700 = vmatpush1.bf16.msra.mxu0 %v7858_v10  ;;  %2741 = vmatpush1.bf16.msra.mxu1 %v7860_v14  ;;  %v1199_v10 = vld [vmem:[#allocation11 + $0x690] sm:$0xff] }
 0x7c3   :  { %2701 = vmatprep.subr.bf16.mxu0 %v7875_v20  ;;  %2742 = vmatprep.subr.bf16.mxu1 %v7877_v21  ;;  %v1207_v14 = vld [vmem:[#allocation11 + $0x6d0] sm:$0xff]  ;;  %v1200_v20 = vld [vmem:[#allocation11 + $0x698] sm:$0xff] }
 0x7c4   :  { %v1208_v21 = vld [vmem:[#allocation11 + $0x6d8] sm:$0xff]  ;;  %v7987_v23 = vcombine.high %v1199_v10, %v1207_v14  ;;  %v7986_v34 = vcombine.low %v1199_v10, %v1207_v14 }
 0x7c5   :  { %v7989_v24 = vcombine.high %v1200_v20, %v1208_v21  ;;  %v7988_v35 = vcombine.low %v1200_v20, %v1208_v21 }
 0x7c6   :  { %2702 = vmatpush1.bf16.msra.mxu0 %v7874_v29  ;;  %2743 = vmatpush1.bf16.msra.mxu1 %v7876_v25  ;;  %v1215_v29 = vld [vmem:[#allocation11 + $0x710] sm:$0xff] }
 0x7c7   :  { %2703 = vmatprep.subr.bf16.mxu0 %v7891_v30  ;;  %2744 = vmatprep.subr.bf16.mxu1 %v7893_v31  ;;  %v1223_v25 = vld [vmem:[#allocation11 + $0x750] sm:$0xff]  ;;  %v1216_v30 = vld [vmem:[#allocation11 + $0x718] sm:$0xff] }
 0x7c8   :  { %v1224_v31 = vld [vmem:[#allocation11 + $0x758] sm:$0xff]  ;;  %v8003_v7 = vcombine.high %v1215_v29, %v1223_v25  ;;  %v8002_v40 = vcombine.low %v1215_v29, %v1223_v25 }
 0x7c9   :  { %v8005_v8 = vcombine.high %v1216_v30, %v1224_v31  ;;  %v8004_v32 = vcombine.low %v1216_v30, %v1224_v31 }
 0x7ca   :  { %2704 = vmatpush1.bf16.msra.mxu0 %v7890_v5  ;;  %2745 = vmatpush1.bf16.msra.mxu1 %v7892_v37  ;;  %v1231_v5 = vld [vmem:[#allocation11 + $0x790] sm:$0xff] }
 0x7cb   :  { %2705 = vmatprep.subr.bf16.mxu0 %v7907_v38  ;;  %2746 = vmatprep.subr.bf16.mxu1 %v7909_v39  ;;  %v1239_v37 = vld [vmem:[#allocation11 + $0x7d0] sm:$0xff]  ;;  %v1232_v38 = vld [vmem:[#allocation11 + $0x798] sm:$0xff] }
 0x7cc   :  { %v1240_v39 = vld [vmem:[#allocation11 + $0x7d8] sm:$0xff]  ;;  %v8019_v41 = vcombine.high %v1231_v5, %v1239_v37  ;;  %v8018_v46 = vcombine.low %v1231_v5, %v1239_v37 }
 0x7cd   :  { %v8021_v42 = vcombine.high %v1232_v38, %v1240_v39  ;;  %v8020_v47 = vcombine.low %v1232_v38, %v1240_v39 }
 0x7ce   :  { %2706 = vmatpush1.bf16.msra.mxu0 %v7906_v43  ;;  %2747 = vmatpush1.bf16.msra.mxu1 %v7908_v33  ;;  %v993_v43 = vld [vmem:[#allocation11 + $0x20] sm:$0xff] }
 0x7cf   :  { %2707 = vmatprep.subr.bf16.mxu0 %v7923_v44  ;;  %2748 = vmatprep.subr.bf16.mxu1 %v7925_v45  ;;  %v1001_v33 = vld [vmem:[#allocation11 + $0x60] sm:$0xff]  ;;  %v994_v44 = vld [vmem:[#allocation11 + $0x28] sm:$0xff] }
 0x7d0   :  { %v1002_v45 = vld [vmem:[#allocation11 + $0x68] sm:$0xff]  ;;  %v7783_v48 = vcombine.high %v993_v43, %v1001_v33  ;;  %v7782_v54 = vcombine.low %v993_v43, %v1001_v33 }
 0x7d1   :  { %v7785_v49 = vcombine.high %v994_v44, %v1002_v45  ;;  %v7784_v55 = vcombine.low %v994_v44, %v1002_v45 }
 0x7d2   :  { %2708 = vmatpush1.bf16.msra.mxu0 %v7922_v50  ;;  %2749 = vmatpush1.bf16.msra.mxu1 %v7924_v51  ;;  %v1009_v50 = vld [vmem:[#allocation11 + $0xa0] sm:$0xff] }
 0x7d3   :  { %2709 = vmatprep.subr.bf16.mxu0 %v7939_v52  ;;  %2750 = vmatprep.subr.bf16.mxu1 %v7941_v53  ;;  %v1017_v51 = vld [vmem:[#allocation11 + $0xe0] sm:$0xff]  ;;  %v1010_v52 = vld [vmem:[#allocation11 + $0xa8] sm:$0xff] }
 0x7d4   :  { %v1018_v53 = vld [vmem:[#allocation11 + $0xe8] sm:$0xff]  ;;  %v7799_v56 = vcombine.high %v1009_v50, %v1017_v51  ;;  %v7798_v62 = vcombine.low %v1009_v50, %v1017_v51 }
 0x7d5   :  { %v7801_v57 = vcombine.high %v1010_v52, %v1018_v53  ;;  %v7800_v63 = vcombine.low %v1010_v52, %v1018_v53 }
 0x7d6   :  { %2710 = vmatpush1.bf16.msra.mxu0 %v7938_v58  ;;  %2751 = vmatpush1.bf16.msra.mxu1 %v7940_v59  ;;  %v1025_v58 = vld [vmem:[#allocation11 + $0x120] sm:$0xff] }
 0x7d7   :  { %2711 = vmatprep.subr.bf16.mxu0 %v7955_v60  ;;  %2752 = vmatprep.subr.bf16.mxu1 %v7957_v61  ;;  %v1033_v59 = vld [vmem:[#allocation11 + $0x160] sm:$0xff]  ;;  %v1026_v60 = vld [vmem:[#allocation11 + $0x128] sm:$0xff] }
 0x7d8   :  { %v1034_v61 = vld [vmem:[#allocation11 + $0x168] sm:$0xff]  ;;  %v7815_v0 = vcombine.high %v1025_v58, %v1033_v59  ;;  %v7814_v10 = vcombine.low %v1025_v58, %v1033_v59 }
 0x7d9   :  { %v7817_v1 = vcombine.high %v1026_v60, %v1034_v61  ;;  %v7816_v14 = vcombine.low %v1026_v60, %v1034_v61 }
 0x7da   :  { %2712 = vmatpush1.bf16.msra.mxu0 %v7954_v2  ;;  %2753 = vmatpush1.bf16.msra.mxu1 %v7956_v4  ;;  %v1041_v2 = vld [vmem:[#allocation11 + $0x1a0] sm:$0xff] }
 0x7db   :  { %2713 = vmatprep.subr.bf16.mxu0 %v7971_v6  ;;  %2754 = vmatprep.subr.bf16.mxu1 %v7973_v9  ;;  %v1049_v4 = vld [vmem:[#allocation11 + $0x1e0] sm:$0xff]  ;;  %v1042_v6 = vld [vmem:[#allocation11 + $0x1a8] sm:$0xff] }
 0x7dc   :  { %v1050_v9 = vld [vmem:[#allocation11 + $0x1e8] sm:$0xff]  ;;  %v7831_v20 = vcombine.high %v1041_v2, %v1049_v4  ;;  %v7830_v29 = vcombine.low %v1041_v2, %v1049_v4 }
 0x7dd   :  { %v7833_v21 = vcombine.high %v1042_v6, %v1050_v9  ;;  %v7832_v25 = vcombine.low %v1042_v6, %v1050_v9 }
 0x7de   :  { %2714 = vmatpush1.bf16.msra.mxu0 %v7970_v22  ;;  %2755 = vmatpush1.bf16.msra.mxu1 %v7972_v27  ;;  %v1057_v22 = vld [vmem:[#allocation11 + $0x220] sm:$0xff] }
 0x7df   :  { %2715 = vmatprep.subr.bf16.mxu0 %v7987_v23  ;;  %2756 = vmatprep.subr.bf16.mxu1 %v7989_v24  ;;  %v1065_v27 = vld [vmem:[#allocation11 + $0x260] sm:$0xff]  ;;  %v1058_v23 = vld [vmem:[#allocation11 + $0x228] sm:$0xff] }
 0x7e0   :  { %v1066_v24 = vld [vmem:[#allocation11 + $0x268] sm:$0xff]  ;;  %v7847_v30 = vcombine.high %v1057_v22, %v1065_v27  ;;  %v7846_v5 = vcombine.low %v1057_v22, %v1065_v27 }
 0x7e1   :  { %v7849_v31 = vcombine.high %v1058_v23, %v1066_v24  ;;  %v7848_v37 = vcombine.low %v1058_v23, %v1066_v24 }
 0x7e2   :  { %2716 = vmatpush1.bf16.msra.mxu0 %v7986_v34  ;;  %2757 = vmatpush1.bf16.msra.mxu1 %v7988_v35  ;;  %v1073_v34 = vld [vmem:[#allocation11 + $0x2a0] sm:$0xff] }
 0x7e3   :  { %2717 = vmatprep.subr.bf16.mxu0 %v8003_v7  ;;  %2758 = vmatprep.subr.bf16.mxu1 %v8005_v8  ;;  %v1081_v35 = vld [vmem:[#allocation11 + $0x2e0] sm:$0xff]  ;;  %v1074_v7 = vld [vmem:[#allocation11 + $0x2a8] sm:$0xff] }
 0x7e4   :  { %v1082_v8 = vld [vmem:[#allocation11 + $0x2e8] sm:$0xff]  ;;  %v7863_v38 = vcombine.high %v1073_v34, %v1081_v35  ;;  %v7862_v43 = vcombine.low %v1073_v34, %v1081_v35 }
 0x7e5   :  { %v7865_v39 = vcombine.high %v1074_v7, %v1082_v8  ;;  %v7864_v33 = vcombine.low %v1074_v7, %v1082_v8 }
 0x7e6   :  { %2718 = vmatpush1.bf16.msra.mxu0 %v8002_v40  ;;  %2759 = vmatpush1.bf16.msra.mxu1 %v8004_v32  ;;  %v1089_v40 = vld [vmem:[#allocation11 + $0x320] sm:$0xff] }
 0x7e7   :  { %2719 = vmatprep.subr.bf16.mxu0 %v8019_v41  ;;  %2760 = vmatprep.subr.bf16.mxu1 %v8021_v42  ;;  %v1097_v32 = vld [vmem:[#allocation11 + $0x360] sm:$0xff]  ;;  %v1090_v41 = vld [vmem:[#allocation11 + $0x328] sm:$0xff] }
 0x7e8   :  { %v1098_v42 = vld [vmem:[#allocation11 + $0x368] sm:$0xff]  ;;  %v7879_v44 = vcombine.high %v1089_v40, %v1097_v32  ;;  %v7878_v50 = vcombine.low %v1089_v40, %v1097_v32 }
 0x7e9   :  { %v7881_v45 = vcombine.high %v1090_v41, %v1098_v42  ;;  %v7880_v51 = vcombine.low %v1090_v41, %v1098_v42 }
 0x7ea   :  { %2720 = vmatpush1.bf16.msra.mxu0 %v8018_v46  ;;  %2761 = vmatpush1.bf16.msra.mxu1 %v8020_v47  ;;  %v1105_v46 = vld [vmem:[#allocation11 + $0x3a0] sm:$0xff] }
 0x7eb   :  { %2771 = vmatprep.subr.bf16.mxu0 %v7783_v48  ;;  %2812 = vmatprep.subr.bf16.mxu1 %v7785_v49  ;;  %v1113_v47 = vld [vmem:[#allocation11 + $0x3e0] sm:$0xff]  ;;  %v1106_v48 = vld [vmem:[#allocation11 + $0x3a8] sm:$0xff] }
 0x7ec   :  { %v1114_v49 = vld [vmem:[#allocation11 + $0x3e8] sm:$0xff]  ;;  %v7895_v52 = vcombine.high %v1105_v46, %v1113_v47  ;;  %v7894_v58 = vcombine.low %v1105_v46, %v1113_v47 }
 0x7ed   :  { %2722 = vmatmul.mubr.bf16.vlgmr.msra.gmra.mrb[12].mxu0 %v9765_v16  ;;  %2763 = vmatmul.mubr.bf16.vlgmr.msra.gmra.mrb[12].mxu1 %v9765_v16  ;;  %v7897_v53 = vcombine.high %v1106_v48, %v1114_v49  ;;  %v7896_v59 = vcombine.low %v1106_v48, %v1114_v49 }
 0x7ee   :  { %2772 = vmatpush1.bf16.msra.mxu0 %v7782_v54  ;;  %2803 = vmatprep.mubr.bf16.mxu0 %v9769_v17  ;;  %v1121_v54 = vld [vmem:[#allocation11 + $0x420] sm:$0xff] }
 0x7ef   :  { %2813 = vmatpush1.bf16.msra.mxu1 %v7784_v55  ;;  %2844 = vmatprep.mubr.bf16.mxu1 %v9769_v17  ;;  %v1129_v55 = vld [vmem:[#allocation11 + $0x460] sm:$0xff] }
 0x7f0   :  { %2773 = vmatprep.subr.bf16.mxu0 %v7799_v56  ;;  %2814 = vmatprep.subr.bf16.mxu1 %v7801_v57  ;;  %v1122_v56 = vld [vmem:[#allocation11 + $0x428] sm:$0xff]  ;;  %v7911_v60 = vcombine.high %v1121_v54, %v1129_v55  ;;  %v7910_v2 = vcombine.low %v1121_v54, %v1129_v55 }
 0x7f1   :  { %v1130_v57 = vld [vmem:[#allocation11 + $0x468] sm:$0xff] }
 0x7f2   :  { %2774 = vmatpush1.bf16.msra.mxu0 %v7798_v62  ;;  %v7913_v61 = vcombine.high %v1122_v56, %v1130_v57  ;;  %v1137_v62 = vld [vmem:[#allocation11 + $0x4a0] sm:$0xff]  ;;  %v7912_v4 = vcombine.low %v1122_v56, %v1130_v57 }
 0x7f3   :  { %2815 = vmatpush1.bf16.msra.mxu1 %v7800_v63  ;;  %2775 = vmatprep.subr.bf16.mxu0 %v7815_v0  ;;  %v1145_v63 = vld [vmem:[#allocation11 + $0x4e0] sm:$0xff]  ;;  %v1138_v0 = vld [vmem:[#allocation11 + $0x4a8] sm:$0xff] }
 0x7f4   :  { %2816 = vmatprep.subr.bf16.mxu1 %v7817_v1  ;;  %v1146_v1 = vld [vmem:[#allocation11 + $0x4e8] sm:$0xff]  ;;  %v7927_v6 = vcombine.high %v1137_v62, %v1145_v63  ;;  %v7926_v22 = vcombine.low %v1137_v62, %v1145_v63 }
 0x7f5   :  { %v7929_v9 = vcombine.high %v1138_v0, %v1146_v1  ;;  %v7928_v27 = vcombine.low %v1138_v0, %v1146_v1 }
 0x7f6   :  { %2776 = vmatpush1.bf16.msra.mxu0 %v7814_v10  ;;  %v1153_v10 = vld [vmem:[#allocation11 + $0x520] sm:$0xff] }
 0x7f7   :  { %2817 = vmatpush1.bf16.msra.mxu1 %v7816_v14  ;;  %2777 = vmatprep.subr.bf16.mxu0 %v7831_v20  ;;  %v1161_v14 = vld [vmem:[#allocation11 + $0x560] sm:$0xff]  ;;  %v1154_v20 = vld [vmem:[#allocation11 + $0x528] sm:$0xff] }
 0x7f8   :  { %2818 = vmatprep.subr.bf16.mxu1 %v7833_v21  ;;  %v1162_v21 = vld [vmem:[#allocation11 + $0x568] sm:$0xff]  ;;  %v7943_v23 = vcombine.high %v1153_v10, %v1161_v14  ;;  %v7942_v34 = vcombine.low %v1153_v10, %v1161_v14 }
 0x7f9   :  { %v7945_v24 = vcombine.high %v1154_v20, %v1162_v21  ;;  %v7944_v35 = vcombine.low %v1154_v20, %v1162_v21 }
 0x7fa   :  { %2778 = vmatpush1.bf16.msra.mxu0 %v7830_v29  ;;  %v1169_v29 = vld [vmem:[#allocation11 + $0x5a0] sm:$0xff] }
 0x7fb   :  { %2819 = vmatpush1.bf16.msra.mxu1 %v7832_v25  ;;  %2779 = vmatprep.subr.bf16.mxu0 %v7847_v30  ;;  %v1177_v25 = vld [vmem:[#allocation11 + $0x5e0] sm:$0xff]  ;;  %v1170_v30 = vld [vmem:[#allocation11 + $0x5a8] sm:$0xff] }
 0x7fc   :  { %2820 = vmatprep.subr.bf16.mxu1 %v7849_v31  ;;  %v1178_v31 = vld [vmem:[#allocation11 + $0x5e8] sm:$0xff]  ;;  %v7959_v7 = vcombine.high %v1169_v29, %v1177_v25  ;;  %v7958_v40 = vcombine.low %v1169_v29, %v1177_v25  ;;  %v1020_v29 = vld [vmem:[#allocation11 + $0xf8] sm:$0xff] }
 0x7fd   :  { %v7961_v8 = vcombine.high %v1170_v30, %v1178_v31  ;;  %v7960_v32 = vcombine.low %v1170_v30, %v1178_v31  ;;  %v1027_v31 = vld [vmem:[#allocation11 + $0x130] sm:$0xff] }
 0x7fe   :  { %2780 = vmatpush1.bf16.msra.mxu0 %v7846_v5  ;;  %v1185_v5 = vld [vmem:[#allocation11 + $0x620] sm:$0xff] }
 0x7ff   :  { %2821 = vmatpush1.bf16.msra.mxu1 %v7848_v37  ;;  %2781 = vmatprep.subr.bf16.mxu0 %v7863_v38  ;;  %v1193_v37 = vld [vmem:[#allocation11 + $0x660] sm:$0xff]  ;;  %v1186_v38 = vld [vmem:[#allocation11 + $0x628] sm:$0xff] }
 0x800   :  { %2822 = vmatprep.subr.bf16.mxu1 %v7865_v39  ;;  %v1194_v39 = vld [vmem:[#allocation11 + $0x668] sm:$0xff]  ;;  %v7975_v41 = vcombine.high %v1185_v5, %v1193_v37  ;;  %v7974_v46 = vcombine.low %v1185_v5, %v1193_v37 }
 0x801   :  { %v7977_v42 = vcombine.high %v1186_v38, %v1194_v39  ;;  %v7976_v47 = vcombine.low %v1186_v38, %v1194_v39 }
 0x802   :  { %2782 = vmatpush1.bf16.msra.mxu0 %v7862_v43  ;;  %v1201_v43 = vld [vmem:[#allocation11 + $0x6a0] sm:$0xff] }
 0x803   :  { %2823 = vmatpush1.bf16.msra.mxu1 %v7864_v33  ;;  %2783 = vmatprep.subr.bf16.mxu0 %v7879_v44  ;;  %v1209_v33 = vld [vmem:[#allocation11 + $0x6e0] sm:$0xff]  ;;  %v1202_v44 = vld [vmem:[#allocation11 + $0x6a8] sm:$0xff] }
 0x804   :  { %2824 = vmatprep.subr.bf16.mxu1 %v7881_v45  ;;  %v1210_v45 = vld [vmem:[#allocation11 + $0x6e8] sm:$0xff]  ;;  %v7991_v48 = vcombine.high %v1201_v43, %v1209_v33  ;;  %v7990_v54 = vcombine.low %v1201_v43, %v1209_v33 }
 0x805   :  { %v7993_v49 = vcombine.high %v1202_v44, %v1210_v45  ;;  %v7992_v55 = vcombine.low %v1202_v44, %v1210_v45 }
 0x806   :  { %2784 = vmatpush1.bf16.msra.mxu0 %v7878_v50  ;;  %v1217_v50 = vld [vmem:[#allocation11 + $0x720] sm:$0xff] }
 0x807   :  { %2825 = vmatpush1.bf16.msra.mxu1 %v7880_v51  ;;  %2785 = vmatprep.subr.bf16.mxu0 %v7895_v52  ;;  %v1225_v51 = vld [vmem:[#allocation11 + $0x760] sm:$0xff]  ;;  %v1218_v52 = vld [vmem:[#allocation11 + $0x728] sm:$0xff] }
 0x808   :  { %2826 = vmatprep.subr.bf16.mxu1 %v7897_v53  ;;  %v1226_v53 = vld [vmem:[#allocation11 + $0x768] sm:$0xff]  ;;  %v8007_v56 = vcombine.high %v1217_v50, %v1225_v51  ;;  %v8006_v62 = vcombine.low %v1217_v50, %v1225_v51 }
 0x809   :  { %v8009_v57 = vcombine.high %v1218_v52, %v1226_v53  ;;  %v8008_v63 = vcombine.low %v1218_v52, %v1226_v53  ;;  %v1075_v53 = vld [vmem:[#allocation11 + $0x2b0] sm:$0xff] }
 0x80a   :  { %2786 = vmatpush1.bf16.msra.mxu0 %v7894_v58  ;;  %v1233_v58 = vld [vmem:[#allocation11 + $0x7a0] sm:$0xff] }
 0x80b   :  { %2827 = vmatpush1.bf16.msra.mxu1 %v7896_v59  ;;  %2787 = vmatprep.subr.bf16.mxu0 %v7911_v60  ;;  %v1241_v59 = vld [vmem:[#allocation11 + $0x7e0] sm:$0xff]  ;;  %v1234_v60 = vld [vmem:[#allocation11 + $0x7a8] sm:$0xff] }
 0x80c   :  { %2828 = vmatprep.subr.bf16.mxu1 %v7913_v61  ;;  %v1242_v61 = vld [vmem:[#allocation11 + $0x7e8] sm:$0xff]  ;;  %v8023_v0 = vcombine.high %v1233_v58, %v1241_v59  ;;  %v8022_v10 = vcombine.low %v1233_v58, %v1241_v59 }
 0x80d   :  { %v8025_v1 = vcombine.high %v1234_v60, %v1242_v61  ;;  %v8024_v14 = vcombine.low %v1234_v60, %v1242_v61  ;;  %v1091_v61 = vld [vmem:[#allocation11 + $0x330] sm:$0xff] }
 0x80e   :  { %2788 = vmatpush1.bf16.msra.mxu0 %v7910_v2  ;;  %v995_v2 = vld [vmem:[#allocation11 + $0x30] sm:$0xff] }
 0x80f   :  { %2829 = vmatpush1.bf16.msra.mxu1 %v7912_v4  ;;  %2789 = vmatprep.subr.bf16.mxu0 %v7927_v6  ;;  %v1003_v4 = vld [vmem:[#allocation11 + $0x70] sm:$0xff]  ;;  %v996_v6 = vld [vmem:[#allocation11 + $0x38] sm:$0xff] }
 0x810   :  { %2830 = vmatprep.subr.bf16.mxu1 %v7929_v9  ;;  %v1004_v9 = vld [vmem:[#allocation11 + $0x78] sm:$0xff]  ;;  %v7787_v20 = vcombine.high %v995_v2, %v1003_v4 }
 0x811   :  { %v7789_v21 = vcombine.high %v996_v6, %v1004_v9  ;;  %v7788_v25 = vcombine.low %v996_v6, %v1004_v9  ;;  %v1107_v9 = vld [vmem:[#allocation11 + $0x3b0] sm:$0xff] }
 0x812   :  { %2790 = vmatpush1.bf16.msra.mxu0 %v7926_v22  ;;  %v1011_v22 = vld [vmem:[#allocation11 + $0xb0] sm:$0xff] }
 0x813   :  { %2831 = vmatpush1.bf16.msra.mxu1 %v7928_v27  ;;  %2791 = vmatprep.subr.bf16.mxu0 %v7943_v23  ;;  %v1019_v27 = vld [vmem:[#allocation11 + $0xf0] sm:$0xff]  ;;  %v7786_v23 = vcombine.low %v995_v2, %v1003_v4 }
 0x814   :  { %2832 = vmatprep.subr.bf16.mxu1 %v7945_v24  ;;  %v1012_v24 = vld [vmem:[#allocation11 + $0xb8] sm:$0xff]  ;;  %v7803_v30 = vcombine.high %v1011_v22, %v1019_v27  ;;  %v7802_v5 = vcombine.low %v1011_v22, %v1019_v27 }
 0x815   :  { %v7804_v37 = vcombine.low %v1012_v24, %v1020_v29 }
 0x816   :  { %2792 = vmatpush1.bf16.msra.mxu0 %v7942_v34  ;;  %v1035_v34 = vld [vmem:[#allocation11 + $0x170] sm:$0xff] }
 0x817   :  { %2833 = vmatpush1.bf16.msra.mxu1 %v7944_v35  ;;  %2793 = vmatprep.subr.bf16.mxu0 %v7959_v7  ;;  %v7805_v35 = vcombine.high %v1012_v24, %v1020_v29  ;;  %v1028_v7 = vld [vmem:[#allocation11 + $0x138] sm:$0xff]  ;;  %v7819_v38 = vcombine.high %v1027_v31, %v1035_v34  ;;  %v7818_v43 = vcombine.low %v1027_v31, %v1035_v34  ;;  %v1123_v24 = vld [vmem:[#allocation11 + $0x430] sm:$0xff] }
 0x818   :  { %2834 = vmatprep.subr.bf16.mxu1 %v7961_v8  ;;  %v1036_v8 = vld [vmem:[#allocation11 + $0x178] sm:$0xff]  ;;  %v1131_v29 = vld [vmem:[#allocation11 + $0x470] sm:$0xff] }
 0x819   :  { %v7821_v39 = vcombine.high %v1028_v7, %v1036_v8  ;;  %v7820_v33 = vcombine.low %v1028_v7, %v1036_v8  ;;  %v1139_v8 = vld [vmem:[#allocation11 + $0x4b0] sm:$0xff] }
 0x81a   :  { %2794 = vmatpush1.bf16.msra.mxu0 %v7958_v40  ;;  %v1043_v40 = vld [vmem:[#allocation11 + $0x1b0] sm:$0xff] }
 0x81b   :  { %2835 = vmatpush1.bf16.msra.mxu1 %v7960_v32  ;;  %2795 = vmatprep.subr.bf16.mxu0 %v7975_v41  ;;  %v1051_v32 = vld [vmem:[#allocation11 + $0x1f0] sm:$0xff]  ;;  %v1044_v41 = vld [vmem:[#allocation11 + $0x1b8] sm:$0xff] }
 0x81c   :  { %2836 = vmatprep.subr.bf16.mxu1 %v7977_v42  ;;  %v1052_v42 = vld [vmem:[#allocation11 + $0x1f8] sm:$0xff]  ;;  %v7835_v44 = vcombine.high %v1043_v40, %v1051_v32 }
 0x81d   :  { %v7837_v45 = vcombine.high %v1044_v41, %v1052_v42  ;;  %v7836_v50 = vcombine.low %v1044_v41, %v1052_v42  ;;  %v1155_v42 = vld [vmem:[#allocation11 + $0x530] sm:$0xff] }
 0x81e   :  { %2796 = vmatpush1.bf16.msra.mxu0 %v7974_v46  ;;  %v1059_v46 = vld [vmem:[#allocation11 + $0x230] sm:$0xff] }
 0x81f   :  { %2837 = vmatpush1.bf16.msra.mxu1 %v7976_v47  ;;  %2797 = vmatprep.subr.bf16.mxu0 %v7991_v48  ;;  %v1067_v47 = vld [vmem:[#allocation11 + $0x270] sm:$0xff]  ;;  %v1060_v48 = vld [vmem:[#allocation11 + $0x238] sm:$0xff] }
 0x820   :  { %2838 = vmatprep.subr.bf16.mxu1 %v7993_v49  ;;  %v1068_v49 = vld [vmem:[#allocation11 + $0x278] sm:$0xff]  ;;  %v7851_v51 = vcombine.high %v1059_v46, %v1067_v47 }
 0x821   :  { %v7853_v52 = vcombine.high %v1060_v48, %v1068_v49  ;;  %v7852_v58 = vcombine.low %v1060_v48, %v1068_v49  ;;  %v1171_v49 = vld [vmem:[#allocation11 + $0x5b0] sm:$0xff] }
 0x822   :  { %2798 = vmatpush1.bf16.msra.mxu0 %v7990_v54  ;;  %v1083_v54 = vld [vmem:[#allocation11 + $0x2f0] sm:$0xff] }
 0x823   :  { %2839 = vmatpush1.bf16.msra.mxu1 %v7992_v55  ;;  %2799 = vmatprep.subr.bf16.mxu0 %v8007_v56  ;;  %v1076_v55 = vld [vmem:[#allocation11 + $0x2b8] sm:$0xff]  ;;  %v7867_v59 = vcombine.high %v1075_v53, %v1083_v54 }
 0x824   :  { %2840 = vmatprep.subr.bf16.mxu1 %v8009_v57  ;;  %v1084_v56 = vld [vmem:[#allocation11 + $0x2f8] sm:$0xff]  ;;  %v7850_v57 = vcombine.low %v1059_v46, %v1067_v47 }
 0x825   :  { %v7869_v60 = vcombine.high %v1076_v55, %v1084_v56  ;;  %v7868_v2 = vcombine.low %v1076_v55, %v1084_v56  ;;  %v1187_v56 = vld [vmem:[#allocation11 + $0x630] sm:$0xff] }
 0x826   :  { %2800 = vmatpush1.bf16.msra.mxu0 %v8006_v62  ;;  %v1099_v62 = vld [vmem:[#allocation11 + $0x370] sm:$0xff] }
 0x827   :  { %2841 = vmatpush1.bf16.msra.mxu1 %v8008_v63  ;;  %2801 = vmatprep.subr.bf16.mxu0 %v8023_v0  ;;  %v1092_v63 = vld [vmem:[#allocation11 + $0x338] sm:$0xff]  ;;  %v7883_v4 = vcombine.high %v1091_v61, %v1099_v62 }
 0x828   :  { %2842 = vmatprep.subr.bf16.mxu1 %v8025_v1  ;;  %v1100_v0 = vld [vmem:[#allocation11 + $0x378] sm:$0xff]  ;;  %v7866_v1 = vcombine.low %v1075_v53, %v1083_v54 }
 0x829   :  { %v7885_v6 = vcombine.high %v1092_v63, %v1100_v0  ;;  %v7884_v22 = vcombine.low %v1092_v63, %v1100_v0  ;;  %v1203_v0 = vld [vmem:[#allocation11 + $0x6b0] sm:$0xff] }
 0x82a   :  { %2802 = vmatpush1.bf16.msra.mxu0 %v8022_v10  ;;  %v1115_v10 = vld [vmem:[#allocation11 + $0x3f0] sm:$0xff] }
 0x82b   :  { %2843 = vmatpush1.bf16.msra.mxu1 %v8024_v14  ;;  %2853 = vmatprep.subr.bf16.mxu0 %v7787_v20  ;;  %v1108_v14 = vld [vmem:[#allocation11 + $0x3b8] sm:$0xff]  ;;  %v7899_v27 = vcombine.high %v1107_v9, %v1115_v10  ;;  %v7898_v31 = vcombine.low %v1107_v9, %v1115_v10 }
 0x82c   :  { %2894 = vmatprep.subr.bf16.mxu1 %v7789_v21  ;;  %v1116_v20 = vld [vmem:[#allocation11 + $0x3f8] sm:$0xff]  ;;  %v7882_v21 = vcombine.low %v1091_v61, %v1099_v62 }
 0x82d   :  { %2804 = vmatmul.mubr.bf16.vlgmr.msra.gmra.mrb[16].mxu0 %v9765_v16  ;;  %v7900_v34 = vcombine.low %v1108_v14, %v1116_v20 }
 0x82e   :  { %2845 = vmatmul.mubr.bf16.vlgmr.msra.gmra.mrb[16].mxu1 %v9765_v16  ;;  %2854 = vmatpush1.bf16.msra.mxu0 %v7786_v23  ;;  %v7901_v23 = vcombine.high %v1108_v14, %v1116_v20  ;;  %v1219_v20 = vld [vmem:[#allocation11 + $0x730] sm:$0xff] }
 0x82f   :  { %2885 = vmatprep.mubr.bf16.mxu0 %v9769_v17  ;;  %2895 = vmatpush1.bf16.msra.mxu1 %v7788_v25  ;;  %v1124_v25 = vld [vmem:[#allocation11 + $0x438] sm:$0xff] }
 0x830   :  { %2926 = vmatprep.mubr.bf16.mxu1 %v9769_v17  ;;  %2855 = vmatprep.subr.bf16.mxu0 %v7803_v30  ;;  %v7834_v17 = vcombine.low %v1043_v40, %v1051_v32  ;;  %v1132_v30 = vld [vmem:[#allocation11 + $0x478] sm:$0xff] }
 0x831   :  { %2896 = vmatprep.subr.bf16.mxu1 %v7805_v35  ;;  %v7915_v35 = vcombine.high %v1123_v24, %v1131_v29  ;;  %v7917_v7 = vcombine.high %v1124_v25, %v1132_v30  ;;  %v7916_v40 = vcombine.low %v1124_v25, %v1132_v30  ;;  %v1235_v30 = vld [vmem:[#allocation11 + $0x7b0] sm:$0xff] }
 0x832   :  { %2856 = vmatpush1.bf16.msra.mxu0 %v7802_v5  ;;  %v1147_v5 = vld [vmem:[#allocation11 + $0x4f0] sm:$0xff] }
 0x833   :  { %2897 = vmatpush1.bf16.msra.mxu1 %v7804_v37  ;;  %2857 = vmatprep.subr.bf16.mxu0 %v7819_v38  ;;  %v1140_v37 = vld [vmem:[#allocation11 + $0x4b8] sm:$0xff]  ;;  %v7931_v32 = vcombine.high %v1139_v8, %v1147_v5 }
 0x834   :  { %2898 = vmatprep.subr.bf16.mxu1 %v7821_v39  ;;  %v1148_v38 = vld [vmem:[#allocation11 + $0x4f8] sm:$0xff]  ;;  %v7914_v39 = vcombine.low %v1123_v24, %v1131_v29 }
 0x835   :  { %v7933_v41 = vcombine.high %v1140_v37, %v1148_v38  ;;  %v7932_v46 = vcombine.low %v1140_v37, %v1148_v38 }
 0x836   :  { %2858 = vmatpush1.bf16.msra.mxu0 %v7818_v43  ;;  %v1163_v43 = vld [vmem:[#allocation11 + $0x570] sm:$0xff] }
 0x837   :  { %2899 = vmatpush1.bf16.msra.mxu1 %v7820_v33  ;;  %2859 = vmatprep.subr.bf16.mxu0 %v7835_v44  ;;  %v1156_v33 = vld [vmem:[#allocation11 + $0x538] sm:$0xff]  ;;  %v7947_v47 = vcombine.high %v1155_v42, %v1163_v43 }
 0x838   :  { %2900 = vmatprep.subr.bf16.mxu1 %v7837_v45  ;;  %v1164_v44 = vld [vmem:[#allocation11 + $0x578] sm:$0xff]  ;;  %v7930_v45 = vcombine.low %v1139_v8, %v1147_v5 }
 0x839   :  { %v7949_v48 = vcombine.high %v1156_v33, %v1164_v44  ;;  %v7948_v53 = vcombine.low %v1156_v33, %v1164_v44  ;;  %v8801_v33 = vld [vmem:[#allocation13 + $0x114] ss:$8 sps:$4 sm:$0xff]   ;;  %v8796_v44 = vld [vmem:[#allocation13 + $0x10] ss:$8 sps:$4 sm:$0xff]  }
 0x83a   :  { %2860 = vmatpush1.bf16.msra.mxu0 %v7834_v17  ;;  %v1179_v17 = vld [vmem:[#allocation11 + $0x5f0] sm:$0xff] }
 0x83b   :  { %2901 = vmatpush1.bf16.msra.mxu1 %v7836_v50  ;;  %2861 = vmatprep.subr.bf16.mxu0 %v7851_v51  ;;  %v1172_v50 = vld [vmem:[#allocation11 + $0x5b8] sm:$0xff]  ;;  %v7963_v54 = vcombine.high %v1171_v49, %v1179_v17 }
 0x83c   :  { %2902 = vmatprep.subr.bf16.mxu1 %v7853_v52  ;;  %v1180_v51 = vld [vmem:[#allocation11 + $0x5f8] sm:$0xff]  ;;  %v7946_v52 = vcombine.low %v1155_v42, %v1163_v43  ;;  %v8793_v42 = vld [vmem:[#allocation13 + $0x100] ss:$8 sps:$4 sm:$0xff]  }
 0x83d   :  { %v7965_v55 = vcombine.high %v1172_v50, %v1180_v51  ;;  %v7964_v61 = vcombine.low %v1172_v50, %v1180_v51  ;;  %v8798_v43 = vld [vmem:[#allocation13 + $0x14] ss:$8 sps:$4 sm:$0xff]   ;;  %v8808_v51 = vld [vmem:[#allocation13 + $0x30] ss:$8 sps:$4 sm:$0xff]  }
 0x83e   :  { %2862 = vmatpush1.bf16.msra.mxu0 %v7850_v57  ;;  %v1195_v57 = vld [vmem:[#allocation11 + $0x670] sm:$0xff] }
 0x83f   :  { %2903 = vmatpush1.bf16.msra.mxu1 %v7852_v58  ;;  %2863 = vmatprep.subr.bf16.mxu0 %v7867_v59  ;;  %v1188_v58 = vld [vmem:[#allocation11 + $0x638] sm:$0xff]  ;;  %v7979_v62 = vcombine.high %v1187_v56, %v1195_v57 }
 0x840   :  { %2904 = vmatprep.subr.bf16.mxu1 %v7869_v60  ;;  %v1196_v59 = vld [vmem:[#allocation11 + $0x678] sm:$0xff]  ;;  %v7962_v60 = vcombine.low %v1171_v49, %v1179_v17  ;;  %v8805_v49 = vld [vmem:[#allocation13 + $0x120] ss:$8 sps:$4 sm:$0xff]  }
 0x841   :  { %v7981_v63 = vcombine.high %v1188_v58, %v1196_v59  ;;  %v7980_v9 = vcombine.low %v1188_v58, %v1196_v59  ;;  %v8810_v17 = vld [vmem:[#allocation13 + $0x34] ss:$8 sps:$4 sm:$0xff]   ;;  %v8820_v58 = vld [vmem:[#allocation13 + $0x50] ss:$8 sps:$4 sm:$0xff]  }
 0x842   :  { %2864 = vmatpush1.bf16.msra.mxu0 %v7866_v1  ;;  %v1211_v1 = vld [vmem:[#allocation11 + $0x6f0] sm:$0xff] }
 0x843   :  { %2905 = vmatpush1.bf16.msra.mxu1 %v7868_v2  ;;  %2865 = vmatprep.subr.bf16.mxu0 %v7883_v4  ;;  %v1204_v2 = vld [vmem:[#allocation11 + $0x6b8] sm:$0xff]  ;;  %v7995_v10 = vcombine.high %v1203_v0, %v1211_v1 }
 0x844   :  { %2906 = vmatprep.subr.bf16.mxu1 %v7885_v6  ;;  %v1212_v4 = vld [vmem:[#allocation11 + $0x6f8] sm:$0xff]  ;;  %v7978_v6 = vcombine.low %v1187_v56, %v1195_v57 }
 0x845   :  { %v7997_v14 = vcombine.high %v1204_v2, %v1212_v4  ;;  %v7996_v24 = vcombine.low %v1204_v2, %v1212_v4  ;;  %v8813_v50 = vld [vmem:[#allocation13 + $0x134] ss:$8 sps:$4 sm:$0xff]   ;;  %v8823_v59 = vld [vmem:[#allocation13 + $0x150] ss:$8 sps:$4 sm:$0xff]  }
 0x846   :  { %2866 = vmatpush1.bf16.msra.mxu0 %v7882_v21  ;;  %v1227_v21 = vld [vmem:[#allocation11 + $0x770] sm:$0xff] }
 0x847   :  { %2907 = vmatpush1.bf16.msra.mxu1 %v7884_v22  ;;  %2867 = vmatprep.subr.bf16.mxu0 %v7899_v27  ;;  %v1220_v22 = vld [vmem:[#allocation11 + $0x738] sm:$0xff]  ;;  %v8011_v29 = vcombine.high %v1219_v20, %v1227_v21 }
 0x848   :  { %2908 = vmatprep.subr.bf16.mxu1 %v7901_v23  ;;  %v1228_v27 = vld [vmem:[#allocation11 + $0x778] sm:$0xff]  ;;  %v7994_v23 = vcombine.low %v1203_v0, %v1211_v1 }
 0x849   :  { %v8013_v25 = vcombine.high %v1220_v22, %v1228_v27  ;;  %v8012_v8 = vcombine.low %v1220_v22, %v1228_v27  ;;  %v8822_v56 = vld [vmem:[#allocation13 + $0x54] ss:$8 sps:$4 sm:$0xff]   ;;  %v8832_v22 = vld [vmem:[#allocation13 + $0x70] ss:$8 sps:$4 sm:$0xff]  }
 0x84a   :  { %2868 = vmatpush1.bf16.msra.mxu0 %v7898_v31  ;;  %v1243_v31 = vld [vmem:[#allocation11 + $0x7f0] sm:$0xff] }
 0x84b   :  { %2909 = vmatpush1.bf16.msra.mxu1 %v7900_v34  ;;  %2869 = vmatprep.subr.bf16.mxu0 %v7915_v35  ;;  %v1236_v34 = vld [vmem:[#allocation11 + $0x7b8] sm:$0xff]  ;;  %v8027_v5 = vcombine.high %v1235_v30, %v1243_v31  ;;  %v8026_v38 = vcombine.low %v1235_v30, %v1243_v31 }
 0x84c   :  { %2910 = vmatprep.subr.bf16.mxu1 %v7917_v7  ;;  %v1244_v35 = vld [vmem:[#allocation11 + $0x7f8] sm:$0xff]  ;;  %v8010_v7 = vcombine.low %v1219_v20, %v1227_v21 }
 0x84d   :  { %v8029_v37 = vcombine.high %v1236_v34, %v1244_v35  ;;  %v8825_v57 = vld [vmem:[#allocation13 + $0x154] ss:$8 sps:$4 sm:$0xff]   ;;  %v8835_v27 = vld [vmem:[#allocation13 + $0x170] ss:$8 sps:$4 sm:$0xff]  }
 0x84e   :  { %2870 = vmatpush1.bf16.msra.mxu0 %v7914_v39  ;;  %v8028_v39 = vcombine.low %v1236_v34, %v1244_v35  ;;  %v8834_v20 = vld [vmem:[#allocation13 + $0x74] ss:$8 sps:$4 sm:$0xff]   ;;  %v8844_v34 = vld [vmem:[#allocation13 + $0x90] ss:$8 sps:$4 sm:$0xff]  }
 0x84f   :  { %2911 = vmatpush1.bf16.msra.mxu1 %v7916_v40  ;;  %2871 = vmatprep.subr.bf16.mxu0 %v7931_v32  ;;  %v8792_v40 = vld [vmem:[#allocation13 + $0x4] ss:$8 sps:$4 sm:$0xff]   ;;  %v8837_v21 = vld [vmem:[#allocation13 + $0x174] ss:$8 sps:$4 sm:$0xff]   ;;  %v8847_v35 = vld [vmem:[#allocation13 + $0x190] ss:$8 sps:$4 sm:$0xff]  }
 0x850   :  { %2912 = vmatprep.subr.bf16.mxu1 %v7933_v41  ;;  %v8795_v32 = vld [vmem:[#allocation13 + $0x104] ss:$8 sps:$4 sm:$0xff]   ;;  %v8790_v41 = vld [vmem:[#allocation13] ss:$8 sps:$4 sm:$0xff]   ;;  %v8846_v30 = vld [vmem:[#allocation13 + $0x94] ss:$8 sps:$4 sm:$0xff]  }
 0x851   :  { %v8849_v31 = vld [vmem:[#allocation13 + $0x194] ss:$8 sps:$4 sm:$0xff]  }
 0x852   :  { %2872 = vmatpush1.bf16.msra.mxu0 %v7930_v45  ;;  %v8799_v45 = vld [vmem:[#allocation13 + $0x110] ss:$8 sps:$4 sm:$0xff]  }
 0x853   :  { %2913 = vmatpush1.bf16.msra.mxu1 %v7932_v46  ;;  %2873 = vmatprep.subr.bf16.mxu0 %v7947_v47  ;;  %v8804_v46 = vld [vmem:[#allocation13 + $0x24] ss:$8 sps:$4 sm:$0xff]  }
 0x854   :  { %2914 = vmatprep.subr.bf16.mxu1 %v7949_v48  ;;  %v8807_v47 = vld [vmem:[#allocation13 + $0x124] ss:$8 sps:$4 sm:$0xff]   ;;  %v8802_v48 = vld [vmem:[#allocation13 + $0x20] ss:$8 sps:$4 sm:$0xff]  }
 0x856   :  { %2874 = vmatpush1.bf16.msra.mxu0 %v7946_v52  ;;  %v8816_v52 = vld [vmem:[#allocation13 + $0x44] ss:$8 sps:$4 sm:$0xff]  }
 0x857   :  { %2915 = vmatpush1.bf16.msra.mxu1 %v7948_v53  ;;  %2875 = vmatprep.subr.bf16.mxu0 %v7963_v54  ;;  %v8819_v53 = vld [vmem:[#allocation13 + $0x144] ss:$8 sps:$4 sm:$0xff]   ;;  %v8814_v54 = vld [vmem:[#allocation13 + $0x40] ss:$8 sps:$4 sm:$0xff]  }
 0x858   :  { %2916 = vmatprep.subr.bf16.mxu1 %v7965_v55  ;;  %v8817_v55 = vld [vmem:[#allocation13 + $0x140] ss:$8 sps:$4 sm:$0xff]  }
 0x85a   :  { %2876 = vmatpush1.bf16.msra.mxu0 %v7962_v60  ;;  %v8828_v60 = vld [vmem:[#allocation13 + $0x64] ss:$8 sps:$4 sm:$0xff]  }
 0x85b   :  { %2917 = vmatpush1.bf16.msra.mxu1 %v7964_v61  ;;  %2877 = vmatprep.subr.bf16.mxu0 %v7979_v62 }
 0x85c   :  { %2918 = vmatprep.subr.bf16.mxu1 %v7981_v63  ;;  %v8831_v63 = vld [vmem:[#allocation13 + $0x164] ss:$8 sps:$4 sm:$0xff]  }
 0x85e   :  { %2878 = vmatpush1.bf16.msra.mxu0 %v7978_v6  ;;  %v8826_v6 = vld [vmem:[#allocation13 + $0x60] ss:$8 sps:$4 sm:$0xff]  }
 0x85f   :  { %2919 = vmatpush1.bf16.msra.mxu1 %v7980_v9  ;;  %2879 = vmatprep.subr.bf16.mxu0 %v7995_v10 }
 0x860   :  { %2920 = vmatprep.subr.bf16.mxu1 %v7997_v14  ;;  %v8829_v14 = vld [vmem:[#allocation13 + $0x160] ss:$8 sps:$4 sm:$0xff]  }
 0x862   :  { %2880 = vmatpush1.bf16.msra.mxu0 %v7994_v23  ;;  %v8840_v23 = vld [vmem:[#allocation13 + $0x84] ss:$8 sps:$4 sm:$0xff]  }
 0x863   :  { %2921 = vmatpush1.bf16.msra.mxu1 %v7996_v24  ;;  %2881 = vmatprep.subr.bf16.mxu0 %v8011_v29  ;;  %v8843_v24 = vld [vmem:[#allocation13 + $0x184] ss:$8 sps:$4 sm:$0xff]   ;;  %v8838_v29 = vld [vmem:[#allocation13 + $0x80] ss:$8 sps:$4 sm:$0xff]  }
 0x864   :  { %2922 = vmatprep.subr.bf16.mxu1 %v8013_v25  ;;  %v8841_v25 = vld [vmem:[#allocation13 + $0x180] ss:$8 sps:$4 sm:$0xff]  }
 0x866   :  { %2882 = vmatpush1.bf16.msra.mxu0 %v8010_v7  ;;  %v8852_v7 = vld [vmem:[#allocation13 + $0xa4] ss:$8 sps:$4 sm:$0xff]  }
 0x867   :  { %2923 = vmatpush1.bf16.msra.mxu1 %v8012_v8  ;;  %2883 = vmatprep.subr.bf16.mxu0 %v8027_v5  ;;  %v8855_v8 = vld [vmem:[#allocation13 + $0x1a4] ss:$8 sps:$4 sm:$0xff]   ;;  %v8850_v5 = vld [vmem:[#allocation13 + $0xa0] ss:$8 sps:$4 sm:$0xff]  }
 0x868   :  { %2924 = vmatprep.subr.bf16.mxu1 %v8029_v37  ;;  %v8853_v37 = vld [vmem:[#allocation13 + $0x1a0] ss:$8 sps:$4 sm:$0xff]  }
 0x86a   :  { %2884 = vmatpush1.bf16.msra.mxu0 %v8026_v38  ;;  %v8858_v38 = vld [vmem:[#allocation13 + $0xb4] ss:$8 sps:$4 sm:$0xff]  }
 0x86b   :  { %2925 = vmatpush1.bf16.msra.mxu1 %v8028_v39  ;;  %3767 = vmatprep.subr.bf16.mxu0 %v8792_v40  ;;  %v8861_v39 = vld [vmem:[#allocation13 + $0x1b4] ss:$8 sps:$4 sm:$0xff]   ;;  %v8856_v40 = vld [vmem:[#allocation13 + $0xb0] ss:$8 sps:$4 sm:$0xff]  }
 0x86c   :  { %3808 = vmatprep.subr.bf16.mxu1 %v8795_v32  ;;  %v8859_v32 = vld [vmem:[#allocation13 + $0x1b0] ss:$8 sps:$4 sm:$0xff]  }
 0x86d   :  { %2886 = vmatmul.mubr.bf16.vlgmr.msra.gmra.mrb[20].mxu0 %v9765_v16 }
 0x86e   :  { %2927 = vmatmul.mubr.bf16.vlgmr.msra.gmra.mrb[20].mxu1 %v9765_v16  ;;  %3768 = vmatpush1.bf16.msra.mxu0 %v8790_v41  ;;  %v8811_v16 = vld [vmem:[#allocation13 + $0x130] ss:$8 sps:$4 sm:$0xff]   ;;  %v8864_v41 = vld [vmem:[#allocation13 + $0xc4] ss:$8 sps:$4 sm:$0xff]  }
 0x86f   :  { %3809 = vmatpush1.bf16.msra.mxu1 %v8793_v42  ;;  %3769 = vmatprep.subr.bf16.mxu0 %v8798_v43  ;;  %v8867_v42 = vld [vmem:[#allocation13 + $0x1c4] ss:$8 sps:$4 sm:$0xff]   ;;  %v8862_v43 = vld [vmem:[#allocation13 + $0xc0] ss:$8 sps:$4 sm:$0xff]  }
 0x870   :  { %3810 = vmatprep.subr.bf16.mxu1 %v8801_v33  ;;  %v8865_v33 = vld [vmem:[#allocation13 + $0x1c0] ss:$8 sps:$4 sm:$0xff]  }
 0x872   :  { %3770 = vmatpush1.bf16.msra.mxu0 %v8796_v44  ;;  %v8870_v44 = vld [vmem:[#allocation13 + $0xd4] ss:$8 sps:$4 sm:$0xff]  }
 0x873   :  { %3811 = vmatpush1.bf16.msra.mxu1 %v8799_v45  ;;  %3771 = vmatprep.subr.bf16.mxu0 %v8804_v46  ;;  %v8873_v45 = vld [vmem:[#allocation13 + $0x1d4] ss:$8 sps:$4 sm:$0xff]   ;;  %v8868_v46 = vld [vmem:[#allocation13 + $0xd0] ss:$8 sps:$4 sm:$0xff]  }
 0x874   :  { %3812 = vmatprep.subr.bf16.mxu1 %v8807_v47  ;;  %v8871_v47 = vld [vmem:[#allocation13 + $0x1d0] ss:$8 sps:$4 sm:$0xff]  }
 0x876   :  { %3772 = vmatpush1.bf16.msra.mxu0 %v8802_v48  ;;  %v8876_v48 = vld [vmem:[#allocation13 + $0xe4] ss:$8 sps:$4 sm:$0xff]  }
 0x877   :  { %3813 = vmatpush1.bf16.msra.mxu1 %v8805_v49  ;;  %3773 = vmatprep.subr.bf16.mxu0 %v8810_v17  ;;  %v8879_v49 = vld [vmem:[#allocation13 + $0x1e4] ss:$8 sps:$4 sm:$0xff]   ;;  %v8874_v17 = vld [vmem:[#allocation13 + $0xe0] ss:$8 sps:$4 sm:$0xff]  }
 0x878   :  { %3814 = vmatprep.subr.bf16.mxu1 %v8813_v50  ;;  %v8877_v50 = vld [vmem:[#allocation13 + $0x1e0] ss:$8 sps:$4 sm:$0xff]  }
 0x87a   :  { %3774 = vmatpush1.bf16.msra.mxu0 %v8808_v51  ;;  %v8882_v51 = vld [vmem:[#allocation13 + $0xf4] ss:$8 sps:$4 sm:$0xff]  }
 0x87b   :  { %3815 = vmatpush1.bf16.msra.mxu1 %v8811_v16  ;;  %3775 = vmatprep.subr.bf16.mxu0 %v8816_v52  ;;  %v8885_v16 = vld [vmem:[#allocation13 + $0x1f4] ss:$8 sps:$4 sm:$0xff]   ;;  %v8880_v52 = vld [vmem:[#allocation13 + $0xf0] ss:$8 sps:$4 sm:$0xff]  }
 0x87c   :  { %3816 = vmatprep.subr.bf16.mxu1 %v8819_v53  ;;  %v8883_v53 = vld [vmem:[#allocation13 + $0x1f0] ss:$8 sps:$4 sm:$0xff]  }
 0x87e   :  { %3776 = vmatpush1.bf16.msra.mxu0 %v8814_v54  ;;  %v8888_v54 = vld [vmem:[#allocation13 + $0x204] ss:$8 sps:$4 sm:$0xff]  }
 0x87f   :  { %3817 = vmatpush1.bf16.msra.mxu1 %v8817_v55  ;;  %3777 = vmatprep.subr.bf16.mxu0 %v8822_v56  ;;  %v8891_v55 = vld [vmem:[#allocation13 + $0x304] ss:$8 sps:$4 sm:$0xff]  }
 0x880   :  { %v9787_v61 = vpop.f32.mrb[8].mxu0  ;;  %v9789_v62 = vpop.f32.mrb[8].mxu1  ;;  %3818 = vmatprep.subr.bf16.mxu1 %v8825_v57 }
 0x881   :  { %v9791_v0 = vpop.f32.mrb[9].mxu0  ;;  %v9793_v1 = vpop.f32.mrb[9].mxu1 }
 0x882   :  { %v2645_v2 = vpop.f32.mrb[10].mxu0  ;;  %v2686_v4 = vpop.f32.mrb[10].mxu1  ;;  %3778 = vmatpush1.bf16.msra.mxu0 %v8820_v58 }
 0x883   :  { %v2646_v9 = vpop.f32.mrb[11].mxu0  ;;  %v2687_v10 = vpop.f32.mrb[11].mxu1  ;;  %3819 = vmatpush1.bf16.msra.mxu1 %v8823_v59  ;;  %3779 = vmatprep.subr.bf16.mxu0 %v8828_v60 }
 0x884   :  { %3820 = vmatprep.subr.bf16.mxu1 %v8831_v63 }
 0x886   :  { %3780 = vmatpush1.bf16.msra.mxu0 %v8826_v6  ;;  %v9803_v6 = vld [vmem:[#allocation7 + $0x8] sm:$0xff] }
 0x887   :  { %3821 = vmatpush1.bf16.msra.mxu1 %v8829_v14  ;;  %3781 = vmatprep.subr.bf16.mxu0 %v8834_v20  ;;  %v1282_v9 = vrot.slane %v9803_v6, %v9671_v15  ;;  %v1290_v10 = vrot.slane %v9803_v6, %v9715_v19  ;;  %v1286_v14 = vrot.slane %v9803_v6, %v9678_v18 }
 0x888   :  { %3822 = vmatprep.subr.bf16.mxu1 %v8837_v21  ;;  %v1294_v20 = vrot.slane %v9803_v6, %v9744_v12 }
 0x88a   :  { %3782 = vmatpush1.bf16.msra.mxu0 %v8832_v22 }
 0x88b   :  { %3823 = vmatpush1.bf16.msra.mxu1 %v8835_v27  ;;  %3783 = vmatprep.subr.bf16.mxu0 %v8840_v23 }
 0x88c   :  { %3824 = vmatprep.subr.bf16.mxu1 %v8843_v24 }
 0x88e   :  { %3784 = vmatpush1.bf16.msra.mxu0 %v8838_v29 }
 0x88f   :  { %3825 = vmatpush1.bf16.msra.mxu1 %v8841_v25  ;;  %3785 = vmatprep.subr.bf16.mxu0 %v8846_v30 }
 0x890   :  { %3826 = vmatprep.subr.bf16.mxu1 %v8849_v31 }
 0x892   :  { %3786 = vmatpush1.bf16.msra.mxu0 %v8844_v34 }
 0x893   :  { %3827 = vmatpush1.bf16.msra.mxu1 %v8847_v35  ;;  %3787 = vmatprep.subr.bf16.mxu0 %v8852_v7 }
 0x894   :  { %3828 = vmatprep.subr.bf16.mxu1 %v8855_v8 }
 0x896   :  { %3788 = vmatpush1.bf16.msra.mxu0 %v8850_v5 }
 0x897   :  { %3829 = vmatpush1.bf16.msra.mxu1 %v8853_v37  ;;  %3789 = vmatprep.subr.bf16.mxu0 %v8858_v38 }
 0x898   :  { %3830 = vmatprep.subr.bf16.mxu1 %v8861_v39  ;;  %v9813_v39 = vld [vmem:[#allocation7] sm:$0xff] }
 0x89a   :  { %3790 = vmatpush1.bf16.msra.mxu0 %v8856_v40  ;;  %v1250_v40 = vrot.slane %v9813_v39, %v9671_v15 }
 0x89b   :  { %3831 = vmatpush1.bf16.msra.mxu1 %v8859_v32  ;;  %3791 = vmatprep.subr.bf16.mxu0 %v8864_v41  ;;  %v1258_v41 = vrot.slane %v9813_v39, %v9715_v19 }
 0x89c   :  { %3832 = vmatprep.subr.bf16.mxu1 %v8867_v42 }
 0x89e   :  { %3792 = vmatpush1.bf16.msra.mxu0 %v8862_v43  ;;  %v1254_v43 = vrot.slane %v9813_v39, %v9678_v18 }
 0x89f   :  { %3833 = vmatpush1.bf16.msra.mxu1 %v8865_v33  ;;  %3793 = vmatprep.subr.bf16.mxu0 %v8870_v44 }
 0x8a0   :  { %3834 = vmatprep.subr.bf16.mxu1 %v8873_v45 }
 0x8a2   :  { %3794 = vmatpush1.bf16.msra.mxu0 %v8868_v46  ;;  %v1262_v46 = vrot.slane %v9813_v39, %v9744_v12 }
 0x8a3   :  { %3835 = vmatpush1.bf16.msra.mxu1 %v8871_v47  ;;  %3795 = vmatprep.subr.bf16.mxu0 %v8876_v48 }
 0x8a4   :  { %3836 = vmatprep.subr.bf16.mxu1 %v8879_v49 }
 0x8a6   :  { %3796 = vmatpush1.bf16.msra.mxu0 %v8874_v17  ;;  %v2642_v17 = vadd.f32 %v9787_v61, %v1250_v40  ;;  %v8886_v61 = vld [vmem:[#allocation13 + $0x200] ss:$8 sps:$4 sm:$0xff]  }
 0x8a7   :  { %3837 = vmatpush1.bf16.msra.mxu1 %v8877_v50  ;;  %3797 = vmatprep.subr.bf16.mxu0 %v8882_v51  ;;  %v8910_v40 = vld [vmem:[#allocation13 + $0x240] ss:$8 sps:$4 sm:$0xff]  }
 0x8a8   :  { %3838 = vmatprep.subr.bf16.mxu1 %v8885_v16 }
 0x8aa   :  { %3798 = vmatpush1.bf16.msra.mxu0 %v8880_v52  ;;  %v2683_v52 = vadd.f32 %v9789_v62, %v1258_v41  ;;  %v8918_v41 = vld [vmem:[#allocation13 + $0x254] ss:$8 sps:$4 sm:$0xff]  }
 0x8ab   :  { %3839 = vmatpush1.bf16.msra.mxu1 %v8883_v53  ;;  %3849 = vmatprep.subr.bf16.mxu0 %v8888_v54 }
 0x8ac   :  { %3890 = vmatprep.subr.bf16.mxu1 %v8891_v55 }
 0x8c0   :  { %v9795_v56 = vpop.f32.mrb[12].mxu0  ;;  %v9797_v57 = vpop.f32.mrb[12].mxu1 }
 0x8c1   :  { %v9799_v58 = vpop.f32.mrb[13].mxu0  ;;  %v9801_v59 = vpop.f32.mrb[13].mxu1 }
 0x8c2   :  { %v2727_v60 = vpop.f32.mrb[14].mxu0  ;;  %v2768_v63 = vpop.f32.mrb[14].mxu1 }
 0x8c3   :  { %v2728_v2 = vpop.f32.mrb[15].mxu0  ;;  %v2769_v4 = vpop.f32.mrb[15].mxu1  ;;  %v2644_v60 = vadd.f32 %v9791_v0, %v1254_v43  ;;  %v8892_v0 = vld [vmem:[#allocation13 + $0x210] ss:$8 sps:$4 sm:$0xff]  }
 0x8c4   :  { %v2685_v4 = vadd.f32 %v9793_v1, %v1262_v46  ;;  %v8895_v1 = vld [vmem:[#allocation13 + $0x310] ss:$8 sps:$4 sm:$0xff]   ;;  %v8922_v46 = vld [vmem:[#allocation13 + $0x260] ss:$8 sps:$4 sm:$0xff]  }
 0x8c5   :  { %v8916_v43 = vld [vmem:[#allocation13 + $0x250] ss:$8 sps:$4 sm:$0xff]  }
 0x900   :  { %v2805_v21 = vpop.f32.mrb[16].mxu0 }
 0x901   :  { %v2806_v22 = vadd.f32 %v2805_v21, %v1282_v9  ;;  %v2846_v27 = vpop.f32.mrb[16].mxu1  ;;  %v2807_v23 = vpop.f32.mrb[17].mxu0 }
 0x902   :  { %v2847_v24 = vadd.f32 %v2846_v27, %v1290_v10  ;;  %v2808_v29 = vadd.f32 %v2807_v23, %v1286_v14  ;;  %v2848_v25 = vpop.f32.mrb[17].mxu1  ;;  %v2809_v30 = vpop.f32.mrb[18].mxu0  ;;  %v8889_v23 = vld [vmem:[#allocation13 + $0x300] ss:$8 sps:$4 sm:$0xff]  }
 0x903   :  { %v2943_v31 = vmul.f32 0.70710677, %v2806_v22  ;;  %v2849_v34 = vadd.f32 %v2848_v25, %v1294_v20  ;;  %v2850_v35 = vpop.f32.mrb[18].mxu1  ;;  %v2810_v7 = vpop.f32.mrb[19].mxu0  ;;  %v2935_v33 = vmul.f32 0.5, %v2806_v22 }
 0x904   :  { %v2945_v8 = vmul.f32 0.70710677, %v2847_v24  ;;  %v2944_v5 = vmul.f32 0.70710677, %v2808_v29  ;;  %v2851_v38 = vpop.f32.mrb[19].mxu1  ;;  %v2937_v47 = vmul.f32 0.5, %v2847_v24 }
 0x905   :  { %9270 = verf.f32 %v2943_v31  ;;  %v2946_v37 = vmul.f32 0.70710677, %v2849_v34  ;;  %v2936_v51 = vmul.f32 0.5, %v2808_v29  ;;  %v2938_v54 = vmul.f32 0.5, %v2849_v34  ;;  %v8894_v24 = vld [vmem:[#allocation13 + $0x214] ss:$8 sps:$4 sm:$0xff]  }
 0x906   :  { %9272 = verf.f32 %v2945_v8  ;;  %v8897_v29 = vld [vmem:[#allocation13 + $0x314] ss:$8 sps:$4 sm:$0xff]   ;;  %v8900_v25 = vld [vmem:[#allocation13 + $0x224] ss:$8 sps:$4 sm:$0xff]   ;;  %v8898_v31 = vld [vmem:[#allocation13 + $0x220] ss:$8 sps:$4 sm:$0xff]  }
 0x907   :  { %9274 = verf.f32 %v2944_v5  ;;  %v8903_v30 = vld [vmem:[#allocation13 + $0x324] ss:$8 sps:$4 sm:$0xff]   ;;  %v8901_v34 = vld [vmem:[#allocation13 + $0x320] ss:$8 sps:$4 sm:$0xff]   ;;  %v8906_v35 = vld [vmem:[#allocation13 + $0x234] ss:$8 sps:$4 sm:$0xff]  }
 0x908   :  { %9276 = verf.f32 %v2946_v37  ;;  %v8909_v7 = vld [vmem:[#allocation13 + $0x334] ss:$8 sps:$4 sm:$0xff]   ;;  %v8904_v8 = vld [vmem:[#allocation13 + $0x230] ss:$8 sps:$4 sm:$0xff]   ;;  %v8912_v37 = vld [vmem:[#allocation13 + $0x244] ss:$8 sps:$4 sm:$0xff]  }
 0x909   :  { %v8907_v5 = vld [vmem:[#allocation13 + $0x330] ss:$8 sps:$4 sm:$0xff]   ;;  %v8915_v38 = vld [vmem:[#allocation13 + $0x344] ss:$8 sps:$4 sm:$0xff]  }
 0x90f   :  { %v9271_v32 = vpop.eup %9270 }
 0x910   :  { %v9273_v42 = vpop.eup %9272  ;;  %v2959_v44 = vadd.f32 1.0, %v9271_v32  ;;  %v8913_v32 = vld [vmem:[#allocation13 + $0x340] ss:$8 sps:$4 sm:$0xff]  }
 0x911   :  { %v9275_v45 = vpop.eup %9274  ;;  %v2961_v48 = vadd.f32 1.0, %v9273_v42  ;;  %v8921_v42 = vld [vmem:[#allocation13 + $0x354] ss:$8 sps:$4 sm:$0xff]  }
 0x912   :  { %v9277_v49 = vpop.eup %9276  ;;  %v2967_v50 = vmul.f32 %v2959_v44, %v2935_v33  ;;  %v2960_v16 = vadd.f32 1.0, %v9275_v45  ;;  %v8919_v33 = vld [vmem:[#allocation13 + $0x350] ss:$8 sps:$4 sm:$0xff]   ;;  %v8924_v44 = vld [vmem:[#allocation13 + $0x264] ss:$8 sps:$4 sm:$0xff]  }
 0x913   :  { %v2969_v53 = vmul.f32 %v2961_v48, %v2937_v47  ;;  %v2962_v55 = vadd.f32 1.0, %v9277_v49  ;;  %v8927_v45 = vld [vmem:[#allocation13 + $0x364] ss:$8 sps:$4 sm:$0xff]   ;;  %v8925_v47 = vld [vmem:[#allocation13 + $0x360] ss:$8 sps:$4 sm:$0xff]  }
 0x914   :  { %v2975_v63 = vmul.f32 %v2967_v50, %v2642_v17  ;;  %v2968_v2 = vmul.f32 %v2960_v16, %v2936_v51  ;;  %v8930_v48 = vld [vmem:[#allocation13 + $0x274] ss:$8 sps:$4 sm:$0xff]   ;;  %v8928_v17 = vld [vmem:[#allocation13 + $0x270] ss:$8 sps:$4 sm:$0xff]   ;;  %v8936_v51 = vld [vmem:[#allocation13 + $0x284] ss:$8 sps:$4 sm:$0xff]  }
 0x915   :  { %v2977_v9 = vmul.f32 %v2969_v53, %v2683_v52  ;;  %v2970_v10 = vmul.f32 %v2962_v55, %v2938_v54  ;;  %v8933_v49 = vld [vmem:[#allocation13 + $0x374] ss:$8 sps:$4 sm:$0xff]   ;;  %v8931_v50 = vld [vmem:[#allocation13 + $0x370] ss:$8 sps:$4 sm:$0xff]   ;;  %v8939_v16 = vld [vmem:[#allocation13 + $0x384] ss:$8 sps:$4 sm:$0xff]  }
 0x916   :  { %v2976_v14 = vmul.f32 %v2968_v2, %v2644_v60  ;;  %v2983_v22 = vpack.c.bf16 %v2975_v63, %v2975_v63  ;;  %v8934_v52 = vld [vmem:[#allocation13 + $0x280] ss:$8 sps:$4 sm:$0xff]   ;;  %v8942_v54 = vld [vmem:[#allocation13 + $0x294] ss:$8 sps:$4 sm:$0xff]   ;;  %v9828_v60 = vsub.s32 6, %v9651_v3  ;;  %v9831_v63 = vsub.s32 5, %v9651_v3 }
 0x917   :  { %v2978_v20 = vmul.f32 %v2970_v10, %v2685_v4  ;;  %v2985_v62 = vpack.c.bf16 %v2977_v9, %v2977_v9  ;;  %v8937_v53 = vld [vmem:[#allocation13 + $0x380] ss:$8 sps:$4 sm:$0xff]   ;;  %v8945_v55 = vld [vmem:[#allocation13 + $0x394] ss:$8 sps:$4 sm:$0xff]   ;;  %v8940_v2 = vld [vmem:[#allocation13 + $0x290] ss:$8 sps:$4 sm:$0xff]   ;;  %v1298_v10 = vrot.slane %v9803_v6, %v9747_v13 }
 0x918   :  { %v2984_v21 = vpack.c.bf16 %v2976_v14, %v2976_v14  ;;  %v9834_v4 = vsub.s32 7, %v9651_v3  ;;  %v8943_v9 = vld [vmem:[#allocation13 + $0x390] ss:$8 sps:$4 sm:$0xff]   ;;  %v8948_v14 = vld [vmem:[#allocation13 + $0x2a4] ss:$8 sps:$4 sm:$0xff]  }
 0x919   :  { %v2986_v27 = vpack.c.bf16 %v2978_v20, %v2978_v20  ;;  %v1306_v20 = vrot.slane %v9803_v6, %v9828_v60 }
 0x91a   :  { %3799 = vmatprep.mubr.bf16.mxu0 %v2984_v21  ;;  %v1302_v21 = vrot.slane %v9803_v6, %v9831_v63 }
 0x91b   :  { %3840 = vmatprep.mubr.bf16.mxu1 %v2986_v27  ;;  %3800 = vmatmul.mubr.bf16.vlgmr.msra.gmra.mrb[24].mxu0 %v2983_v22  ;;  %v1310_v22 = vrot.slane %v9803_v6, %v9834_v4  ;;  %v8946_v27 = vld [vmem:[#allocation13 + $0x2a0] ss:$8 sps:$4 sm:$0xff]  }
 0x91c   :  { %3841 = vmatmul.mubr.bf16.vlgmr.msra.gmra.mrb[24].mxu1 %v2985_v62  ;;  %3850 = vmatpush1.bf16.msra.mxu0 %v8886_v61  ;;  %v8951_v61 = vld [vmem:[#allocation13 + $0x3a4] ss:$8 sps:$4 sm:$0xff]  }
 0x91d   :  { %3891 = vmatpush1.bf16.msra.mxu1 %v8889_v23  ;;  %3851 = vmatprep.subr.bf16.mxu0 %v8894_v24 }
 0x91e   :  { %3892 = vmatprep.subr.bf16.mxu1 %v8897_v29  ;;  %v8949_v29 = vld [vmem:[#allocation13 + $0x3a0] ss:$8 sps:$4 sm:$0xff]  }
 0x920   :  { %3852 = vmatpush1.bf16.msra.mxu0 %v8892_v0  ;;  %v8954_v0 = vld [vmem:[#allocation13 + $0x2b4] ss:$8 sps:$4 sm:$0xff]  }
 0x921   :  { %3893 = vmatpush1.bf16.msra.mxu1 %v8895_v1  ;;  %3853 = vmatprep.subr.bf16.mxu0 %v8900_v25 }
 0x922   :  { %3894 = vmatprep.subr.bf16.mxu1 %v8903_v30 }
 0x924   :  { %3854 = vmatpush1.bf16.msra.mxu0 %v8898_v31 }
 0x925   :  { %3895 = vmatpush1.bf16.msra.mxu1 %v8901_v34  ;;  %3855 = vmatprep.subr.bf16.mxu0 %v8906_v35  ;;  %v8957_v34 = vld [vmem:[#allocation13 + $0x3b4] ss:$8 sps:$4 sm:$0xff]  }
 0x926   :  { %3896 = vmatprep.subr.bf16.mxu1 %v8909_v7 }
 0x928   :  { %3856 = vmatpush1.bf16.msra.mxu0 %v8904_v8 }
 0x929   :  { %3897 = vmatpush1.bf16.msra.mxu1 %v8907_v5  ;;  %3857 = vmatprep.subr.bf16.mxu0 %v8912_v37  ;;  %v8952_v5 = vld [vmem:[#allocation13 + $0x2b0] ss:$8 sps:$4 sm:$0xff]  }
 0x92a   :  { %3898 = vmatprep.subr.bf16.mxu1 %v8915_v38 }
 0x92c   :  { %3858 = vmatpush1.bf16.msra.mxu0 %v8910_v40  ;;  %v8955_v40 = vld [vmem:[#allocation13 + $0x3b0] ss:$8 sps:$4 sm:$0xff]  }
 0x92d   :  { %3899 = vmatpush1.bf16.msra.mxu1 %v8913_v32  ;;  %3859 = vmatprep.subr.bf16.mxu0 %v8918_v41 }
 0x92e   :  { %3900 = vmatprep.subr.bf16.mxu1 %v8921_v42  ;;  %v8960_v42 = vld [vmem:[#allocation13 + $0x2c4] ss:$8 sps:$4 sm:$0xff]  }
 0x930   :  { %3860 = vmatpush1.bf16.msra.mxu0 %v8916_v43  ;;  %v8963_v43 = vld [vmem:[#allocation13 + $0x3c4] ss:$8 sps:$4 sm:$0xff]  }
 0x931   :  { %3901 = vmatpush1.bf16.msra.mxu1 %v8919_v33  ;;  %3861 = vmatprep.subr.bf16.mxu0 %v8924_v44  ;;  %v8958_v33 = vld [vmem:[#allocation13 + $0x2c0] ss:$8 sps:$4 sm:$0xff]  }
 0x932   :  { %3902 = vmatprep.subr.bf16.mxu1 %v8927_v45  ;;  %v8961_v44 = vld [vmem:[#allocation13 + $0x3c0] ss:$8 sps:$4 sm:$0xff]   ;;  %v8966_v45 = vld [vmem:[#allocation13 + $0x2d4] ss:$8 sps:$4 sm:$0xff]  }
 0x934   :  { %3862 = vmatpush1.bf16.msra.mxu0 %v8922_v46  ;;  %v8969_v46 = vld [vmem:[#allocation13 + $0x3d4] ss:$8 sps:$4 sm:$0xff]  }
 0x935   :  { %3903 = vmatpush1.bf16.msra.mxu1 %v8925_v47  ;;  %3863 = vmatprep.subr.bf16.mxu0 %v8930_v48  ;;  %v8964_v47 = vld [vmem:[#allocation13 + $0x2d0] ss:$8 sps:$4 sm:$0xff]  }
 0x936   :  { %3904 = vmatprep.subr.bf16.mxu1 %v8933_v49  ;;  %v8967_v48 = vld [vmem:[#allocation13 + $0x3d0] ss:$8 sps:$4 sm:$0xff]   ;;  %v8972_v49 = vld [vmem:[#allocation13 + $0x2e4] ss:$8 sps:$4 sm:$0xff]  }
 0x938   :  { %3864 = vmatpush1.bf16.msra.mxu0 %v8928_v17  ;;  %v1266_v17 = vrot.slane %v9813_v39, %v9747_v13 }
 0x939   :  { %3905 = vmatpush1.bf16.msra.mxu1 %v8931_v50  ;;  %3865 = vmatprep.subr.bf16.mxu0 %v8936_v51  ;;  %v8975_v50 = vld [vmem:[#allocation13 + $0x3e4] ss:$8 sps:$4 sm:$0xff]  }
 0x93a   :  { %3906 = vmatprep.subr.bf16.mxu1 %v8939_v16  ;;  %v1274_v16 = vrot.slane %v9813_v39, %v9828_v60 }
 0x93c   :  { %3866 = vmatpush1.bf16.msra.mxu0 %v8934_v52 }
 0x93d   :  { %3907 = vmatpush1.bf16.msra.mxu1 %v8937_v53  ;;  %3867 = vmatprep.subr.bf16.mxu0 %v8942_v54  ;;  %v1270_v53 = vrot.slane %v9813_v39, %v9831_v63 }
 0x93e   :  { %3908 = vmatprep.subr.bf16.mxu1 %v8945_v55 }
 0x940   :  { %3868 = vmatpush1.bf16.msra.mxu0 %v8940_v2  ;;  %v2887_v3 = vpop.f32.mrb[20].mxu0  ;;  %v8970_v2 = vld [vmem:[#allocation13 + $0x2e0] ss:$8 sps:$4 sm:$0xff]  }
 0x941   :  { %3909 = vmatpush1.bf16.msra.mxu1 %v8943_v9  ;;  %v2888_v23 = vadd.f32 %v2887_v3, %v1298_v10  ;;  %v2928_v24 = vpop.f32.mrb[20].mxu1  ;;  %v2889_v62 = vpop.f32.mrb[21].mxu0  ;;  %3869 = vmatprep.subr.bf16.mxu0 %v8948_v14  ;;  %v1278_v10 = vrot.slane %v9813_v39, %v9834_v4  ;;  %v2724_v3 = vadd.f32 %v9795_v56, %v1266_v17 }
 0x942   :  { %v2929_v1 = vadd.f32 %v2928_v24, %v1306_v20  ;;  %v2890_v25 = vadd.f32 %v2889_v62, %v1302_v21  ;;  %v2930_v30 = vpop.f32.mrb[21].mxu1  ;;  %v2891_v31 = vpop.f32.mrb[22].mxu0  ;;  %3910 = vmatprep.subr.bf16.mxu1 %v8951_v61  ;;  %v8973_v21 = vld [vmem:[#allocation13 + $0x3e0] ss:$8 sps:$4 sm:$0xff]   ;;  %v8978_v61 = vld [vmem:[#allocation13 + $0x2f4] ss:$8 sps:$4 sm:$0xff]   ;;  %v2726_v39 = vadd.f32 %v9799_v58, %v1270_v53 }
 0x943   :  { %v2947_v35 = vmul.f32 0.70710677, %v2888_v23  ;;  %v2931_v7 = vadd.f32 %v2930_v30, %v1310_v22  ;;  %v2932_v8 = vpop.f32.mrb[22].mxu1  ;;  %v2892_v6 = vpop.f32.mrb[23].mxu0  ;;  %v2939_v54 = vmul.f32 0.5, %v2888_v23 }
 0x944   :  { %v2949_v37 = vmul.f32 0.70710677, %v2929_v1  ;;  %v2948_v38 = vmul.f32 0.70710677, %v2890_v25  ;;  %3870 = vmatpush1.bf16.msra.mxu0 %v8946_v27  ;;  %v2933_v41 = vpop.f32.mrb[23].mxu1  ;;  %v2941_v14 = vmul.f32 0.5, %v2929_v1  ;;  %v2767_v8 = vadd.f32 %v9801_v59, %v1278_v10 }
 0x945   :  { %9278 = verf.f32 %v2947_v35  ;;  %v2950_v32 = vmul.f32 0.70710677, %v2931_v7  ;;  %3911 = vmatpush1.bf16.msra.mxu1 %v8949_v29  ;;  %3871 = vmatprep.subr.bf16.mxu0 %v8954_v0  ;;  %v2940_v24 = vmul.f32 0.5, %v2890_v25  ;;  %v8981_v23 = vld [vmem:[#allocation13 + $0x3f4] ss:$8 sps:$4 sm:$0xff]   ;;  %v2765_v29 = vadd.f32 %v9797_v57, %v1274_v16 }
 0x946   :  { %9280 = verf.f32 %v2949_v37  ;;  %3912 = vmatprep.subr.bf16.mxu1 %v8957_v34  ;;  %v2942_v30 = vmul.f32 0.5, %v2931_v7  ;;  %v8976_v35 = vld [vmem:[#allocation13 + $0x2f0] ss:$8 sps:$4 sm:$0xff]  }
 0x947   :  { %9282 = verf.f32 %v2948_v38  ;;  %v8979_v25 = vld [vmem:[#allocation13 + $0x3f0] ss:$8 sps:$4 sm:$0xff]  }
 0x948   :  { %9284 = verf.f32 %v2950_v32  ;;  %3872 = vmatpush1.bf16.msra.mxu0 %v8952_v5  ;;  %v9311_v32 = vld [vmem:[#allocation5 + $0x8] sm:$0xff] }
 0x949   :  { %3913 = vmatpush1.bf16.msra.mxu1 %v8955_v40  ;;  %3873 = vmatprep.subr.bf16.mxu0 %v8960_v42  ;;  %v9310_v40 = vld [vmem:[#allocation5] sm:$0xff]  ;;  %v3126_v41 = vrot.slane %v9311_v32, %v9831_v63 }
 0x94a   :  { %3914 = vmatprep.subr.bf16.mxu1 %v8963_v43  ;;  %v3122_v59 = vrot.slane %v9310_v40, %v9831_v63  ;;  %v9006_v40 = vld [vmem:[#allocation8 + $0x240] ss:$12 sps:$4 sm:$0xff]   ;;  %v9011_v32 = vld [vmem:[#allocation8 + $0x258] ss:$12 sps:$4 sm:$0xff]  }
 0x94c   :  { %3874 = vmatpush1.bf16.msra.mxu0 %v8958_v33 }
 0x94d   :  { %3915 = vmatpush1.bf16.msra.mxu1 %v8961_v44  ;;  %3875 = vmatprep.subr.bf16.mxu0 %v8966_v45 }
 0x94e   :  { %3916 = vmatprep.subr.bf16.mxu1 %v8969_v46 }
 0x94f   :  { %v9279_v51 = vpop.eup %9278 }
 0x950   :  { %v9281_v52 = vpop.eup %9280  ;;  %v2963_v55 = vadd.f32 1.0, %v9279_v51  ;;  %3876 = vmatpush1.bf16.msra.mxu0 %v8964_v47 }
 0x951   :  { %v9283_v9 = vpop.eup %9282  ;;  %v2965_v20 = vadd.f32 1.0, %v9281_v52  ;;  %3917 = vmatpush1.bf16.msra.mxu1 %v8967_v48  ;;  %3877 = vmatprep.subr.bf16.mxu0 %v8972_v49 }
 0x952   :  { %v9285_v22 = vpop.eup %9284  ;;  %v2971_v27 = vmul.f32 %v2963_v55, %v2939_v54  ;;  %v2964_v62 = vadd.f32 1.0, %v9283_v9  ;;  %3918 = vmatprep.subr.bf16.mxu1 %v8975_v50 }
 0x953   :  { %v2973_v0 = vmul.f32 %v2965_v20, %v2941_v14  ;;  %v2966_v31 = vadd.f32 1.0, %v9285_v22 }
 0x954   :  { %v2979_v1 = vmul.f32 %v2971_v27, %v2724_v3  ;;  %v2972_v34 = vmul.f32 %v2964_v62, %v2940_v24  ;;  %3878 = vmatpush1.bf16.msra.mxu0 %v8970_v2 }
 0x955   :  { %v2981_v6 = vmul.f32 %v2973_v0, %v2765_v29  ;;  %v2974_v56 = vmul.f32 %v2966_v31, %v2942_v30  ;;  %3919 = vmatpush1.bf16.msra.mxu1 %v8973_v21  ;;  %3879 = vmatprep.subr.bf16.mxu0 %v8978_v61  ;;  %v8984_v29 = vld [vmem:[#allocation8 + $0x184] ss:$12 sps:$4 sm:$0xff]   ;;  %v8987_v0 = vld [vmem:[#allocation8 + $0x19c] ss:$12 sps:$4 sm:$0xff]   ;;  %v8990_v31 = vld [vmem:[#allocation8 + $0x1b4] ss:$12 sps:$4 sm:$0xff]  }
 0x956   :  { %3920 = vmatprep.subr.bf16.mxu1 %v8981_v23  ;;  %v2980_v5 = vmul.f32 %v2972_v34, %v2726_v39  ;;  %v2987_v7 = vpack.c.bf16 %v2979_v1, %v2979_v1  ;;  %v8982_v23 = vld [vmem:[#allocation8 + $0x180] ss:$12 sps:$4 sm:$0xff]   ;;  %v8985_v30 = vld [vmem:[#allocation8 + $0x198] ss:$12 sps:$4 sm:$0xff]   ;;  %v9009_v39 = vld [vmem:[#allocation8 + $0x248] ss:$12 sps:$4 sm:$0xff]  }
 0x957   :  { %v2982_v37 = vmul.f32 %v2974_v56, %v2767_v8  ;;  %v2989_v58 = vpack.c.bf16 %v2981_v6, %v2981_v6  ;;  %v9010_v1 = vld [vmem:[#allocation8 + $0x188] ss:$12 sps:$4 sm:$0xff]   ;;  %v9014_v34 = vld [vmem:[#allocation8 + $0x260] ss:$12 sps:$4 sm:$0xff]   ;;  %v8996_v6 = vld [vmem:[#allocation8 + $0x1e4] ss:$12 sps:$4 sm:$0xff]  }
 0x958   :  { %3880 = vmatpush1.bf16.msra.mxu0 %v8976_v35  ;;  %v2988_v57 = vpack.c.bf16 %v2980_v5, %v2980_v5  ;;  %v9015_v35 = vld [vmem:[#allocation8 + $0x1a0] ss:$12 sps:$4 sm:$0xff]   ;;  %v8991_v8 = vld [vmem:[#allocation8 + $0x1c8] ss:$12 sps:$4 sm:$0xff]   ;;  %v8997_v5 = vld [vmem:[#allocation8 + $0x1f8] ss:$12 sps:$4 sm:$0xff]  }
 0x959   :  { %3921 = vmatpush1.bf16.msra.mxu1 %v8979_v25  ;;  %v2990_v38 = vpack.c.bf16 %v2982_v37, %v2982_v37  ;;  %4302 = vmatprep.subr.bf16.mxu0 %v8984_v29  ;;  %v8994_v56 = vld [vmem:[#allocation8 + $0x1e0] ss:$12 sps:$4 sm:$0xff]   ;;  %v8999_v25 = vld [vmem:[#allocation8 + $0x1fc] ss:$12 sps:$4 sm:$0xff]  }
 0x95a   :  { %3881 = vmatprep.mubr.bf16.mxu0 %v2988_v57  ;;  %8635 = vmatprep.subr.bf16.mxu1 %v9009_v39  ;;  %v9002_v37 = vld [vmem:[#allocation8 + $0x214] ss:$12 sps:$4 sm:$0xff]   ;;  %v9000_v57 = vld [vmem:[#allocation8 + $0x210] ss:$12 sps:$4 sm:$0xff]  }
 0x95b   :  { %3922 = vmatprep.mubr.bf16.mxu1 %v2990_v38  ;;  %3882 = vmatmul.mubr.bf16.vlgmr.msra.gmra.mrb[28].mxu0 %v2987_v7  ;;  %v9005_v7 = vld [vmem:[#allocation8 + $0x22c] ss:$12 sps:$4 sm:$0xff]   ;;  %v9003_v38 = vld [vmem:[#allocation8 + $0x228] ss:$12 sps:$4 sm:$0xff]  }
 0x95c   :  { %3923 = vmatmul.mubr.bf16.vlgmr.msra.gmra.mrb[28].mxu1 %v2989_v58  ;;  %4303 = vmatpush1.bf16.msra.mxu0 %v8982_v23  ;;  %v9008_v58 = vld [vmem:[#allocation8 + $0x244] ss:$12 sps:$4 sm:$0xff]   ;;  %v9041_v29 = vld [vmem:[#allocation8 + $0x2e8] ss:$12 sps:$4 sm:$0xff]  }
 0x95d   :  { %4304 = vmatprep.subr.bf16.mxu0 %v8987_v0  ;;  %8636 = vmatpush3.bf16.msra.mxu1 %v9010_v1  ;;  %v9044_v23 = vld [vmem:[#allocation8 + $0x2f0] ss:$12 sps:$4 sm:$0xff]  }
 0x95e   :  { %8637 = vmatprep.subr.bf16.mxu1 %v9014_v34  ;;  %v9045_v0 = vld [vmem:[#allocation8 + $0x230] ss:$12 sps:$4 sm:$0xff]  }
 0x95f   :  { %v9873_v1 = vld [vmem:[#allocation5 + $0x18] sm:$0xff] }
 0x960   :  { %4305 = vmatpush1.bf16.msra.mxu0 %v8985_v30  ;;  %v3966_v34 = vrot.slane %v9873_v1, %v9671_v15 }
 0x961   :  { %4306 = vmatprep.subr.bf16.mxu0 %v8990_v31  ;;  %8638 = vmatpush3.bf16.msra.mxu1 %v9015_v35 }
 0x9ee   :  { %v3801_v42 = vpop.f32.mrb[24].mxu0 }
 0x9ef   :  { %v3802_v43 = vadd.f32 %v3801_v42, %v3122_v59  ;;  %v3842_v33 = vpop.f32.mrb[24].mxu1  ;;  %v3803_v44 = vpop.f32.mrb[25].mxu0  ;;  %v9013_v59 = vld [vmem:[#allocation8 + $0x25c] ss:$12 sps:$4 sm:$0xff]  }
 0x9f0   :  { %v3804_v45 = vadd.f32 %v3803_v44, %v3126_v41  ;;  %v3844_v46 = vpop.f32.mrb[25].mxu1  ;;  %v3805_v47 = vpop.f32.mrb[26].mxu0 }
 0x9f1   :  { %v3843_v48 = vadd.f32 %v3842_v33, %v3802_v43  ;;  %v3846_v49 = vpop.f32.mrb[26].mxu1  ;;  %v3806_v17 = vpop.f32.mrb[27].mxu0 }
 0x9f2   :  { %v3845_v50 = vadd.f32 %v3844_v46, %v3804_v45  ;;  %v3847_v51 = vpop.f32.mrb[27].mxu1  ;;  %v9018_v49 = vld [vmem:[#allocation8 + $0x274] ss:$12 sps:$4 sm:$0xff]   ;;  %v9019_v17 = vld [vmem:[#allocation8 + $0x278] ss:$12 sps:$4 sm:$0xff]  }
 0x9f3   :  { %v9020_v51 = vld [vmem:[#allocation8 + $0x1b8] ss:$12 sps:$4 sm:$0xff]   ;;  %8639 = vmatprep.subr.bf16.mxu1 %v9019_v17 }
 0x9f4   :  { %8640 = vmatpush3.bf16.msra.mxu1 %v9020_v51 }
 0xa2e   :  { %v3883_v16 = vpop.f32.mrb[28].mxu0 }
 0xa2f   :  { %v3884_v52 = vadd.f32 %v3883_v16, %v3843_v48  ;;  %v3924_v53 = vpop.f32.mrb[28].mxu1  ;;  %v3885_v54 = vpop.f32.mrb[29].mxu0  ;;  %v9023_v16 = vld [vmem:[#allocation8 + $0x28c] ss:$12 sps:$4 sm:$0xff]  }
 0xa30   :  { %v3886_v55 = vadd.f32 %v3885_v54, %v3845_v50  ;;  %v3926_v2 = vpop.f32.mrb[29].mxu1  ;;  %v3887_v9 = vpop.f32.mrb[30].mxu0  ;;  %v9016_v50 = vld [vmem:[#allocation8 + $0x270] ss:$12 sps:$4 sm:$0xff]  }
 0xa31   :  { %v3925_v10 = vadd.f32 %v3924_v53, %v3884_v52  ;;  %v3928_v14 = vpop.f32.mrb[30].mxu1  ;;  %v3888_v20 = vpop.f32.mrb[31].mxu0  ;;  %v9024_v52 = vld [vmem:[#allocation8 + $0x290] ss:$12 sps:$4 sm:$0xff]   ;;  %v9021_v53 = vld [vmem:[#allocation8 + $0x288] ss:$12 sps:$4 sm:$0xff]  }
 0xa32   :  { %v3927_v21 = vadd.f32 %v3926_v2, %v3886_v55  ;;  %v3929_v61 = vpop.f32.mrb[31].mxu1  ;;  %v9025_v54 = vld [vmem:[#allocation8 + $0x1d0] ss:$12 sps:$4 sm:$0xff]   ;;  %8641 = vmatprep.subr.bf16.mxu1 %v9024_v52  ;;  %v9029_v2 = vld [vmem:[#allocation8 + $0x2a8] ss:$12 sps:$4 sm:$0xff]  }
 0xa33   :  { %v3931_v22 = vadd.f32 %v3925_v10, %v9759_v26  ;;  %v8988_v26 = vld [vmem:[#allocation8 + $0x1b0] ss:$12 sps:$4 sm:$0xff]   ;;  %8642 = vmatpush3.bf16.msra.mxu1 %v9025_v54  ;;  %v9026_v9 = vld [vmem:[#allocation8 + $0x2a0] ss:$12 sps:$4 sm:$0xff]   ;;  %v9030_v10 = vld [vmem:[#allocation8 + $0x1e8] ss:$12 sps:$4 sm:$0xff]  }
 0xa34   :  { %v3932_v3 = vadd.f32 %v3927_v21, %v9761_v28  ;;  %v8993_v28 = vld [vmem:[#allocation8 + $0x1cc] ss:$12 sps:$4 sm:$0xff]   ;;  %4307 = vmatpush1.bf16.msra.mxu0 %v8988_v26  ;;  %v9028_v55 = vld [vmem:[#allocation8 + $0x2a4] ss:$12 sps:$4 sm:$0xff]   ;;  %8643 = vmatprep.subr.bf16.mxu1 %v9029_v2  ;;  %v9033_v14 = vld [vmem:[#allocation8 + $0x2bc] ss:$12 sps:$4 sm:$0xff]  }
 0xa35   :  { %v3939_v27 = vsel %vm137_vm0, %v3931_v22, 0.0  ;;  %4308 = vmatprep.subr.bf16.mxu0 %v8993_v28  ;;  %v9034_v20 = vld [vmem:[#allocation8 + $0x2c0] ss:$12 sps:$4 sm:$0xff]   ;;  %v9031_v21 = vld [vmem:[#allocation8 + $0x2b8] ss:$12 sps:$4 sm:$0xff]   ;;  %v9875_v26 = vld [vmem:[#allocation5 + $0x10] sm:$0xff] }
 0xa36   :  { %v3940_v24 = vsel %vm137_vm0, %v3932_v3, 0.0  ;;  %v9035_v61 = vld [vmem:[#allocation8 + $0x200] ss:$12 sps:$4 sm:$0xff]   ;;  %v3962_v28 = vrot.slane %v9875_v26, %v9671_v15 }
 0xa37   :  { %v3941_v62 = vadd.f32 %v3940_v24, %v3939_v27  ;;  %8644 = vmatpush3.bf16.msra.mxu1 %v9030_v10  ;;  %v9039_v27 = vld [vmem:[#allocation8 + $0x2d8] ss:$12 sps:$4 sm:$0xff]  }
 0xa38   :  { %4309 = vmatpush1.bf16.msra.mxu0 %v8991_v8  ;;  %8645 = vmatprep.subr.bf16.mxu1 %v9034_v20  ;;  %v9040_v24 = vld [vmem:[#allocation8 + $0x218] ss:$12 sps:$4 sm:$0xff]   ;;  %v9052_v20 = vld [vmem:[#allocation10 + $0xa0] ss:$8 sps:$4 sm:$0xff]  }
 0xa39   :  { %3942 = vadd.xlane.f32.xlu0 %v3941_v62  ;;  %4310 = vmatprep.subr.bf16.mxu0 %v8996_v6  ;;  %v9043_v62 = vld [vmem:[#allocation8 + $0x2ec] ss:$12 sps:$4 sm:$0xff]  }
 0xa3a   :  { %v9049_v10 = vld [vmem:[#allocation10 + $0x90] ss:$8 sps:$4 sm:$0xff]  }
 0xa3b   :  { %8646 = vmatpush3.bf16.msra.mxu1 %v9035_v61  ;;  %v9055_v61 = vld [vmem:[#allocation10 + $0xb0] ss:$8 sps:$4 sm:$0xff]  }
 0xa3c   :  { %4311 = vmatpush1.bf16.msra.mxu0 %v8994_v56  ;;  %8647 = vmatprep.subr.bf16.mxu1 %v9039_v27  ;;  %v3976_v56 = vrot.slane %v9873_v1, %v9678_v18  ;;  %v9063_v27 = vld [vmem:[#allocation10 + $0xd4] ss:$8 sps:$4 sm:$0xff]  }
 0xa3d   :  { %4312 = vmatprep.subr.bf16.mxu0 %v8999_v25  ;;  %v3972_v25 = vrot.slane %v9875_v26, %v9678_v18 }
 0xa3f   :  { %8648 = vmatpush3.bf16.msra.mxu1 %v9040_v24  ;;  %v9061_v24 = vld [vmem:[#allocation10 + $0xd0] ss:$8 sps:$4 sm:$0xff]  }
 0xa40   :  { %4313 = vmatpush1.bf16.msra.mxu0 %v8997_v5  ;;  %8649 = vmatprep.subr.bf16.mxu1 %v9044_v23  ;;  %v9069_v23 = vld [vmem:[#allocation10 + $0xf4] ss:$8 sps:$4 sm:$0xff]  }
 0xa41   :  { %4314 = vmatprep.subr.bf16.mxu0 %v9002_v37 }
 0xa43   :  { %8650 = vmatpush3.bf16.msra.mxu1 %v9045_v0 }
 0xa44   :  { %4315 = vmatpush1.bf16.msra.mxu0 %v9000_v57  ;;  %8671 = vmatprep.subr.mxu1 %v9517_v36 }
 0xa45   :  { %4316 = vmatprep.subr.bf16.mxu0 %v9005_v7 }
 0xa48   :  { %4317 = vmatpush1.bf16.msra.mxu0 %v9003_v38 }
 0xa49   :  { %4318 = vmatprep.subr.bf16.mxu0 %v9008_v58 }
 0xa4c   :  { %4319 = vmatpush1.bf16.msra.mxu0 %v9006_v40 }
 0xa4d   :  { %4320 = vmatprep.subr.bf16.mxu0 %v9013_v59 }
 0xa50   :  { %4321 = vmatpush1.bf16.msra.mxu0 %v9011_v32 }
 0xa51   :  { %4322 = vmatprep.subr.bf16.mxu0 %v9018_v49 }
 0xa54   :  { %4323 = vmatpush1.bf16.msra.mxu0 %v9016_v50 }
 0xa55   :  { %4324 = vmatprep.subr.bf16.mxu0 %v9023_v16 }
 0xa58   :  { %4325 = vmatpush1.bf16.msra.mxu0 %v9021_v53  ;;  %v9048_v53 = vld [vmem:[#allocation10 + $0x84] ss:$8 sps:$4 sm:$0xff]  }
 0xa59   :  { %4326 = vmatprep.subr.bf16.mxu0 %v9028_v55 }
 0xa5c   :  { %4327 = vmatpush1.bf16.msra.mxu0 %v9026_v9  ;;  %v9051_v9 = vld [vmem:[#allocation10 + $0x94] ss:$8 sps:$4 sm:$0xff]  }
 0xa5d   :  { %4328 = vmatprep.subr.bf16.mxu0 %v9033_v14  ;;  %v9054_v14 = vld [vmem:[#allocation10 + $0xa4] ss:$8 sps:$4 sm:$0xff]  }
 0xa60   :  { %4329 = vmatpush1.bf16.msra.mxu0 %v9031_v21  ;;  %v9057_v21 = vld [vmem:[#allocation10 + $0xb4] ss:$8 sps:$4 sm:$0xff]  }
 0xac6   :  { %v3943_v41 = vpop.xlane.xlu0 %3942 }
 0xac7   :  { %v3944_v42 = vmul.f32 0.00390625, %v3943_v41 }
 0xac9   :  { %v9862_v43 = vsub.f32 %v3931_v22, %v3944_v42  ;;  %v9864_v33 = vsub.f32 %v3932_v3, %v3944_v42  ;;  %v9036_v22 = vld [vmem:[#allocation8 + $0x2d0] ss:$12 sps:$4 sm:$0xff]   ;;  %v9038_v3 = vld [vmem:[#allocation8 + $0x2d4] ss:$12 sps:$4 sm:$0xff]  }
 0xaca   :  { %4330 = vmatprep.subr.bf16.mxu0 %v9038_v3  ;;  %v9058_v3 = vld [vmem:[#allocation10 + $0xc0] ss:$8 sps:$4 sm:$0xff]  }
 0xacb   :  { %v3947_v44 = vmul.f32 %v9862_v43, %v9862_v43  ;;  %v3948_v45 = vmul.f32 %v9864_v33, %v9864_v33  ;;  %4331 = vmatpush1.bf16.msra.mxu0 %v9036_v22  ;;  %v9060_v22 = vld [vmem:[#allocation10 + $0xc4] ss:$8 sps:$4 sm:$0xff]  }
 0xacc   :  { %4332 = vmatprep.subr.bf16.mxu0 %v9043_v62  ;;  %v9066_v62 = vld [vmem:[#allocation10 + $0xe4] ss:$8 sps:$4 sm:$0xff]  }
 0xacd   :  { %v3949_v46 = vsel %vm137_vm0, %v3947_v44, 0.0  ;;  %v3950_v47 = vsel %vm137_vm0, %v3948_v45, 0.0 }
 0xace   :  { %v3951_v48 = vadd.f32 %v3950_v47, %v3949_v46 }
 0xacf   :  { %4333 = vmatpush1.bf16.msra.mxu0 %v9041_v29  ;;  %v9067_v29 = vld [vmem:[#allocation10 + $0xf0] ss:$8 sps:$4 sm:$0xff]  }
 0xad0   :  { %3952 = vadd.xlane.f32.xlu1 %v3951_v48 }
 0xb5d   :  { %v3953_v30 = vpop.xlane.xlu1 %3952 }
 0xb5e   :  { %v3954_v31 = vmul.f32 0.00390625, %v3953_v30 }
 0xb60   :  { %v3955_v39 = vadd.f32 1e-05, %v3954_v31 }
 0xb62   :  { %9286 = vrsqrt.f32 %v3955_v39  ;;  %v4562_v39 = vrot.slane %v9875_v26, %v9715_v19 }
 0xb6c   :  { %v9287_v35 = vpop.eup %9286 }
 0xb6d   :  { %v3957_v8 = vmul.f32 %v9287_v35, %v9862_v43  ;;  %v3958_v6 = vmul.f32 %v9287_v35, %v9864_v33 }
 0xb6f   :  { %v3968_v5 = vmul.f32 %v3966_v34, %v3958_v6  ;;  %v3967_v37 = vmul.f32 %v3962_v28, %v3957_v8  ;;  %v4566_v34 = vrot.slane %v9873_v1, %v9715_v19 }
 0xb71   :  { %v9887_v57 = vadd.f32 %v3976_v56, %v3968_v5  ;;  %v9889_v7 = vadd.f32 %v3972_v25, %v3967_v37 }
 0xb73   :  { %v3980_v38 = vpack.c.bf16 %v9887_v57, %v9887_v57  ;;  %v3979_v58 = vpack.c.bf16 %v9889_v7, %v9889_v7 }
 0xb75   :  { %4334 = vmatprep.mubr.bf16.mxu0 %v3980_v38  ;;  %4375 = vmatprep.mubr.bf16.mxu1 %v3980_v38 }
 0xb76   :  { %4335 = vmatmul.mubr.bf16.vlgmr.msra.gmra.mrb[32].mxu0 %v3979_v58  ;;  %4376 = vmatmul.mubr.bf16.vlgmr.msra.gmra.mrb[32].mxu1 %v3979_v58 }
 0xb77   :  { %8673 = vmatprep.mubr.msk.f32.mxu1 %vm9518_vm1, %v9517_v36 }
 0xc49   :  { %v4336_v40 = vpop.f32.mrb[32].mxu0  ;;  %v8651_v59 = vpop.f32.mrb[32].mxu1 }
 0xc4a   :  { %v4338_v32 = vpop.f32.mrb[33].mxu0  ;;  %v8652_v41 = vpop.f32.mrb[33].mxu1 }
 0xc4b   :  { %v8653_v42 = vadd.f32 %v8652_v41, %v8651_v59  ;;  %v4340_v43 = vpop.f32.mrb[34].mxu0  ;;  %v8654_v33 = vpop.f32.mrb[34].mxu1  ;;  %8672 = vmatpush3.xpose.msra.mxu1 %v4338_v32  ;;  %v4733_v59 = vld [vmem:[#allocation11 + $0x800] sm:$0xff]  ;;  %v4734_v41 = vld [vmem:[#allocation11 + $0x808] sm:$0xff] }
 0xc4c   :  { %v4341_v44 = vpop.f32.mrb[35].mxu0  ;;  %v8655_v45 = vpop.f32.mrb[35].mxu1  ;;  %8676 = vmatprep.subr.mxu1 %v9517_v36  ;;  %v4741_v32 = vld [vmem:[#allocation11 + $0x840] sm:$0xff]  ;;  %v4742_v33 = vld [vmem:[#allocation11 + $0x848] sm:$0xff] }
 0xc4d   :  { %v8225_v43 = vcombine.high %v4733_v59, %v4741_v32  ;;  %v4757_v44 = vld [vmem:[#allocation11 + $0x8c0] sm:$0xff]  ;;  %v8226_v45 = vcombine.low %v4734_v41, %v4742_v33 }
 0xc4e   :  { %8674 = vmatmul.mubr.f32.vlgmr.msra.gmra.mrb[36].mxu1 %v4336_v40 }
 0xc4f   :  { %8677 = vmatpush3.msk.msra.mxu1 %vm137_vm0, %v8653_v42  ;;  %8678 = vmatprep.mubr.msk.f32.mxu1 %vm9518_vm1, %v9517_v36  ;;  %v9046_v36 = vld [vmem:[#allocation10 + $0x80] ss:$8 sps:$4 sm:$0xff]   ;;  %v8224_v42 = vcombine.low %v4733_v59, %v4741_v32 }
 0xc50   :  { %4647 = vmatprep.subr.bf16.mxu1 %v9048_v53  ;;  %6351 = vmatprep.subr.bf16.mxu0 %v8225_v43  ;;  %v4846_v43 = vld [vmem:[#allocation11 + $0xb88] sm:$0xff] }
 0xc51   :  { %6352 = vmatpush1.bf16.msra.mxu0 %v8224_v42  ;;  %v4853_v42 = vld [vmem:[#allocation11 + $0xbc0] sm:$0xff] }
 0xd21   :  { %v4449_v46 = vpop.f32.mrb[36].mxu1 }
 0xd22   :  { %v4453_v47 = vmul.f32 0.70710677, %v4449_v46  ;;  %v8675_v48 = vpop.f32.mrb[37].mxu1  ;;  %v8227_v46 = vcombine.high %v4734_v41, %v4742_v33  ;;  %v4845_v41 = vld [vmem:[#allocation11 + $0xb80] sm:$0xff]  ;;  %v4854_v33 = vld [vmem:[#allocation11 + $0xbc8] sm:$0xff] }
 0xd23   :  { %v4758_v48 = vld [vmem:[#allocation11 + $0x8c8] sm:$0xff] }
 0xd24   :  { %v4454_v49 = vsel %vm710_vm2, %v4453_v47, -inf }
 0xd25   :  { %4455 = vmax.xlane.f32.xlu0 %v4454_v49  ;;  %v4765_v49 = vld [vmem:[#allocation11 + $0x900] sm:$0xff] }
 0xdb2   :  { %v4456_v17 = vpop.xlane.xlu0 %4455 }
 0xdb3   :  { %v4457_v50 = vsub.f32 %v4453_v47, %v4456_v17  ;;  %v4750_v47 = vld [vmem:[#allocation11 + $0x888] sm:$0xff] }
 0xdb4   :  { %v8243_v17 = vcombine.high %v4750_v47, %v4758_v48  ;;  %v8242_v53 = vcombine.low %v4750_v47, %v4758_v48  ;;  %v4869_v47 = vld [vmem:[#allocation11 + $0xc40] sm:$0xff]  ;;  %v4862_v48 = vld [vmem:[#allocation11 + $0xc08] sm:$0xff] }
 0xdb5   :  { %v4458_v51 = vmul.f32 1.442695, %v4457_v50  ;;  %v4773_v50 = vld [vmem:[#allocation11 + $0x940] sm:$0xff] }
 0xdb7   :  { %9288 = vpow2.f32 %v4458_v51  ;;  %v4766_v51 = vld [vmem:[#allocation11 + $0x908] sm:$0xff] }
 0xdc1   :  { %v9289_v16 = vpop.eup %9288 }
 0xdc2   :  { %v4460_v52 = vsel %vm710_vm2, %v9289_v16, 0.0 }
 0xdc3   :  { %4461 = vadd.xlane.f32.xlu1 %v4460_v52 }
 0xe50   :  { %v4462_v54 = vpop.xlane.xlu1 %4461 }
 0xe51   :  { %9290 = vrcp.f32 %v4462_v54  ;;  %v8257_v54 = vcombine.high %v4765_v49, %v4773_v50 }
 0xe5b   :  { %v9291_v55 = vpop.eup %9290 }
 0xe5c   :  { %v4464_v2 = vmul.f32 %v9291_v55, %v9289_v16  ;;  %v4774_v16 = vld [vmem:[#allocation11 + $0x948] sm:$0xff] }
 0xe5d   :  { %v8259_v55 = vcombine.high %v4766_v51, %v4774_v16 }
 0xe5e   :  { %8679 = vmatmul.mubr.msk.f32.vlgmr.msra.gmra.mrb[38].mxu1 %vm722_vm3, %v4464_v2  ;;  %v4789_v2 = vld [vmem:[#allocation11 + $0x9c0] sm:$0xff] }
 0xe5f   :  { %4648 = vmatpush1.bf16.msra.mxu1 %v9046_v36  ;;  %4679 = vmatprep.mubr.bf16.mxu1 %v9519_v11  ;;  %v9064_v11 = vld [vmem:[#allocation10 + $0xe0] ss:$8 sps:$4 sm:$0xff]  }
 0xe60   :  { %4649 = vmatprep.subr.bf16.mxu1 %v9051_v9  ;;  %v4781_v36 = vld [vmem:[#allocation11 + $0x980] sm:$0xff]  ;;  %v4782_v9 = vld [vmem:[#allocation11 + $0x988] sm:$0xff] }
 0xe63   :  { %4650 = vmatpush1.bf16.msra.mxu1 %v9049_v10  ;;  %v4790_v10 = vld [vmem:[#allocation11 + $0x9c8] sm:$0xff] }
 0xe64   :  { %4651 = vmatprep.subr.bf16.mxu1 %v9054_v14  ;;  %v8256_v14 = vcombine.low %v4765_v49, %v4773_v50  ;;  %v4870_v49 = vld [vmem:[#allocation11 + $0xc48] sm:$0xff]  ;;  %v8338_v50 = vcombine.low %v4846_v43, %v4854_v33 }
 0xe67   :  { %4652 = vmatpush1.bf16.msra.mxu1 %v9052_v20  ;;  %v8258_v20 = vcombine.low %v4766_v51, %v4774_v16  ;;  %v8355_v16 = vcombine.high %v4862_v48, %v4870_v49 }
 0xe68   :  { %4653 = vmatprep.subr.bf16.mxu1 %v9057_v21  ;;  %v8273_v21 = vcombine.high %v4781_v36, %v4789_v2 }
 0xe6b   :  { %4654 = vmatpush1.bf16.msra.mxu1 %v9055_v61  ;;  %v8275_v61 = vcombine.high %v4782_v9, %v4790_v10 }
 0xe6c   :  { %4655 = vmatprep.subr.bf16.mxu1 %v9060_v22  ;;  %v4797_v22 = vld [vmem:[#allocation11 + $0xa00] sm:$0xff] }
 0xe6f   :  { %4656 = vmatpush1.bf16.msra.mxu1 %v9058_v3  ;;  %v4805_v3 = vld [vmem:[#allocation11 + $0xa40] sm:$0xff] }
 0xe70   :  { %4657 = vmatprep.subr.bf16.mxu1 %v9063_v27  ;;  %v4798_v27 = vld [vmem:[#allocation11 + $0xa08] sm:$0xff] }
 0xe73   :  { %4658 = vmatpush1.bf16.msra.mxu1 %v9061_v24  ;;  %v4806_v24 = vld [vmem:[#allocation11 + $0xa48] sm:$0xff] }
 0xe74   :  { %4659 = vmatprep.subr.bf16.mxu1 %v9066_v62  ;;  %v8272_v62 = vcombine.low %v4781_v36, %v4789_v2  ;;  %v8354_v2 = vcombine.low %v4862_v48, %v4870_v49 }
 0xe77   :  { %4660 = vmatpush1.bf16.msra.mxu1 %v9064_v11  ;;  %v8274_v11 = vcombine.low %v4782_v9, %v4790_v10 }
 0xe78   :  { %4661 = vmatprep.subr.bf16.mxu1 %v9069_v23  ;;  %v8289_v23 = vcombine.high %v4797_v22, %v4805_v3 }
 0xe7b   :  { %4662 = vmatpush1.bf16.msra.mxu1 %v9067_v29  ;;  %v8291_v29 = vcombine.high %v4798_v27, %v4806_v24 }
 0xe7c   :  { %6392 = vmatprep.subr.bf16.mxu1 %v8227_v46  ;;  %v8339_v46 = vcombine.high %v4846_v43, %v4854_v33 }
 0xf31   :  { %v4537_v0 = vpop.f32.mrb[38].mxu1 }
 0xf32   :  { %v4541_v30 = vpack.c.bf16 %v4537_v0, %v4537_v0  ;;  %v8680_v31 = vpop.f32.mrb[39].mxu1  ;;  %v4813_v0 = vld [vmem:[#allocation11 + $0xa80] sm:$0xff] }
 0xf33   :  { %v4814_v31 = vld [vmem:[#allocation11 + $0xa88] sm:$0xff] }
 0xf34   :  { %4680 = vmatmul.mubr.bf16.vlgmr.msra.gmra.mrb[40].mxu1 %v4541_v30  ;;  %v4821_v30 = vld [vmem:[#allocation11 + $0xac0] sm:$0xff] }
 0xf35   :  { %6393 = vmatpush1.bf16.msra.mxu1 %v8226_v45  ;;  %v8337_v45 = vcombine.high %v4845_v41, %v4853_v42 }
 0xf36   :  { %6394 = vmatprep.subr.bf16.mxu1 %v8243_v17  ;;  %v8336_v17 = vcombine.low %v4845_v41, %v4853_v42  ;;  %v4934_v42 = vld [vmem:[#allocation11 + $0xe48] sm:$0xff] }
 0xf39   :  { %6395 = vmatpush1.bf16.msra.mxu1 %v8242_v53  ;;  %v4885_v53 = vld [vmem:[#allocation11 + $0xcc0] sm:$0xff] }
 0xf3a   :  { %6396 = vmatprep.subr.bf16.mxu1 %v8259_v55  ;;  %v4886_v55 = vld [vmem:[#allocation11 + $0xcc8] sm:$0xff] }
 0xf3d   :  { %6397 = vmatpush1.bf16.msra.mxu1 %v8258_v20  ;;  %v4901_v20 = vld [vmem:[#allocation11 + $0xd40] sm:$0xff] }
 0xf3e   :  { %6398 = vmatprep.subr.bf16.mxu1 %v8275_v61  ;;  %v4902_v61 = vld [vmem:[#allocation11 + $0xd48] sm:$0xff] }
 0xf41   :  { %6399 = vmatpush1.bf16.msra.mxu1 %v8274_v11 }
 0xf42   :  { %6400 = vmatprep.subr.bf16.mxu1 %v8291_v29 }
0x1007   :  { %v4681_v28 = vpop.f32.mrb[40].mxu1 }
0x1008   :  { %v4682_v35 = vadd.f32 %v4681_v28, %v4562_v39  ;;  %v4683_v8 = vpop.f32.mrb[41].mxu1  ;;  %v4822_v39 = vld [vmem:[#allocation11 + $0xac8] sm:$0xff]  ;;  %v8290_v28 = vcombine.low %v4798_v27, %v4806_v24 }
0x1009   :  { %v4684_v6 = vadd.f32 %v4683_v8, %v4566_v34  ;;  %v4685_v56 = vpop.f32.mrb[42].mxu1  ;;  %v8288_v34 = vcombine.low %v4797_v22, %v4805_v3  ;;  %v8307_v8 = vcombine.high %v4814_v31, %v4822_v39 }
0x100a   :  { %v9910_v25 = vadd.f32 %v4682_v35, %v9889_v7  ;;  %v4686_v5 = vpop.f32.mrb[43].mxu1  ;;  %v4749_v7 = vld [vmem:[#allocation11 + $0x880] sm:$0xff]  ;;  %v8305_v35 = vcombine.high %v4813_v0, %v4821_v30  ;;  %6401 = vmatpush1.bf16.msra.mxu1 %v8290_v28 }
0x100b   :  { %v9913_v37 = vadd.f32 %v4684_v6, %v9887_v57  ;;  %v8241_v57 = vcombine.high %v4749_v7, %v4757_v44  ;;  %v8240_v52 = vcombine.low %v4749_v7, %v4757_v44  ;;  %v4829_v6 = vld [vmem:[#allocation11 + $0xb00] sm:$0xff]  ;;  %v4830_v5 = vld [vmem:[#allocation11 + $0xb08] sm:$0xff]  ;;  %6402 = vmatprep.subr.bf16.mxu1 %v8307_v8 }
0x100c   :  { %v4690_v38 = vsel %vm137_vm0, %v9910_v25, 0.0  ;;  %v4837_v56 = vld [vmem:[#allocation11 + $0xb40] sm:$0xff] }
0x100d   :  { %v4691_v58 = vsel %vm137_vm0, %v9913_v37, 0.0  ;;  %6353 = vmatprep.subr.bf16.mxu0 %v8241_v57  ;;  %v8321_v59 = vcombine.high %v4829_v6, %v4837_v56  ;;  %v8320_v7 = vcombine.low %v4829_v6, %v4837_v56  ;;  %v4861_v57 = vld [vmem:[#allocation11 + $0xc00] sm:$0xff]  ;;  %v4910_v56 = vld [vmem:[#allocation11 + $0xd88] sm:$0xff] }
0x100e   :  { %v4692_v40 = vadd.f32 %v4691_v58, %v4690_v38  ;;  %6354 = vmatpush1.bf16.msra.mxu0 %v8240_v52  ;;  %v4838_v38 = vld [vmem:[#allocation11 + $0xb48] sm:$0xff]  ;;  %v8304_v58 = vcombine.low %v4813_v0, %v4821_v30  ;;  %v8353_v51 = vcombine.high %v4861_v57, %v4869_v47  ;;  %v4877_v52 = vld [vmem:[#allocation11 + $0xc80] sm:$0xff]  ;;  %v8352_v36 = vcombine.low %v4861_v57, %v4869_v47 }
0x100f   :  { %6355 = vmatprep.subr.bf16.mxu0 %v8257_v54  ;;  %v8323_v32 = vcombine.high %v4830_v5, %v4838_v38  ;;  %v8322_v44 = vcombine.low %v4830_v5, %v4838_v38  ;;  %v4878_v54 = vld [vmem:[#allocation11 + $0xc88] sm:$0xff]  ;;  %v8369_v9 = vcombine.high %v4877_v52, %v4885_v53  ;;  %v8368_v22 = vcombine.low %v4877_v52, %v4885_v53  ;;  %v4909_v8 = vld [vmem:[#allocation11 + $0xd80] sm:$0xff] }
0x1010   :  { %4693 = vadd.xlane.f32.xlu0 %v4692_v40  ;;  %v8306_v40 = vcombine.low %v4814_v31, %v4822_v39  ;;  %v8371_v10 = vcombine.high %v4878_v54, %v4886_v55  ;;  %v8370_v3 = vcombine.low %v4878_v54, %v4886_v55  ;;  %v4917_v6 = vld [vmem:[#allocation11 + $0xdc0] sm:$0xff]  ;;  %v4918_v5 = vld [vmem:[#allocation11 + $0xdc8] sm:$0xff] }
0x1011   :  { %v8400_v38 = vcombine.low %v4909_v8, %v4917_v6  ;;  %v4950_v47 = vld [vmem:[#allocation11 + $0xec8] sm:$0xff] }
0x1012   :  { %6356 = vmatpush1.bf16.msra.mxu0 %v8256_v14  ;;  %6403 = vmatpush1.bf16.msra.mxu1 %v8306_v40  ;;  %v4893_v14 = vld [vmem:[#allocation11 + $0xd00] sm:$0xff]  ;;  %v4966_v53 = vld [vmem:[#allocation11 + $0xf48] sm:$0xff] }
0x1013   :  { %6357 = vmatprep.subr.bf16.mxu0 %v8273_v21  ;;  %6404 = vmatprep.subr.bf16.mxu1 %v8323_v32  ;;  %v4894_v21 = vld [vmem:[#allocation11 + $0xd08] sm:$0xff]  ;;  %v8385_v27 = vcombine.high %v4893_v14, %v4901_v20  ;;  %v4925_v40 = vld [vmem:[#allocation11 + $0xe00] sm:$0xff] }
0x1014   :  { %v8387_v24 = vcombine.high %v4894_v21, %v4902_v61  ;;  %v8386_v11 = vcombine.low %v4894_v21, %v4902_v61  ;;  %v4926_v32 = vld [vmem:[#allocation11 + $0xe08] sm:$0xff] }
0x1015   :  { %v8418_v33 = vcombine.low %v4926_v32, %v4934_v42 }
0x1016   :  { %6358 = vmatpush1.bf16.msra.mxu0 %v8272_v62  ;;  %6405 = vmatpush1.bf16.msra.mxu1 %v8322_v44  ;;  %v8384_v62 = vcombine.low %v4893_v14, %v4901_v20  ;;  %v4941_v44 = vld [vmem:[#allocation11 + $0xe80] sm:$0xff]  ;;  %v4982_v20 = vld [vmem:[#allocation11 + $0xfc8] sm:$0xff] }
0x1017   :  { %6359 = vmatprep.subr.bf16.mxu0 %v8289_v23  ;;  %6406 = vmatprep.subr.bf16.mxu1 %v8339_v46  ;;  %v4942_v46 = vld [vmem:[#allocation11 + $0xe88] sm:$0xff] }
0x1018   :  { %v8434_v49 = vcombine.low %v4942_v46, %v4950_v47 }
0x101a   :  { %6360 = vmatpush1.bf16.msra.mxu0 %v8288_v34  ;;  %6407 = vmatpush1.bf16.msra.mxu1 %v8338_v50  ;;  %v4957_v50 = vld [vmem:[#allocation11 + $0xf00] sm:$0xff] }
0x101b   :  { %6361 = vmatprep.subr.bf16.mxu0 %v8305_v35  ;;  %6408 = vmatprep.subr.bf16.mxu1 %v8355_v16  ;;  %v4958_v16 = vld [vmem:[#allocation11 + $0xf08] sm:$0xff] }
0x101c   :  { %v8450_v55 = vcombine.low %v4958_v16, %v4966_v53 }
0x101e   :  { %6362 = vmatpush1.bf16.msra.mxu0 %v8304_v58  ;;  %6409 = vmatpush1.bf16.msra.mxu1 %v8354_v2  ;;  %v8403_v58 = vcombine.high %v4910_v56, %v4918_v5  ;;  %v4973_v2 = vld [vmem:[#allocation11 + $0xf80] sm:$0xff] }
0x101f   :  { %6363 = vmatprep.subr.bf16.mxu0 %v8321_v59  ;;  %6410 = vmatprep.subr.bf16.mxu1 %v8371_v10  ;;  %v4933_v59 = vld [vmem:[#allocation11 + $0xe40] sm:$0xff]  ;;  %v4974_v10 = vld [vmem:[#allocation11 + $0xf88] sm:$0xff] }
0x1020   :  { %v8417_v41 = vcombine.high %v4925_v40, %v4933_v59  ;;  %v8416_v43 = vcombine.low %v4925_v40, %v4933_v59  ;;  %v8466_v61 = vcombine.low %v4974_v10, %v4982_v20 }
0x1022   :  { %6364 = vmatpush1.bf16.msra.mxu0 %v8320_v7  ;;  %6411 = vmatpush1.bf16.msra.mxu1 %v8370_v3  ;;  %v8419_v7 = vcombine.high %v4926_v32, %v4934_v42  ;;  %v4735_v3 = vld [vmem:[#allocation11 + $0x810] sm:$0xff]  ;;  %v4752_v42 = vld [vmem:[#allocation11 + $0x898] sm:$0xff] }
0x1023   :  { %6365 = vmatprep.subr.bf16.mxu0 %v8337_v45  ;;  %6412 = vmatprep.subr.bf16.mxu1 %v8387_v24  ;;  %v4949_v45 = vld [vmem:[#allocation11 + $0xec0] sm:$0xff]  ;;  %v4736_v24 = vld [vmem:[#allocation11 + $0x818] sm:$0xff]  ;;  %v4751_v32 = vld [vmem:[#allocation11 + $0x890] sm:$0xff] }
0x1024   :  { %v8433_v57 = vcombine.high %v4941_v44, %v4949_v45  ;;  %v8432_v48 = vcombine.low %v4941_v44, %v4949_v45  ;;  %v4768_v44 = vld [vmem:[#allocation11 + $0x918] sm:$0xff] }
0x1025   :  { %v4776_v45 = vld [vmem:[#allocation11 + $0x958] sm:$0xff] }
0x1026   :  { %6366 = vmatpush1.bf16.msra.mxu0 %v8336_v17  ;;  %6413 = vmatpush1.bf16.msra.mxu1 %v8386_v11  ;;  %v8435_v17 = vcombine.high %v4942_v46, %v4950_v47  ;;  %v4744_v11 = vld [vmem:[#allocation11 + $0x858] sm:$0xff] }
0x1027   :  { %6367 = vmatprep.subr.bf16.mxu0 %v8353_v51  ;;  %6414 = vmatprep.subr.bf16.mxu1 %v8403_v58  ;;  %v4965_v51 = vld [vmem:[#allocation11 + $0xf40] sm:$0xff] }
0x1028   :  { %v8449_v52 = vcombine.high %v4957_v50, %v4965_v51  ;;  %v8448_v54 = vcombine.low %v4957_v50, %v4965_v51  ;;  %v4784_v50 = vld [vmem:[#allocation11 + $0x998] sm:$0xff] }
0x1029   :  { %v4792_v51 = vld [vmem:[#allocation11 + $0x9d8] sm:$0xff] }
0x102a   :  { %6368 = vmatpush1.bf16.msra.mxu0 %v8352_v36  ;;  %v8451_v36 = vcombine.high %v4958_v16, %v4966_v53 }
0x102b   :  { %6369 = vmatprep.subr.bf16.mxu0 %v8369_v9  ;;  %v4981_v9 = vld [vmem:[#allocation11 + $0xfc0] sm:$0xff] }
0x102c   :  { %v8465_v14 = vcombine.high %v4973_v2, %v4981_v9  ;;  %v8464_v21 = vcombine.low %v4973_v2, %v4981_v9  ;;  %v4800_v2 = vld [vmem:[#allocation11 + $0xa18] sm:$0xff] }
0x102d   :  { %v4808_v9 = vld [vmem:[#allocation11 + $0xa58] sm:$0xff] }
0x102e   :  { %6370 = vmatpush1.bf16.msra.mxu0 %v8368_v22  ;;  %v8467_v22 = vcombine.high %v4974_v10, %v4982_v20 }
0x102f   :  { %6371 = vmatprep.subr.bf16.mxu0 %v8385_v27  ;;  %v4743_v27 = vld [vmem:[#allocation11 + $0x850] sm:$0xff] }
0x1032   :  { %6372 = vmatpush1.bf16.msra.mxu0 %v8384_v62  ;;  %v8229_v62 = vcombine.high %v4735_v3, %v4743_v27 }
0x109d   :  { %v4694_v23 = vpop.xlane.xlu0 %4693 }
0x109e   :  { %v4695_v29 = vmul.f32 0.00390625, %v4694_v23  ;;  %v8228_v23 = vcombine.low %v4735_v3, %v4743_v27  ;;  %v4816_v3 = vld [vmem:[#allocation11 + $0xa98] sm:$0xff] }
0x109f   :  { %v4824_v27 = vld [vmem:[#allocation11 + $0xad8] sm:$0xff] }
0x10a0   :  { %v9920_v0 = vsub.f32 %v9910_v25, %v4695_v29  ;;  %v9923_v30 = vsub.f32 %v9913_v37, %v4695_v29  ;;  %v8401_v25 = vcombine.high %v4909_v8, %v4917_v6  ;;  %v8402_v37 = vcombine.low %v4910_v56, %v4918_v5 }
0x10a1   :  { %v8230_v29 = vcombine.low %v4736_v24, %v4744_v11  ;;  %v4717_v8 = vrot.slane %v9873_v1, %v9744_v12  ;;  %v4723_v56 = vrot.slane %v9875_v26, %v9747_v13 }
0x10a2   :  { %v4698_v31 = vmul.f32 %v9920_v0, %v9920_v0  ;;  %v4699_v39 = vmul.f32 %v9923_v30, %v9923_v30  ;;  %6373 = vmatprep.subr.bf16.mxu0 %v8401_v25  ;;  %6415 = vmatpush1.bf16.msra.mxu1 %v8402_v37  ;;  %v4727_v25 = vrot.slane %v9873_v1, %v9747_v13 }
0x10a3   :  { %6374 = vmatpush1.bf16.msra.mxu0 %v8400_v38  ;;  %6416 = vmatprep.subr.bf16.mxu1 %v8419_v7  ;;  %v4775_v7 = vld [vmem:[#allocation11 + $0x950] sm:$0xff] }
0x10a4   :  { %v4700_v34 = vsel %vm137_vm0, %v4698_v31, 0.0  ;;  %v4701_v28 = vsel %vm137_vm0, %v4699_v39, 0.0  ;;  %6375 = vmatprep.subr.bf16.mxu0 %v8417_v41  ;;  %v8231_v31 = vcombine.high %v4736_v24, %v4744_v11  ;;  %v4759_v41 = vld [vmem:[#allocation11 + $0x8d0] sm:$0xff] }
0x10a5   :  { %v4702_v35 = vadd.f32 %v4701_v28, %v4700_v34  ;;  %v8244_v46 = vcombine.low %v4751_v32, %v4759_v41 }
0x10a6   :  { %6417 = vmatpush1.bf16.msra.mxu1 %v8418_v33 }
0x10a7   :  { %4703 = vadd.xlane.f32.xlu1 %v4702_v35  ;;  %6376 = vmatpush1.bf16.msra.mxu0 %v8416_v43  ;;  %v4713_v35 = vrot.slane %v9875_v26, %v9744_v12  ;;  %v4760_v43 = vld [vmem:[#allocation11 + $0x8d8] sm:$0xff] }
0x10a8   :  { %6377 = vmatprep.subr.bf16.mxu0 %v8433_v57  ;;  %6418 = vmatprep.subr.bf16.mxu1 %v8435_v17  ;;  %v8247_v33 = vcombine.high %v4752_v42, %v4760_v43  ;;  %v8246_v57 = vcombine.low %v4752_v42, %v4760_v43  ;;  %v4791_v17 = vld [vmem:[#allocation11 + $0x9d0] sm:$0xff] }
0x10a9   :  { %v4863_v42 = vld [vmem:[#allocation11 + $0xc10] sm:$0xff] }
0x10aa   :  { %6419 = vmatpush1.bf16.msra.mxu1 %v8434_v49  ;;  %v4783_v49 = vld [vmem:[#allocation11 + $0x990] sm:$0xff] }
0x10ab   :  { %6378 = vmatpush1.bf16.msra.mxu0 %v8432_v48  ;;  %6420 = vmatprep.subr.bf16.mxu1 %v8451_v36  ;;  %v8263_v48 = vcombine.high %v4768_v44, %v4776_v45  ;;  %v8277_v53 = vcombine.high %v4783_v49, %v4791_v17  ;;  %v4807_v36 = vld [vmem:[#allocation11 + $0xa50] sm:$0xff]  ;;  %v8276_v10 = vcombine.low %v4783_v49, %v4791_v17 }
0x10ac   :  { %6379 = vmatprep.subr.bf16.mxu0 %v8449_v52  ;;  %v8262_v52 = vcombine.low %v4768_v44, %v4776_v45  ;;  %v4871_v43 = vld [vmem:[#allocation11 + $0xc50] sm:$0xff] }
0x10ad   :  { %v8357_v44 = vcombine.high %v4863_v42, %v4871_v43  ;;  %v8356_v49 = vcombine.low %v4863_v42, %v4871_v43 }
0x10ae   :  { %6421 = vmatpush1.bf16.msra.mxu1 %v8450_v55  ;;  %v4799_v55 = vld [vmem:[#allocation11 + $0xa10] sm:$0xff] }
0x10af   :  { %6380 = vmatpush1.bf16.msra.mxu0 %v8448_v54  ;;  %6422 = vmatprep.subr.bf16.mxu1 %v8467_v22  ;;  %v8279_v54 = vcombine.high %v4784_v50, %v4792_v51  ;;  %v8293_v20 = vcombine.high %v4799_v55, %v4807_v36  ;;  %v4823_v22 = vld [vmem:[#allocation11 + $0xad0] sm:$0xff]  ;;  %v8292_v24 = vcombine.low %v4799_v55, %v4807_v36 }
0x10b0   :  { %6381 = vmatprep.subr.bf16.mxu0 %v8465_v14  ;;  %v8278_v14 = vcombine.low %v4784_v50, %v4792_v51 }
0x10b2   :  { %6423 = vmatpush1.bf16.msra.mxu1 %v8466_v61  ;;  %v4815_v61 = vld [vmem:[#allocation11 + $0xa90] sm:$0xff] }
0x10b3   :  { %6382 = vmatpush1.bf16.msra.mxu0 %v8464_v21  ;;  %6474 = vmatprep.subr.bf16.mxu1 %v8231_v31  ;;  %v8295_v21 = vcombine.high %v4800_v2, %v4808_v9  ;;  %v8309_v11 = vcombine.high %v4815_v61, %v4823_v22  ;;  %v4839_v31 = vld [vmem:[#allocation11 + $0xb50] sm:$0xff] }
0x10b4   :  { %6433 = vmatprep.subr.bf16.mxu0 %v8229_v62  ;;  %v8294_v62 = vcombine.low %v4800_v2, %v4808_v9 }
0x1134   :  { %v4704_v39 = vpop.xlane.xlu1 %4703 }
0x1135   :  { %v4705_v34 = vmul.f32 0.00390625, %v4704_v39  ;;  %v4832_v39 = vld [vmem:[#allocation11 + $0xb18] sm:$0xff] }
0x1137   :  { %v4706_v28 = vadd.f32 1e-05, %v4705_v34  ;;  %v4840_v34 = vld [vmem:[#allocation11 + $0xb58] sm:$0xff] }
0x1139   :  { %9292 = vrsqrt.f32 %v4706_v28  ;;  %v8308_v28 = vcombine.low %v4815_v61, %v4823_v22 }
0x1143   :  { %v9293_v6 = vpop.eup %9292 }
0x1144   :  { %v4708_v5 = vmul.f32 %v9293_v6, %v9920_v0  ;;  %v4709_v38 = vmul.f32 %v9293_v6, %v9923_v30  ;;  %v4767_v0 = vld [vmem:[#allocation11 + $0x910] sm:$0xff]  ;;  %v8245_v30 = vcombine.high %v4751_v32, %v4759_v41  ;;  %v8327_v6 = vcombine.high %v4832_v39, %v4840_v34 }
0x1145   :  { %v8261_v47 = vcombine.high %v4767_v0, %v4775_v7  ;;  %v8260_v16 = vcombine.low %v4767_v0, %v4775_v7  ;;  %v4864_v0 = vld [vmem:[#allocation11 + $0xc18] sm:$0xff] }
0x1146   :  { %v4718_v37 = vmul.f32 %v4713_v35, %v4708_v5  ;;  %v4719_v58 = vmul.f32 %v4717_v8, %v4709_v38  ;;  %v8310_v35 = vcombine.low %v4816_v3, %v4824_v27  ;;  %v4848_v5 = vld [vmem:[#allocation11 + $0xb98] sm:$0xff] }
0x1147   :  { %v4856_v38 = vld [vmem:[#allocation11 + $0xbd8] sm:$0xff] }
0x1148   :  { %v9941_v40 = vadd.f32 %v4723_v56, %v4718_v37  ;;  %v9943_v59 = vadd.f32 %v4727_v25, %v4719_v58  ;;  %v4847_v56 = vld [vmem:[#allocation11 + $0xb90] sm:$0xff]  ;;  %v8326_v58 = vcombine.low %v4832_v39, %v4840_v34  ;;  %v8343_v41 = vcombine.high %v4848_v5, %v4856_v38 }
0x1149   :  { %v4855_v25 = vld [vmem:[#allocation11 + $0xbd0] sm:$0xff]  ;;  %v8342_v7 = vcombine.low %v4848_v5, %v4856_v38 }
0x114a   :  { %v9947_v26 = vpack.c.bf16 %v9941_v40, %v9941_v40  ;;  %v9951_v1 = vpack.c.bf16 %v9943_v59, %v9943_v59  ;;  %v8341_v32 = vcombine.high %v4847_v56, %v4855_v25 }
0x114c   :  { %6383 = vmatprep.mubr.bf16.mxu0 %v9951_v1  ;;  %6424 = vmatprep.mubr.bf16.mxu1 %v9951_v1 }
0x114d   :  { %6384 = vmatmul.mubr.bf16.vlgmr.msra.gmra.mrb[36].mxu0 %v9947_v26  ;;  %6425 = vmatmul.mubr.bf16.vlgmr.msra.gmra.mrb[44].mxu1 %v9947_v26 }
0x114e   :  { %6434 = vmatpush1.bf16.msra.mxu0 %v8228_v23  ;;  %6475 = vmatpush1.bf16.msra.mxu1 %v8230_v29  ;;  %v8311_v23 = vcombine.high %v4816_v3, %v4824_v27  ;;  %v4831_v29 = vld [vmem:[#allocation11 + $0xb10] sm:$0xff] }
0x114f   :  { %6465 = vmatprep.mubr.bf16.mxu0 %v9951_v1  ;;  %6506 = vmatprep.mubr.bf16.mxu1 %v9951_v1  ;;  %v8325_v8 = vcombine.high %v4831_v29, %v4839_v31  ;;  %v8324_v37 = vcombine.low %v4831_v29, %v4839_v31 }
0x1150   :  { %6435 = vmatprep.subr.bf16.mxu0 %v8245_v30  ;;  %6476 = vmatprep.subr.bf16.mxu1 %v8247_v33  ;;  %v4872_v30 = vld [vmem:[#allocation11 + $0xc58] sm:$0xff]  ;;  %v8340_v33 = vcombine.low %v4847_v56, %v4855_v25 }
0x1151   :  { %v8359_v45 = vcombine.high %v4864_v0, %v4872_v30  ;;  %v8358_v17 = vcombine.low %v4864_v0, %v4872_v30 }
0x1152   :  { %6436 = vmatpush1.bf16.msra.mxu0 %v8244_v46  ;;  %6477 = vmatpush1.bf16.msra.mxu1 %v8246_v57  ;;  %v4879_v46 = vld [vmem:[#allocation11 + $0xc90] sm:$0xff] }
0x1153   :  { %6437 = vmatprep.subr.bf16.mxu0 %v8261_v47  ;;  %6478 = vmatprep.subr.bf16.mxu1 %v8263_v48  ;;  %v4887_v57 = vld [vmem:[#allocation11 + $0xcd0] sm:$0xff]  ;;  %v4880_v47 = vld [vmem:[#allocation11 + $0xc98] sm:$0xff] }
0x1154   :  { %v4888_v48 = vld [vmem:[#allocation11 + $0xcd8] sm:$0xff]  ;;  %v8373_v50 = vcombine.high %v4879_v46, %v4887_v57  ;;  %v8372_v55 = vcombine.low %v4879_v46, %v4887_v57 }
0x1155   :  { %v8375_v51 = vcombine.high %v4880_v47, %v4888_v48  ;;  %v8374_v36 = vcombine.low %v4880_v47, %v4888_v48 }
0x1156   :  { %6438 = vmatpush1.bf16.msra.mxu0 %v8260_v16  ;;  %6479 = vmatpush1.bf16.msra.mxu1 %v8262_v52  ;;  %v4895_v16 = vld [vmem:[#allocation11 + $0xd10] sm:$0xff] }
0x1157   :  { %6439 = vmatprep.subr.bf16.mxu0 %v8277_v53  ;;  %6480 = vmatprep.subr.bf16.mxu1 %v8279_v54  ;;  %v4903_v52 = vld [vmem:[#allocation11 + $0xd50] sm:$0xff]  ;;  %v4896_v53 = vld [vmem:[#allocation11 + $0xd18] sm:$0xff] }
0x1158   :  { %v4904_v54 = vld [vmem:[#allocation11 + $0xd58] sm:$0xff]  ;;  %v8389_v2 = vcombine.high %v4895_v16, %v4903_v52  ;;  %v8388_v61 = vcombine.low %v4895_v16, %v4903_v52 }
0x1159   :  { %v8391_v9 = vcombine.high %v4896_v53, %v4904_v54  ;;  %v8390_v22 = vcombine.low %v4896_v53, %v4904_v54 }
0x115a   :  { %6440 = vmatpush1.bf16.msra.mxu0 %v8276_v10  ;;  %6481 = vmatpush1.bf16.msra.mxu1 %v8278_v14  ;;  %v4911_v10 = vld [vmem:[#allocation11 + $0xd90] sm:$0xff] }
0x115b   :  { %6441 = vmatprep.subr.bf16.mxu0 %v8293_v20  ;;  %6482 = vmatprep.subr.bf16.mxu1 %v8295_v21  ;;  %v4919_v14 = vld [vmem:[#allocation11 + $0xdd0] sm:$0xff]  ;;  %v4912_v20 = vld [vmem:[#allocation11 + $0xd98] sm:$0xff] }
0x115c   :  { %v4920_v21 = vld [vmem:[#allocation11 + $0xdd8] sm:$0xff]  ;;  %v8405_v3 = vcombine.high %v4911_v10, %v4919_v14  ;;  %v8404_v29 = vcombine.low %v4911_v10, %v4919_v14 }
0x115d   :  { %v8407_v27 = vcombine.high %v4912_v20, %v4920_v21  ;;  %v8406_v31 = vcombine.low %v4912_v20, %v4920_v21 }
0x115e   :  { %6442 = vmatpush1.bf16.msra.mxu0 %v8292_v24  ;;  %6483 = vmatpush1.bf16.msra.mxu1 %v8294_v62  ;;  %v4927_v24 = vld [vmem:[#allocation11 + $0xe10] sm:$0xff] }
0x115f   :  { %6443 = vmatprep.subr.bf16.mxu0 %v8309_v11  ;;  %6484 = vmatprep.subr.bf16.mxu1 %v8311_v23  ;;  %v4935_v62 = vld [vmem:[#allocation11 + $0xe50] sm:$0xff]  ;;  %v4928_v11 = vld [vmem:[#allocation11 + $0xe18] sm:$0xff] }
0x1160   :  { %v4936_v23 = vld [vmem:[#allocation11 + $0xe58] sm:$0xff]  ;;  %v8421_v39 = vcombine.high %v4927_v24, %v4935_v62  ;;  %v8420_v56 = vcombine.low %v4927_v24, %v4935_v62 }
0x1161   :  { %v8423_v34 = vcombine.high %v4928_v11, %v4936_v23  ;;  %v8422_v25 = vcombine.low %v4928_v11, %v4936_v23 }
0x1162   :  { %6444 = vmatpush1.bf16.msra.mxu0 %v8308_v28  ;;  %6485 = vmatpush1.bf16.msra.mxu1 %v8310_v35  ;;  %v4943_v28 = vld [vmem:[#allocation11 + $0xe90] sm:$0xff] }
0x1163   :  { %6445 = vmatprep.subr.bf16.mxu0 %v8325_v8  ;;  %6486 = vmatprep.subr.bf16.mxu1 %v8327_v6  ;;  %v4951_v35 = vld [vmem:[#allocation11 + $0xed0] sm:$0xff]  ;;  %v4944_v8 = vld [vmem:[#allocation11 + $0xe98] sm:$0xff] }
0x1164   :  { %v4952_v6 = vld [vmem:[#allocation11 + $0xed8] sm:$0xff]  ;;  %v8437_v5 = vcombine.high %v4943_v28, %v4951_v35  ;;  %v8436_v42 = vcombine.low %v4943_v28, %v4951_v35 }
0x1165   :  { %v8439_v38 = vcombine.high %v4944_v8, %v4952_v6  ;;  %v8438_v43 = vcombine.low %v4944_v8, %v4952_v6 }
0x1166   :  { %6446 = vmatpush1.bf16.msra.mxu0 %v8324_v37  ;;  %6487 = vmatpush1.bf16.msra.mxu1 %v8326_v58  ;;  %v4959_v37 = vld [vmem:[#allocation11 + $0xf10] sm:$0xff] }
0x1167   :  { %6447 = vmatprep.subr.bf16.mxu0 %v8341_v32  ;;  %6488 = vmatprep.subr.bf16.mxu1 %v8343_v41  ;;  %v4967_v58 = vld [vmem:[#allocation11 + $0xf50] sm:$0xff]  ;;  %v4960_v32 = vld [vmem:[#allocation11 + $0xf18] sm:$0xff] }
0x1168   :  { %v4968_v41 = vld [vmem:[#allocation11 + $0xf58] sm:$0xff]  ;;  %v8453_v0 = vcombine.high %v4959_v37, %v4967_v58  ;;  %v8452_v46 = vcombine.low %v4959_v37, %v4967_v58 }
0x1169   :  { %v8455_v30 = vcombine.high %v4960_v32, %v4968_v41  ;;  %v8454_v57 = vcombine.low %v4960_v32, %v4968_v41 }
0x116a   :  { %6448 = vmatpush1.bf16.msra.mxu0 %v8340_v33  ;;  %6489 = vmatpush1.bf16.msra.mxu1 %v8342_v7  ;;  %v4975_v33 = vld [vmem:[#allocation11 + $0xf90] sm:$0xff] }
0x116b   :  { %6449 = vmatprep.subr.bf16.mxu0 %v8357_v44  ;;  %6490 = vmatprep.subr.bf16.mxu1 %v8359_v45  ;;  %v4983_v7 = vld [vmem:[#allocation11 + $0xfd0] sm:$0xff]  ;;  %v4976_v44 = vld [vmem:[#allocation11 + $0xf98] sm:$0xff] }
0x116c   :  { %v4984_v45 = vld [vmem:[#allocation11 + $0xfd8] sm:$0xff]  ;;  %v8469_v47 = vcombine.high %v4975_v33, %v4983_v7  ;;  %v8468_v16 = vcombine.low %v4975_v33, %v4983_v7 }
0x116d   :  { %v8471_v48 = vcombine.high %v4976_v44, %v4984_v45  ;;  %v8470_v52 = vcombine.low %v4976_v44, %v4984_v45 }
0x116e   :  { %6450 = vmatpush1.bf16.msra.mxu0 %v8356_v49  ;;  %6491 = vmatpush1.bf16.msra.mxu1 %v8358_v17  ;;  %v4737_v49 = vld [vmem:[#allocation11 + $0x820] sm:$0xff] }
0x116f   :  { %6451 = vmatprep.subr.bf16.mxu0 %v8373_v50  ;;  %6492 = vmatprep.subr.bf16.mxu1 %v8375_v51  ;;  %v4745_v17 = vld [vmem:[#allocation11 + $0x860] sm:$0xff]  ;;  %v4738_v50 = vld [vmem:[#allocation11 + $0x828] sm:$0xff] }
0x1170   :  { %v4746_v51 = vld [vmem:[#allocation11 + $0x868] sm:$0xff]  ;;  %v8233_v53 = vcombine.high %v4737_v49, %v4745_v17  ;;  %v8232_v10 = vcombine.low %v4737_v49, %v4745_v17 }
0x1171   :  { %v8235_v54 = vcombine.high %v4738_v50, %v4746_v51  ;;  %v8234_v14 = vcombine.low %v4738_v50, %v4746_v51 }
0x1172   :  { %6452 = vmatpush1.bf16.msra.mxu0 %v8372_v55  ;;  %6493 = vmatpush1.bf16.msra.mxu1 %v8374_v36  ;;  %v4753_v55 = vld [vmem:[#allocation11 + $0x8a0] sm:$0xff] }
0x1173   :  { %6453 = vmatprep.subr.bf16.mxu0 %v8389_v2  ;;  %6494 = vmatprep.subr.bf16.mxu1 %v8391_v9  ;;  %v4761_v36 = vld [vmem:[#allocation11 + $0x8e0] sm:$0xff]  ;;  %v4754_v2 = vld [vmem:[#allocation11 + $0x8a8] sm:$0xff] }
0x1174   :  { %v4762_v9 = vld [vmem:[#allocation11 + $0x8e8] sm:$0xff]  ;;  %v8249_v20 = vcombine.high %v4753_v55, %v4761_v36  ;;  %v8248_v24 = vcombine.low %v4753_v55, %v4761_v36 }
0x1175   :  { %v8251_v21 = vcombine.high %v4754_v2, %v4762_v9  ;;  %v8250_v62 = vcombine.low %v4754_v2, %v4762_v9 }
0x1176   :  { %6454 = vmatpush1.bf16.msra.mxu0 %v8388_v61  ;;  %6495 = vmatpush1.bf16.msra.mxu1 %v8390_v22  ;;  %v4769_v61 = vld [vmem:[#allocation11 + $0x920] sm:$0xff] }
0x1177   :  { %6455 = vmatprep.subr.bf16.mxu0 %v8405_v3  ;;  %6496 = vmatprep.subr.bf16.mxu1 %v8407_v27  ;;  %v4777_v22 = vld [vmem:[#allocation11 + $0x960] sm:$0xff]  ;;  %v4770_v3 = vld [vmem:[#allocation11 + $0x928] sm:$0xff] }
0x1178   :  { %v4778_v27 = vld [vmem:[#allocation11 + $0x968] sm:$0xff]  ;;  %v8265_v11 = vcombine.high %v4769_v61, %v4777_v22  ;;  %v8264_v28 = vcombine.low %v4769_v61, %v4777_v22 }
0x1179   :  { %v8267_v23 = vcombine.high %v4770_v3, %v4778_v27  ;;  %v8266_v35 = vcombine.low %v4770_v3, %v4778_v27 }
0x117a   :  { %6456 = vmatpush1.bf16.msra.mxu0 %v8404_v29  ;;  %6497 = vmatpush1.bf16.msra.mxu1 %v8406_v31  ;;  %v4785_v29 = vld [vmem:[#allocation11 + $0x9a0] sm:$0xff] }
0x117b   :  { %6457 = vmatprep.subr.bf16.mxu0 %v8421_v39  ;;  %6498 = vmatprep.subr.bf16.mxu1 %v8423_v34  ;;  %v4793_v31 = vld [vmem:[#allocation11 + $0x9e0] sm:$0xff]  ;;  %v4786_v39 = vld [vmem:[#allocation11 + $0x9a8] sm:$0xff] }
0x117c   :  { %v4794_v34 = vld [vmem:[#allocation11 + $0x9e8] sm:$0xff]  ;;  %v8281_v8 = vcombine.high %v4785_v29, %v4793_v31  ;;  %v8280_v37 = vcombine.low %v4785_v29, %v4793_v31 }
0x117d   :  { %v8283_v6 = vcombine.high %v4786_v39, %v4794_v34  ;;  %v8282_v58 = vcombine.low %v4786_v39, %v4794_v34 }
0x117e   :  { %6458 = vmatpush1.bf16.msra.mxu0 %v8420_v56  ;;  %6499 = vmatpush1.bf16.msra.mxu1 %v8422_v25  ;;  %v4801_v56 = vld [vmem:[#allocation11 + $0xa20] sm:$0xff] }
0x117f   :  { %6459 = vmatprep.subr.bf16.mxu0 %v8437_v5  ;;  %6500 = vmatprep.subr.bf16.mxu1 %v8439_v38  ;;  %v4809_v25 = vld [vmem:[#allocation11 + $0xa60] sm:$0xff]  ;;  %v4802_v5 = vld [vmem:[#allocation11 + $0xa28] sm:$0xff] }
0x1180   :  { %v4810_v38 = vld [vmem:[#allocation11 + $0xa68] sm:$0xff]  ;;  %v8297_v32 = vcombine.high %v4801_v56, %v4809_v25  ;;  %v8296_v33 = vcombine.low %v4801_v56, %v4809_v25 }
0x1181   :  { %v8299_v41 = vcombine.high %v4802_v5, %v4810_v38  ;;  %v8298_v7 = vcombine.low %v4802_v5, %v4810_v38 }
0x1182   :  { %6460 = vmatpush1.bf16.msra.mxu0 %v8436_v42  ;;  %6501 = vmatpush1.bf16.msra.mxu1 %v8438_v43  ;;  %v4817_v42 = vld [vmem:[#allocation11 + $0xaa0] sm:$0xff] }
0x1183   :  { %6461 = vmatprep.subr.bf16.mxu0 %v8453_v0  ;;  %6502 = vmatprep.subr.bf16.mxu1 %v8455_v30  ;;  %v4825_v43 = vld [vmem:[#allocation11 + $0xae0] sm:$0xff]  ;;  %v4818_v0 = vld [vmem:[#allocation11 + $0xaa8] sm:$0xff] }
0x1184   :  { %v4826_v30 = vld [vmem:[#allocation11 + $0xae8] sm:$0xff]  ;;  %v8313_v44 = vcombine.high %v4817_v42, %v4825_v43  ;;  %v8312_v49 = vcombine.low %v4817_v42, %v4825_v43 }
0x1185   :  { %v8315_v45 = vcombine.high %v4818_v0, %v4826_v30  ;;  %v8314_v17 = vcombine.low %v4818_v0, %v4826_v30 }
0x1186   :  { %6462 = vmatpush1.bf16.msra.mxu0 %v8452_v46  ;;  %6503 = vmatpush1.bf16.msra.mxu1 %v8454_v57  ;;  %v4833_v46 = vld [vmem:[#allocation11 + $0xb20] sm:$0xff] }
0x1187   :  { %6463 = vmatprep.subr.bf16.mxu0 %v8469_v47  ;;  %6504 = vmatprep.subr.bf16.mxu1 %v8471_v48  ;;  %v4841_v57 = vld [vmem:[#allocation11 + $0xb60] sm:$0xff]  ;;  %v4834_v47 = vld [vmem:[#allocation11 + $0xb28] sm:$0xff] }
0x1188   :  { %v4842_v48 = vld [vmem:[#allocation11 + $0xb68] sm:$0xff]  ;;  %v8329_v50 = vcombine.high %v4833_v46, %v4841_v57  ;;  %v8328_v55 = vcombine.low %v4833_v46, %v4841_v57 }
0x1189   :  { %v8331_v51 = vcombine.high %v4834_v47, %v4842_v48  ;;  %v8330_v36 = vcombine.low %v4834_v47, %v4842_v48 }
0x118a   :  { %6464 = vmatpush1.bf16.msra.mxu0 %v8468_v16  ;;  %6505 = vmatpush1.bf16.msra.mxu1 %v8470_v52  ;;  %v4849_v16 = vld [vmem:[#allocation11 + $0xba0] sm:$0xff] }
0x118b   :  { %6515 = vmatprep.subr.bf16.mxu0 %v8233_v53  ;;  %6556 = vmatprep.subr.bf16.mxu1 %v8235_v54  ;;  %v4857_v52 = vld [vmem:[#allocation11 + $0xbe0] sm:$0xff]  ;;  %v4850_v53 = vld [vmem:[#allocation11 + $0xba8] sm:$0xff] }
0x118c   :  { %v4858_v54 = vld [vmem:[#allocation11 + $0xbe8] sm:$0xff]  ;;  %v8345_v2 = vcombine.high %v4849_v16, %v4857_v52  ;;  %v8344_v61 = vcombine.low %v4849_v16, %v4857_v52 }
0x118d   :  { %6466 = vmatmul.mubr.bf16.vlgmr.msra.gmra.mrb[40].mxu0 %v9947_v26  ;;  %6507 = vmatmul.mubr.bf16.vlgmr.msra.gmra.mrb[48].mxu1 %v9947_v26  ;;  %v8347_v9 = vcombine.high %v4850_v53, %v4858_v54  ;;  %v8346_v22 = vcombine.low %v4850_v53, %v4858_v54 }
0x118e   :  { %6516 = vmatpush1.bf16.msra.mxu0 %v8232_v10  ;;  %6547 = vmatprep.mubr.bf16.mxu0 %v9951_v1  ;;  %v4865_v10 = vld [vmem:[#allocation11 + $0xc20] sm:$0xff] }
0x118f   :  { %6557 = vmatpush1.bf16.msra.mxu1 %v8234_v14  ;;  %6588 = vmatprep.mubr.bf16.mxu1 %v9951_v1  ;;  %v4873_v14 = vld [vmem:[#allocation11 + $0xc60] sm:$0xff] }
0x1190   :  { %6517 = vmatprep.subr.bf16.mxu0 %v8249_v20  ;;  %6558 = vmatprep.subr.bf16.mxu1 %v8251_v21  ;;  %v4866_v20 = vld [vmem:[#allocation11 + $0xc28] sm:$0xff]  ;;  %v8361_v3 = vcombine.high %v4865_v10, %v4873_v14  ;;  %v8360_v29 = vcombine.low %v4865_v10, %v4873_v14 }
0x1191   :  { %v4874_v21 = vld [vmem:[#allocation11 + $0xc68] sm:$0xff] }
0x1192   :  { %6518 = vmatpush1.bf16.msra.mxu0 %v8248_v24  ;;  %v8363_v27 = vcombine.high %v4866_v20, %v4874_v21  ;;  %v4881_v24 = vld [vmem:[#allocation11 + $0xca0] sm:$0xff]  ;;  %v8362_v31 = vcombine.low %v4866_v20, %v4874_v21 }
0x1193   :  { %6559 = vmatpush1.bf16.msra.mxu1 %v8250_v62  ;;  %6519 = vmatprep.subr.bf16.mxu0 %v8265_v11  ;;  %v4889_v62 = vld [vmem:[#allocation11 + $0xce0] sm:$0xff]  ;;  %v4882_v11 = vld [vmem:[#allocation11 + $0xca8] sm:$0xff] }
0x1194   :  { %6560 = vmatprep.subr.bf16.mxu1 %v8267_v23  ;;  %v4890_v23 = vld [vmem:[#allocation11 + $0xce8] sm:$0xff]  ;;  %v8377_v39 = vcombine.high %v4881_v24, %v4889_v62  ;;  %v8376_v56 = vcombine.low %v4881_v24, %v4889_v62 }
0x1195   :  { %v8379_v34 = vcombine.high %v4882_v11, %v4890_v23  ;;  %v8378_v25 = vcombine.low %v4882_v11, %v4890_v23 }
0x1196   :  { %6520 = vmatpush1.bf16.msra.mxu0 %v8264_v28  ;;  %v4897_v28 = vld [vmem:[#allocation11 + $0xd20] sm:$0xff] }
0x1197   :  { %6561 = vmatpush1.bf16.msra.mxu1 %v8266_v35  ;;  %6521 = vmatprep.subr.bf16.mxu0 %v8281_v8  ;;  %v4905_v35 = vld [vmem:[#allocation11 + $0xd60] sm:$0xff]  ;;  %v4898_v8 = vld [vmem:[#allocation11 + $0xd28] sm:$0xff] }
0x1198   :  { %6562 = vmatprep.subr.bf16.mxu1 %v8283_v6  ;;  %v4906_v6 = vld [vmem:[#allocation11 + $0xd68] sm:$0xff]  ;;  %v8393_v5 = vcombine.high %v4897_v28, %v4905_v35  ;;  %v8392_v42 = vcombine.low %v4897_v28, %v4905_v35 }
0x1199   :  { %v8395_v38 = vcombine.high %v4898_v8, %v4906_v6  ;;  %v8394_v43 = vcombine.low %v4898_v8, %v4906_v6 }
0x119a   :  { %6522 = vmatpush1.bf16.msra.mxu0 %v8280_v37  ;;  %v4913_v37 = vld [vmem:[#allocation11 + $0xda0] sm:$0xff] }
0x119b   :  { %6563 = vmatpush1.bf16.msra.mxu1 %v8282_v58  ;;  %6523 = vmatprep.subr.bf16.mxu0 %v8297_v32  ;;  %v4921_v58 = vld [vmem:[#allocation11 + $0xde0] sm:$0xff]  ;;  %v4914_v32 = vld [vmem:[#allocation11 + $0xda8] sm:$0xff] }
0x119c   :  { %6564 = vmatprep.subr.bf16.mxu1 %v8299_v41  ;;  %v4922_v41 = vld [vmem:[#allocation11 + $0xde8] sm:$0xff]  ;;  %v8409_v0 = vcombine.high %v4913_v37, %v4921_v58  ;;  %v8408_v46 = vcombine.low %v4913_v37, %v4921_v58  ;;  %v4764_v37 = vld [vmem:[#allocation11 + $0x8f8] sm:$0xff] }
0x119d   :  { %v8411_v30 = vcombine.high %v4914_v32, %v4922_v41  ;;  %v8410_v57 = vcombine.low %v4914_v32, %v4922_v41  ;;  %v4771_v41 = vld [vmem:[#allocation11 + $0x930] sm:$0xff] }
0x119e   :  { %6524 = vmatpush1.bf16.msra.mxu0 %v8296_v33  ;;  %v4929_v33 = vld [vmem:[#allocation11 + $0xe20] sm:$0xff] }
0x119f   :  { %6565 = vmatpush1.bf16.msra.mxu1 %v8298_v7  ;;  %6525 = vmatprep.subr.bf16.mxu0 %v8313_v44  ;;  %v4937_v7 = vld [vmem:[#allocation11 + $0xe60] sm:$0xff]  ;;  %v4930_v44 = vld [vmem:[#allocation11 + $0xe28] sm:$0xff] }
0x11a0   :  { %6566 = vmatprep.subr.bf16.mxu1 %v8315_v45  ;;  %v4938_v45 = vld [vmem:[#allocation11 + $0xe68] sm:$0xff]  ;;  %v8425_v47 = vcombine.high %v4929_v33, %v4937_v7  ;;  %v8424_v16 = vcombine.low %v4929_v33, %v4937_v7 }
0x11a1   :  { %v8427_v48 = vcombine.high %v4930_v44, %v4938_v45  ;;  %v8426_v52 = vcombine.low %v4930_v44, %v4938_v45 }
0x11a2   :  { %6526 = vmatpush1.bf16.msra.mxu0 %v8312_v49  ;;  %v4945_v49 = vld [vmem:[#allocation11 + $0xea0] sm:$0xff] }
0x11a3   :  { %6567 = vmatpush1.bf16.msra.mxu1 %v8314_v17  ;;  %6527 = vmatprep.subr.bf16.mxu0 %v8329_v50  ;;  %v4953_v17 = vld [vmem:[#allocation11 + $0xee0] sm:$0xff]  ;;  %v4946_v50 = vld [vmem:[#allocation11 + $0xea8] sm:$0xff] }
0x11a4   :  { %6568 = vmatprep.subr.bf16.mxu1 %v8331_v51  ;;  %v4954_v51 = vld [vmem:[#allocation11 + $0xee8] sm:$0xff]  ;;  %v8441_v53 = vcombine.high %v4945_v49, %v4953_v17  ;;  %v8440_v10 = vcombine.low %v4945_v49, %v4953_v17 }
0x11a5   :  { %v8443_v54 = vcombine.high %v4946_v50, %v4954_v51  ;;  %v8442_v14 = vcombine.low %v4946_v50, %v4954_v51 }
0x11a6   :  { %6528 = vmatpush1.bf16.msra.mxu0 %v8328_v55  ;;  %v4961_v55 = vld [vmem:[#allocation11 + $0xf20] sm:$0xff] }
0x11a7   :  { %6569 = vmatpush1.bf16.msra.mxu1 %v8330_v36  ;;  %6529 = vmatprep.subr.bf16.mxu0 %v8345_v2  ;;  %v4969_v36 = vld [vmem:[#allocation11 + $0xf60] sm:$0xff]  ;;  %v4962_v2 = vld [vmem:[#allocation11 + $0xf28] sm:$0xff] }
0x11a8   :  { %6570 = vmatprep.subr.bf16.mxu1 %v8347_v9  ;;  %v4970_v9 = vld [vmem:[#allocation11 + $0xf68] sm:$0xff]  ;;  %v8457_v20 = vcombine.high %v4961_v55, %v4969_v36  ;;  %v8456_v24 = vcombine.low %v4961_v55, %v4969_v36 }
0x11a9   :  { %v8459_v21 = vcombine.high %v4962_v2, %v4970_v9  ;;  %v8458_v62 = vcombine.low %v4962_v2, %v4970_v9  ;;  %v4819_v9 = vld [vmem:[#allocation11 + $0xab0] sm:$0xff] }
0x11aa   :  { %6530 = vmatpush1.bf16.msra.mxu0 %v8344_v61  ;;  %v4977_v61 = vld [vmem:[#allocation11 + $0xfa0] sm:$0xff] }
0x11ab   :  { %6571 = vmatpush1.bf16.msra.mxu1 %v8346_v22  ;;  %6531 = vmatprep.subr.bf16.mxu0 %v8361_v3  ;;  %v4985_v22 = vld [vmem:[#allocation11 + $0xfe0] sm:$0xff]  ;;  %v4978_v3 = vld [vmem:[#allocation11 + $0xfa8] sm:$0xff] }
0x11ac   :  { %6572 = vmatprep.subr.bf16.mxu1 %v8363_v27  ;;  %v4986_v27 = vld [vmem:[#allocation11 + $0xfe8] sm:$0xff]  ;;  %v8473_v11 = vcombine.high %v4977_v61, %v4985_v22  ;;  %v8472_v28 = vcombine.low %v4977_v61, %v4985_v22 }
0x11ad   :  { %v8475_v23 = vcombine.high %v4978_v3, %v4986_v27  ;;  %v8474_v35 = vcombine.low %v4978_v3, %v4986_v27  ;;  %v4835_v27 = vld [vmem:[#allocation11 + $0xb30] sm:$0xff] }
0x11ae   :  { %6532 = vmatpush1.bf16.msra.mxu0 %v8360_v29  ;;  %v4739_v29 = vld [vmem:[#allocation11 + $0x830] sm:$0xff] }
0x11af   :  { %6573 = vmatpush1.bf16.msra.mxu1 %v8362_v31  ;;  %6533 = vmatprep.subr.bf16.mxu0 %v8377_v39  ;;  %v4747_v31 = vld [vmem:[#allocation11 + $0x870] sm:$0xff]  ;;  %v4740_v39 = vld [vmem:[#allocation11 + $0x838] sm:$0xff] }
0x11b0   :  { %6574 = vmatprep.subr.bf16.mxu1 %v8379_v34  ;;  %v4748_v34 = vld [vmem:[#allocation11 + $0x878] sm:$0xff]  ;;  %v8237_v8 = vcombine.high %v4739_v29, %v4747_v31 }
0x11b1   :  { %v8239_v6 = vcombine.high %v4740_v39, %v4748_v34  ;;  %v8238_v58 = vcombine.low %v4740_v39, %v4748_v34  ;;  %v4851_v34 = vld [vmem:[#allocation11 + $0xbb0] sm:$0xff] }
0x11b2   :  { %6534 = vmatpush1.bf16.msra.mxu0 %v8376_v56  ;;  %v4755_v56 = vld [vmem:[#allocation11 + $0x8b0] sm:$0xff] }
0x11b3   :  { %6575 = vmatpush1.bf16.msra.mxu1 %v8378_v25  ;;  %6535 = vmatprep.subr.bf16.mxu0 %v8393_v5  ;;  %v4763_v25 = vld [vmem:[#allocation11 + $0x8f0] sm:$0xff]  ;;  %v8236_v5 = vcombine.low %v4739_v29, %v4747_v31 }
0x11b4   :  { %6576 = vmatprep.subr.bf16.mxu1 %v8395_v38  ;;  %v4756_v38 = vld [vmem:[#allocation11 + $0x8b8] sm:$0xff]  ;;  %v8253_v32 = vcombine.high %v4755_v56, %v4763_v25  ;;  %v8252_v33 = vcombine.low %v4755_v56, %v4763_v25 }
0x11b5   :  { %v8254_v7 = vcombine.low %v4756_v38, %v4764_v37 }
0x11b6   :  { %6536 = vmatpush1.bf16.msra.mxu0 %v8392_v42  ;;  %v4779_v42 = vld [vmem:[#allocation11 + $0x970] sm:$0xff] }
0x11b7   :  { %6577 = vmatpush1.bf16.msra.mxu1 %v8394_v43  ;;  %6537 = vmatprep.subr.bf16.mxu0 %v8409_v0  ;;  %v8255_v43 = vcombine.high %v4756_v38, %v4764_v37  ;;  %v4772_v0 = vld [vmem:[#allocation11 + $0x938] sm:$0xff]  ;;  %v8269_v44 = vcombine.high %v4771_v41, %v4779_v42  ;;  %v8268_v49 = vcombine.low %v4771_v41, %v4779_v42  ;;  %v4867_v38 = vld [vmem:[#allocation11 + $0xc30] sm:$0xff] }
0x11b8   :  { %6578 = vmatprep.subr.bf16.mxu1 %v8411_v30  ;;  %v4780_v30 = vld [vmem:[#allocation11 + $0x978] sm:$0xff]  ;;  %v4875_v37 = vld [vmem:[#allocation11 + $0xc70] sm:$0xff] }
0x11b9   :  { %v8271_v45 = vcombine.high %v4772_v0, %v4780_v30  ;;  %v8270_v17 = vcombine.low %v4772_v0, %v4780_v30  ;;  %v4883_v30 = vld [vmem:[#allocation11 + $0xcb0] sm:$0xff] }
0x11ba   :  { %6538 = vmatpush1.bf16.msra.mxu0 %v8408_v46  ;;  %v4787_v46 = vld [vmem:[#allocation11 + $0x9b0] sm:$0xff] }
0x11bb   :  { %6579 = vmatpush1.bf16.msra.mxu1 %v8410_v57  ;;  %6539 = vmatprep.subr.bf16.mxu0 %v8425_v47  ;;  %v4795_v57 = vld [vmem:[#allocation11 + $0x9f0] sm:$0xff]  ;;  %v4788_v47 = vld [vmem:[#allocation11 + $0x9b8] sm:$0xff] }
0x11bc   :  { %6580 = vmatprep.subr.bf16.mxu1 %v8427_v48  ;;  %v4796_v48 = vld [vmem:[#allocation11 + $0x9f8] sm:$0xff]  ;;  %v8285_v50 = vcombine.high %v4787_v46, %v4795_v57 }
0x11bd   :  { %v8287_v51 = vcombine.high %v4788_v47, %v4796_v48  ;;  %v8286_v55 = vcombine.low %v4788_v47, %v4796_v48  ;;  %v4899_v48 = vld [vmem:[#allocation11 + $0xd30] sm:$0xff] }
0x11be   :  { %6540 = vmatpush1.bf16.msra.mxu0 %v8424_v16  ;;  %v4803_v16 = vld [vmem:[#allocation11 + $0xa30] sm:$0xff] }
0x11bf   :  { %6581 = vmatpush1.bf16.msra.mxu1 %v8426_v52  ;;  %6541 = vmatprep.subr.bf16.mxu0 %v8441_v53  ;;  %v4811_v52 = vld [vmem:[#allocation11 + $0xa70] sm:$0xff]  ;;  %v4804_v53 = vld [vmem:[#allocation11 + $0xa38] sm:$0xff] }
0x11c0   :  { %6582 = vmatprep.subr.bf16.mxu1 %v8443_v54  ;;  %v4812_v54 = vld [vmem:[#allocation11 + $0xa78] sm:$0xff]  ;;  %v8301_v36 = vcombine.high %v4803_v16, %v4811_v52 }
0x11c1   :  { %v8303_v2 = vcombine.high %v4804_v53, %v4812_v54  ;;  %v8302_v61 = vcombine.low %v4804_v53, %v4812_v54  ;;  %v4915_v54 = vld [vmem:[#allocation11 + $0xdb0] sm:$0xff] }
0x11c2   :  { %6542 = vmatpush1.bf16.msra.mxu0 %v8440_v10  ;;  %v4827_v10 = vld [vmem:[#allocation11 + $0xaf0] sm:$0xff] }
0x11c3   :  { %6583 = vmatpush1.bf16.msra.mxu1 %v8442_v14  ;;  %6543 = vmatprep.subr.bf16.mxu0 %v8457_v20  ;;  %v4820_v14 = vld [vmem:[#allocation11 + $0xab8] sm:$0xff]  ;;  %v8317_v22 = vcombine.high %v4819_v9, %v4827_v10 }
0x11c4   :  { %6584 = vmatprep.subr.bf16.mxu1 %v8459_v21  ;;  %v4828_v20 = vld [vmem:[#allocation11 + $0xaf8] sm:$0xff]  ;;  %v8300_v21 = vcombine.low %v4803_v16, %v4811_v52 }
0x11c5   :  { %v8319_v3 = vcombine.high %v4820_v14, %v4828_v20  ;;  %v8318_v29 = vcombine.low %v4820_v14, %v4828_v20  ;;  %v4931_v20 = vld [vmem:[#allocation11 + $0xe30] sm:$0xff] }
0x11c6   :  { %6544 = vmatpush1.bf16.msra.mxu0 %v8456_v24  ;;  %v4843_v24 = vld [vmem:[#allocation11 + $0xb70] sm:$0xff] }
0x11c7   :  { %6585 = vmatpush1.bf16.msra.mxu1 %v8458_v62  ;;  %6545 = vmatprep.subr.bf16.mxu0 %v8473_v11  ;;  %v4836_v62 = vld [vmem:[#allocation11 + $0xb38] sm:$0xff]  ;;  %v8333_v31 = vcombine.high %v4835_v27, %v4843_v24 }
0x11c8   :  { %6586 = vmatprep.subr.bf16.mxu1 %v8475_v23  ;;  %v4844_v11 = vld [vmem:[#allocation11 + $0xb78] sm:$0xff]  ;;  %v8316_v23 = vcombine.low %v4819_v9, %v4827_v10 }
0x11c9   :  { %v8335_v39 = vcombine.high %v4836_v62, %v4844_v11  ;;  %v8334_v56 = vcombine.low %v4836_v62, %v4844_v11  ;;  %v4947_v11 = vld [vmem:[#allocation11 + $0xeb0] sm:$0xff] }
0x11ca   :  { %6546 = vmatpush1.bf16.msra.mxu0 %v8472_v28  ;;  %v4859_v28 = vld [vmem:[#allocation11 + $0xbf0] sm:$0xff] }
0x11cb   :  { %6587 = vmatpush1.bf16.msra.mxu1 %v8474_v35  ;;  %6597 = vmatprep.subr.bf16.mxu0 %v8237_v8  ;;  %v4852_v35 = vld [vmem:[#allocation11 + $0xbb8] sm:$0xff]  ;;  %v8349_v25 = vcombine.high %v4851_v34, %v4859_v28  ;;  %v8348_v41 = vcombine.low %v4851_v34, %v4859_v28 }
0x11cc   :  { %6638 = vmatprep.subr.bf16.mxu1 %v8239_v6  ;;  %v4860_v8 = vld [vmem:[#allocation11 + $0xbf8] sm:$0xff]  ;;  %v8332_v6 = vcombine.low %v4835_v27, %v4843_v24 }
0x11cd   :  { %6548 = vmatmul.mubr.bf16.vlgmr.msra.gmra.mrb[44].mxu0 %v9947_v26  ;;  %v8350_v42 = vcombine.low %v4852_v35, %v4860_v8 }
0x11ce   :  { %6589 = vmatmul.mubr.bf16.vlgmr.msra.gmra.mrb[52].mxu1 %v9947_v26  ;;  %6598 = vmatpush1.bf16.msra.mxu0 %v8236_v5  ;;  %v8351_v5 = vcombine.high %v4852_v35, %v4860_v8  ;;  %v4963_v8 = vld [vmem:[#allocation11 + $0xf30] sm:$0xff] }
0x11cf   :  { %6629 = vmatprep.mubr.bf16.mxu0 %v9951_v1  ;;  %6639 = vmatpush1.bf16.msra.mxu1 %v8238_v58  ;;  %v4868_v58 = vld [vmem:[#allocation11 + $0xc38] sm:$0xff] }
0x11d0   :  { %6670 = vmatprep.mubr.bf16.mxu1 %v9951_v1  ;;  %6599 = vmatprep.subr.bf16.mxu0 %v8253_v32  ;;  %v8284_v1 = vcombine.low %v4787_v46, %v4795_v57  ;;  %v4876_v32 = vld [vmem:[#allocation11 + $0xc78] sm:$0xff] }
0x11d1   :  { %6640 = vmatprep.subr.bf16.mxu1 %v8255_v43  ;;  %v8365_v43 = vcombine.high %v4867_v38, %v4875_v37  ;;  %v8367_v0 = vcombine.high %v4868_v58, %v4876_v32  ;;  %v8366_v46 = vcombine.low %v4868_v58, %v4876_v32  ;;  %v4979_v32 = vld [vmem:[#allocation11 + $0xfb0] sm:$0xff] }
0x11d2   :  { %6600 = vmatpush1.bf16.msra.mxu0 %v8252_v33  ;;  %v4891_v33 = vld [vmem:[#allocation11 + $0xcf0] sm:$0xff] }
0x11d3   :  { %6641 = vmatpush1.bf16.msra.mxu1 %v8254_v7  ;;  %6601 = vmatprep.subr.bf16.mxu0 %v8269_v44  ;;  %v4884_v7 = vld [vmem:[#allocation11 + $0xcb8] sm:$0xff]  ;;  %v8381_v57 = vcombine.high %v4883_v30, %v4891_v33 }
0x11d4   :  { %6642 = vmatprep.subr.bf16.mxu1 %v8271_v45  ;;  %v4892_v44 = vld [vmem:[#allocation11 + $0xcf8] sm:$0xff]  ;;  %v8364_v45 = vcombine.low %v4867_v38, %v4875_v37 }
0x11d5   :  { %v8383_v47 = vcombine.high %v4884_v7, %v4892_v44  ;;  %v8382_v16 = vcombine.low %v4884_v7, %v4892_v44 }
0x11d6   :  { %6602 = vmatpush1.bf16.msra.mxu0 %v8268_v49  ;;  %v4907_v49 = vld [vmem:[#allocation11 + $0xd70] sm:$0xff] }
0x11d7   :  { %6643 = vmatpush1.bf16.msra.mxu1 %v8270_v17  ;;  %6603 = vmatprep.subr.bf16.mxu0 %v8285_v50  ;;  %v4900_v17 = vld [vmem:[#allocation11 + $0xd38] sm:$0xff]  ;;  %v8397_v52 = vcombine.high %v4899_v48, %v4907_v49 }
0x11d8   :  { %6644 = vmatprep.subr.bf16.mxu1 %v8287_v51  ;;  %v4908_v50 = vld [vmem:[#allocation11 + $0xd78] sm:$0xff]  ;;  %v8380_v51 = vcombine.low %v4883_v30, %v4891_v33 }
0x11d9   :  { %v8399_v53 = vcombine.high %v4900_v17, %v4908_v50  ;;  %v8398_v9 = vcombine.low %v4900_v17, %v4908_v50  ;;  %v9081_v17 = vld [vmem:[#allocation13 + $0x514] ss:$8 sps:$4 sm:$0xff]   ;;  %v9076_v50 = vld [vmem:[#allocation13 + $0x410] ss:$8 sps:$4 sm:$0xff]  }
0x11da   :  { %6604 = vmatpush1.bf16.msra.mxu0 %v8284_v1  ;;  %v4923_v1 = vld [vmem:[#allocation11 + $0xdf0] sm:$0xff] }
0x11db   :  { %6645 = vmatpush1.bf16.msra.mxu1 %v8286_v55  ;;  %6605 = vmatprep.subr.bf16.mxu0 %v8301_v36  ;;  %v4916_v55 = vld [vmem:[#allocation11 + $0xdb8] sm:$0xff]  ;;  %v8413_v10 = vcombine.high %v4915_v54, %v4923_v1 }
0x11dc   :  { %6646 = vmatprep.subr.bf16.mxu1 %v8303_v2  ;;  %v4924_v36 = vld [vmem:[#allocation11 + $0xdf8] sm:$0xff]  ;;  %v8396_v2 = vcombine.low %v4899_v48, %v4907_v49  ;;  %v9073_v48 = vld [vmem:[#allocation13 + $0x500] ss:$8 sps:$4 sm:$0xff]  }
0x11dd   :  { %v8415_v14 = vcombine.high %v4916_v55, %v4924_v36  ;;  %v8414_v27 = vcombine.low %v4916_v55, %v4924_v36  ;;  %v9078_v49 = vld [vmem:[#allocation13 + $0x414] ss:$8 sps:$4 sm:$0xff]   ;;  %v9088_v36 = vld [vmem:[#allocation13 + $0x430] ss:$8 sps:$4 sm:$0xff]  }
0x11de   :  { %6606 = vmatpush1.bf16.msra.mxu0 %v8300_v21  ;;  %v4939_v21 = vld [vmem:[#allocation11 + $0xe70] sm:$0xff] }
0x11df   :  { %6647 = vmatpush1.bf16.msra.mxu1 %v8302_v61  ;;  %6607 = vmatprep.subr.bf16.mxu0 %v8317_v22  ;;  %v4932_v61 = vld [vmem:[#allocation11 + $0xe38] sm:$0xff]  ;;  %v8429_v24 = vcombine.high %v4931_v20, %v4939_v21 }
0x11e0   :  { %6648 = vmatprep.subr.bf16.mxu1 %v8319_v3  ;;  %v4940_v22 = vld [vmem:[#allocation11 + $0xe78] sm:$0xff]  ;;  %v8412_v3 = vcombine.low %v4915_v54, %v4923_v1  ;;  %v9085_v54 = vld [vmem:[#allocation13 + $0x520] ss:$8 sps:$4 sm:$0xff]  }
0x11e1   :  { %v8431_v62 = vcombine.high %v4932_v61, %v4940_v22  ;;  %v8430_v34 = vcombine.low %v4932_v61, %v4940_v22  ;;  %v9090_v1 = vld [vmem:[#allocation13 + $0x434] ss:$8 sps:$4 sm:$0xff]   ;;  %v9100_v61 = vld [vmem:[#allocation13 + $0x450] ss:$8 sps:$4 sm:$0xff]  }
0x11e2   :  { %6608 = vmatpush1.bf16.msra.mxu0 %v8316_v23  ;;  %v4955_v23 = vld [vmem:[#allocation11 + $0xef0] sm:$0xff] }
0x11e3   :  { %6649 = vmatpush1.bf16.msra.mxu1 %v8318_v29  ;;  %6609 = vmatprep.subr.bf16.mxu0 %v8333_v31  ;;  %v4948_v29 = vld [vmem:[#allocation11 + $0xeb8] sm:$0xff]  ;;  %v8445_v28 = vcombine.high %v4947_v11, %v4955_v23 }
0x11e4   :  { %6650 = vmatprep.subr.bf16.mxu1 %v8335_v39  ;;  %v4956_v31 = vld [vmem:[#allocation11 + $0xef8] sm:$0xff]  ;;  %v8428_v39 = vcombine.low %v4931_v20, %v4939_v21 }
0x11e5   :  { %v8447_v35 = vcombine.high %v4948_v29, %v4956_v31  ;;  %v8446_v38 = vcombine.low %v4948_v29, %v4956_v31  ;;  %v9093_v55 = vld [vmem:[#allocation13 + $0x534] ss:$8 sps:$4 sm:$0xff]   ;;  %v9103_v22 = vld [vmem:[#allocation13 + $0x550] ss:$8 sps:$4 sm:$0xff]  }
0x11e6   :  { %6610 = vmatpush1.bf16.msra.mxu0 %v8332_v6  ;;  %v4971_v6 = vld [vmem:[#allocation11 + $0xf70] sm:$0xff] }
0x11e7   :  { %6651 = vmatpush1.bf16.msra.mxu1 %v8334_v56  ;;  %6611 = vmatprep.subr.bf16.mxu0 %v8349_v25  ;;  %v4964_v56 = vld [vmem:[#allocation11 + $0xf38] sm:$0xff]  ;;  %v8461_v37 = vcombine.high %v4963_v8, %v4971_v6 }
0x11e8   :  { %6652 = vmatprep.subr.bf16.mxu1 %v8351_v5  ;;  %v4972_v25 = vld [vmem:[#allocation11 + $0xf78] sm:$0xff]  ;;  %v8444_v5 = vcombine.low %v4947_v11, %v4955_v23 }
0x11e9   :  { %v8463_v58 = vcombine.high %v4964_v56, %v4972_v25  ;;  %v8462_v30 = vcombine.low %v4964_v56, %v4972_v25  ;;  %v9102_v20 = vld [vmem:[#allocation13 + $0x454] ss:$8 sps:$4 sm:$0xff]   ;;  %v9112_v56 = vld [vmem:[#allocation13 + $0x470] ss:$8 sps:$4 sm:$0xff]  }
0x11ea   :  { %6612 = vmatpush1.bf16.msra.mxu0 %v8348_v41  ;;  %v4987_v41 = vld [vmem:[#allocation11 + $0xff0] sm:$0xff] }
0x11eb   :  { %6653 = vmatpush1.bf16.msra.mxu1 %v8350_v42  ;;  %6613 = vmatprep.subr.bf16.mxu0 %v8365_v43  ;;  %v4980_v42 = vld [vmem:[#allocation11 + $0xfb8] sm:$0xff]  ;;  %v8477_v33 = vcombine.high %v4979_v32, %v4987_v41  ;;  %v8476_v44 = vcombine.low %v4979_v32, %v4987_v41 }
0x11ec   :  { %6654 = vmatprep.subr.bf16.mxu1 %v8367_v0  ;;  %v4988_v43 = vld [vmem:[#allocation11 + $0xff8] sm:$0xff]  ;;  %v8460_v0 = vcombine.low %v4963_v8, %v4971_v6 }
0x11ed   :  { %v8479_v7 = vcombine.high %v4980_v42, %v4988_v43  ;;  %v9105_v21 = vld [vmem:[#allocation13 + $0x554] ss:$8 sps:$4 sm:$0xff]   ;;  %v9115_v25 = vld [vmem:[#allocation13 + $0x570] ss:$8 sps:$4 sm:$0xff]  }
0x11ee   :  { %6614 = vmatpush1.bf16.msra.mxu0 %v8364_v45  ;;  %v8478_v45 = vcombine.low %v4980_v42, %v4988_v43  ;;  %v9114_v8 = vld [vmem:[#allocation13 + $0x474] ss:$8 sps:$4 sm:$0xff]   ;;  %v9124_v42 = vld [vmem:[#allocation13 + $0x490] ss:$8 sps:$4 sm:$0xff]  }
0x11ef   :  { %6655 = vmatpush1.bf16.msra.mxu1 %v8366_v46  ;;  %6615 = vmatprep.subr.bf16.mxu0 %v8381_v57  ;;  %v9072_v46 = vld [vmem:[#allocation13 + $0x404] ss:$8 sps:$4 sm:$0xff]   ;;  %v9117_v6 = vld [vmem:[#allocation13 + $0x574] ss:$8 sps:$4 sm:$0xff]   ;;  %v9127_v43 = vld [vmem:[#allocation13 + $0x590] ss:$8 sps:$4 sm:$0xff]  }
0x11f0   :  { %6656 = vmatprep.subr.bf16.mxu1 %v8383_v47  ;;  %v9075_v57 = vld [vmem:[#allocation13 + $0x504] ss:$8 sps:$4 sm:$0xff]   ;;  %v9070_v47 = vld [vmem:[#allocation13 + $0x400] ss:$8 sps:$4 sm:$0xff]   ;;  %v9126_v32 = vld [vmem:[#allocation13 + $0x494] ss:$8 sps:$4 sm:$0xff]  }
0x11f1   :  { %v9129_v41 = vld [vmem:[#allocation13 + $0x594] ss:$8 sps:$4 sm:$0xff]  }
0x11f2   :  { %6616 = vmatpush1.bf16.msra.mxu0 %v8380_v51  ;;  %v9079_v51 = vld [vmem:[#allocation13 + $0x510] ss:$8 sps:$4 sm:$0xff]  }
0x11f3   :  { %6657 = vmatpush1.bf16.msra.mxu1 %v8382_v16  ;;  %6617 = vmatprep.subr.bf16.mxu0 %v8397_v52  ;;  %v9084_v16 = vld [vmem:[#allocation13 + $0x424] ss:$8 sps:$4 sm:$0xff]  }
0x11f4   :  { %6658 = vmatprep.subr.bf16.mxu1 %v8399_v53  ;;  %v9087_v52 = vld [vmem:[#allocation13 + $0x524] ss:$8 sps:$4 sm:$0xff]   ;;  %v9082_v53 = vld [vmem:[#allocation13 + $0x420] ss:$8 sps:$4 sm:$0xff]  }
0x11f6   :  { %6618 = vmatpush1.bf16.msra.mxu0 %v8396_v2  ;;  %v9096_v2 = vld [vmem:[#allocation13 + $0x444] ss:$8 sps:$4 sm:$0xff]  }
0x11f7   :  { %6659 = vmatpush1.bf16.msra.mxu1 %v8398_v9  ;;  %6619 = vmatprep.subr.bf16.mxu0 %v8413_v10  ;;  %v9099_v9 = vld [vmem:[#allocation13 + $0x544] ss:$8 sps:$4 sm:$0xff]   ;;  %v9094_v10 = vld [vmem:[#allocation13 + $0x440] ss:$8 sps:$4 sm:$0xff]  }
0x11f8   :  { %6660 = vmatprep.subr.bf16.mxu1 %v8415_v14  ;;  %v9097_v14 = vld [vmem:[#allocation13 + $0x540] ss:$8 sps:$4 sm:$0xff]  }
0x11fa   :  { %6620 = vmatpush1.bf16.msra.mxu0 %v8412_v3  ;;  %v9108_v3 = vld [vmem:[#allocation13 + $0x464] ss:$8 sps:$4 sm:$0xff]  }
0x11fb   :  { %6661 = vmatpush1.bf16.msra.mxu1 %v8414_v27  ;;  %6621 = vmatprep.subr.bf16.mxu0 %v8429_v24 }
0x11fc   :  { %6662 = vmatprep.subr.bf16.mxu1 %v8431_v62  ;;  %v9111_v62 = vld [vmem:[#allocation13 + $0x564] ss:$8 sps:$4 sm:$0xff]  }
0x11fe   :  { %6622 = vmatpush1.bf16.msra.mxu0 %v8428_v39  ;;  %v9106_v39 = vld [vmem:[#allocation13 + $0x460] ss:$8 sps:$4 sm:$0xff]  }
0x11ff   :  { %6663 = vmatpush1.bf16.msra.mxu1 %v8430_v34  ;;  %6623 = vmatprep.subr.bf16.mxu0 %v8445_v28 }
0x1200   :  { %6664 = vmatprep.subr.bf16.mxu1 %v8447_v35  ;;  %v9109_v35 = vld [vmem:[#allocation13 + $0x560] ss:$8 sps:$4 sm:$0xff]  }
0x1202   :  { %6624 = vmatpush1.bf16.msra.mxu0 %v8444_v5  ;;  %v9120_v5 = vld [vmem:[#allocation13 + $0x484] ss:$8 sps:$4 sm:$0xff]  }
0x1203   :  { %6665 = vmatpush1.bf16.msra.mxu1 %v8446_v38  ;;  %6625 = vmatprep.subr.bf16.mxu0 %v8461_v37  ;;  %v9123_v38 = vld [vmem:[#allocation13 + $0x584] ss:$8 sps:$4 sm:$0xff]   ;;  %v9118_v37 = vld [vmem:[#allocation13 + $0x480] ss:$8 sps:$4 sm:$0xff]  }
0x1204   :  { %6666 = vmatprep.subr.bf16.mxu1 %v8463_v58  ;;  %v9121_v58 = vld [vmem:[#allocation13 + $0x580] ss:$8 sps:$4 sm:$0xff]  }
0x1206   :  { %6626 = vmatpush1.bf16.msra.mxu0 %v8460_v0  ;;  %v9132_v0 = vld [vmem:[#allocation13 + $0x4a4] ss:$8 sps:$4 sm:$0xff]  }
0x1207   :  { %6667 = vmatpush1.bf16.msra.mxu1 %v8462_v30  ;;  %6627 = vmatprep.subr.bf16.mxu0 %v8477_v33  ;;  %v9135_v30 = vld [vmem:[#allocation13 + $0x5a4] ss:$8 sps:$4 sm:$0xff]   ;;  %v9130_v33 = vld [vmem:[#allocation13 + $0x4a0] ss:$8 sps:$4 sm:$0xff]  }
0x1208   :  { %6668 = vmatprep.subr.bf16.mxu1 %v8479_v7  ;;  %v9133_v7 = vld [vmem:[#allocation13 + $0x5a0] ss:$8 sps:$4 sm:$0xff]  }
0x120a   :  { %6628 = vmatpush1.bf16.msra.mxu0 %v8476_v44  ;;  %v9138_v44 = vld [vmem:[#allocation13 + $0x4b4] ss:$8 sps:$4 sm:$0xff]  }
0x120b   :  { %6669 = vmatpush1.bf16.msra.mxu1 %v8478_v45  ;;  %7512 = vmatprep.subr.bf16.mxu0 %v9072_v46  ;;  %v9141_v45 = vld [vmem:[#allocation13 + $0x5b4] ss:$8 sps:$4 sm:$0xff]   ;;  %v9136_v46 = vld [vmem:[#allocation13 + $0x4b0] ss:$8 sps:$4 sm:$0xff]  }
0x120c   :  { %7553 = vmatprep.subr.bf16.mxu1 %v9075_v57  ;;  %v9139_v57 = vld [vmem:[#allocation13 + $0x5b0] ss:$8 sps:$4 sm:$0xff]  }
0x120d   :  { %6630 = vmatmul.mubr.bf16.vlgmr.msra.gmra.mrb[48].mxu0 %v9947_v26 }
0x120e   :  { %6671 = vmatmul.mubr.bf16.vlgmr.msra.gmra.mrb[56].mxu1 %v9947_v26  ;;  %7513 = vmatpush1.bf16.msra.mxu0 %v9070_v47  ;;  %v9091_v26 = vld [vmem:[#allocation13 + $0x530] ss:$8 sps:$4 sm:$0xff]   ;;  %v9144_v47 = vld [vmem:[#allocation13 + $0x4c4] ss:$8 sps:$4 sm:$0xff]  }
0x120f   :  { %7554 = vmatpush1.bf16.msra.mxu1 %v9073_v48  ;;  %7514 = vmatprep.subr.bf16.mxu0 %v9078_v49  ;;  %v9147_v48 = vld [vmem:[#allocation13 + $0x5c4] ss:$8 sps:$4 sm:$0xff]   ;;  %v9142_v49 = vld [vmem:[#allocation13 + $0x4c0] ss:$8 sps:$4 sm:$0xff]  }
0x1210   :  { %7555 = vmatprep.subr.bf16.mxu1 %v9081_v17  ;;  %v9145_v17 = vld [vmem:[#allocation13 + $0x5c0] ss:$8 sps:$4 sm:$0xff]  }
0x1212   :  { %7515 = vmatpush1.bf16.msra.mxu0 %v9076_v50  ;;  %v9150_v50 = vld [vmem:[#allocation13 + $0x4d4] ss:$8 sps:$4 sm:$0xff]  }
0x1213   :  { %7556 = vmatpush1.bf16.msra.mxu1 %v9079_v51  ;;  %7516 = vmatprep.subr.bf16.mxu0 %v9084_v16  ;;  %v9153_v51 = vld [vmem:[#allocation13 + $0x5d4] ss:$8 sps:$4 sm:$0xff]   ;;  %v9148_v16 = vld [vmem:[#allocation13 + $0x4d0] ss:$8 sps:$4 sm:$0xff]  }
0x1214   :  { %7557 = vmatprep.subr.bf16.mxu1 %v9087_v52  ;;  %v9151_v52 = vld [vmem:[#allocation13 + $0x5d0] ss:$8 sps:$4 sm:$0xff]  }
0x1216   :  { %7517 = vmatpush1.bf16.msra.mxu0 %v9082_v53  ;;  %v9156_v53 = vld [vmem:[#allocation13 + $0x4e4] ss:$8 sps:$4 sm:$0xff]  }
0x1217   :  { %7558 = vmatpush1.bf16.msra.mxu1 %v9085_v54  ;;  %7518 = vmatprep.subr.bf16.mxu0 %v9090_v1  ;;  %v9159_v54 = vld [vmem:[#allocation13 + $0x5e4] ss:$8 sps:$4 sm:$0xff]   ;;  %v9154_v1 = vld [vmem:[#allocation13 + $0x4e0] ss:$8 sps:$4 sm:$0xff]  }
0x1218   :  { %7559 = vmatprep.subr.bf16.mxu1 %v9093_v55  ;;  %v9157_v55 = vld [vmem:[#allocation13 + $0x5e0] ss:$8 sps:$4 sm:$0xff]  }
0x121a   :  { %7519 = vmatpush1.bf16.msra.mxu0 %v9088_v36  ;;  %v9162_v36 = vld [vmem:[#allocation13 + $0x4f4] ss:$8 sps:$4 sm:$0xff]  }
0x121b   :  { %7560 = vmatpush1.bf16.msra.mxu1 %v9091_v26  ;;  %7520 = vmatprep.subr.bf16.mxu0 %v9096_v2  ;;  %v9165_v26 = vld [vmem:[#allocation13 + $0x5f4] ss:$8 sps:$4 sm:$0xff]   ;;  %v9160_v2 = vld [vmem:[#allocation13 + $0x4f0] ss:$8 sps:$4 sm:$0xff]  }
0x121c   :  { %7561 = vmatprep.subr.bf16.mxu1 %v9099_v9  ;;  %v9163_v9 = vld [vmem:[#allocation13 + $0x5f0] ss:$8 sps:$4 sm:$0xff]  }
0x121e   :  { %7521 = vmatpush1.bf16.msra.mxu0 %v9094_v10  ;;  %v9168_v10 = vld [vmem:[#allocation13 + $0x604] ss:$8 sps:$4 sm:$0xff]  }
0x121f   :  { %7562 = vmatpush1.bf16.msra.mxu1 %v9097_v14  ;;  %7522 = vmatprep.subr.bf16.mxu0 %v9102_v20  ;;  %v9171_v14 = vld [vmem:[#allocation13 + $0x704] ss:$8 sps:$4 sm:$0xff]  }
0x1220   :  { %v9969_v27 = vpop.f32.mrb[36].mxu0  ;;  %v9971_v24 = vpop.f32.mrb[44].mxu1  ;;  %7563 = vmatprep.subr.bf16.mxu1 %v9105_v21 }
0x1221   :  { %v9973_v11 = vpop.f32.mrb[37].mxu0  ;;  %v9975_v23 = vpop.f32.mrb[45].mxu1 }
0x1222   :  { %v6389_v29 = vpop.f32.mrb[38].mxu0  ;;  %v6430_v31 = vpop.f32.mrb[46].mxu1  ;;  %7523 = vmatpush1.bf16.msra.mxu0 %v9100_v61 }
0x1223   :  { %v6390_v34 = vpop.f32.mrb[39].mxu0  ;;  %v6431_v28 = vpop.f32.mrb[47].mxu1  ;;  %7564 = vmatpush1.bf16.msra.mxu1 %v9103_v22  ;;  %7524 = vmatprep.subr.bf16.mxu0 %v9108_v3 }
0x1224   :  { %7565 = vmatprep.subr.bf16.mxu1 %v9111_v62 }
0x1226   :  { %7525 = vmatpush1.bf16.msra.mxu0 %v9106_v39  ;;  %v9985_v39 = vld [vmem:[#allocation7 + $0x18] sm:$0xff] }
0x1227   :  { %7566 = vmatpush1.bf16.msra.mxu1 %v9109_v35  ;;  %7526 = vmatprep.subr.bf16.mxu0 %v9114_v8  ;;  %v5026_v34 = vrot.slane %v9985_v39, %v9671_v15  ;;  %v5034_v28 = vrot.slane %v9985_v39, %v9715_v19  ;;  %v5030_v35 = vrot.slane %v9985_v39, %v9678_v18 }
0x1228   :  { %7567 = vmatprep.subr.bf16.mxu1 %v9117_v6  ;;  %v5038_v8 = vrot.slane %v9985_v39, %v9744_v12 }
0x122a   :  { %7527 = vmatpush1.bf16.msra.mxu0 %v9112_v56 }
0x122b   :  { %7568 = vmatpush1.bf16.msra.mxu1 %v9115_v25  ;;  %7528 = vmatprep.subr.bf16.mxu0 %v9120_v5 }
0x122c   :  { %7569 = vmatprep.subr.bf16.mxu1 %v9123_v38 }
0x122e   :  { %7529 = vmatpush1.bf16.msra.mxu0 %v9118_v37 }
0x122f   :  { %7570 = vmatpush1.bf16.msra.mxu1 %v9121_v58  ;;  %7530 = vmatprep.subr.bf16.mxu0 %v9126_v32 }
0x1230   :  { %7571 = vmatprep.subr.bf16.mxu1 %v9129_v41 }
0x1232   :  { %7531 = vmatpush1.bf16.msra.mxu0 %v9124_v42 }
0x1233   :  { %7572 = vmatpush1.bf16.msra.mxu1 %v9127_v43  ;;  %7532 = vmatprep.subr.bf16.mxu0 %v9132_v0 }
0x1234   :  { %7573 = vmatprep.subr.bf16.mxu1 %v9135_v30 }
0x1236   :  { %7533 = vmatpush1.bf16.msra.mxu0 %v9130_v33 }
0x1237   :  { %7574 = vmatpush1.bf16.msra.mxu1 %v9133_v7  ;;  %7534 = vmatprep.subr.bf16.mxu0 %v9138_v44 }
0x1238   :  { %7575 = vmatprep.subr.bf16.mxu1 %v9141_v45  ;;  %v9995_v45 = vld [vmem:[#allocation7 + $0x10] sm:$0xff] }
0x123a   :  { %7535 = vmatpush1.bf16.msra.mxu0 %v9136_v46  ;;  %v4994_v46 = vrot.slane %v9995_v45, %v9671_v15 }
0x123b   :  { %7576 = vmatpush1.bf16.msra.mxu1 %v9139_v57  ;;  %7536 = vmatprep.subr.bf16.mxu0 %v9144_v47  ;;  %v5002_v47 = vrot.slane %v9995_v45, %v9715_v19 }
0x123c   :  { %7577 = vmatprep.subr.bf16.mxu1 %v9147_v48 }
0x123d   :  { %v6427_v19 = vadd.f32 %v9971_v24, %v5002_v47  ;;  %v9204_v47 = vld [vmem:[#allocation13 + $0x664] ss:$8 sps:$4 sm:$0xff]  }
0x123e   :  { %7537 = vmatpush1.bf16.msra.mxu0 %v9142_v49  ;;  %v4998_v49 = vrot.slane %v9995_v45, %v9678_v18 }
0x123f   :  { %7578 = vmatpush1.bf16.msra.mxu1 %v9145_v17  ;;  %7538 = vmatprep.subr.bf16.mxu0 %v9150_v50 }
0x1240   :  { %7579 = vmatprep.subr.bf16.mxu1 %v9153_v51  ;;  %v6388_v18 = vadd.f32 %v9973_v11, %v4998_v49  ;;  %v9172_v11 = vld [vmem:[#allocation13 + $0x610] ss:$8 sps:$4 sm:$0xff]   ;;  %v9202_v49 = vld [vmem:[#allocation13 + $0x660] ss:$8 sps:$4 sm:$0xff]  }
0x1242   :  { %7539 = vmatpush1.bf16.msra.mxu0 %v9148_v16  ;;  %v5006_v16 = vrot.slane %v9995_v45, %v9744_v12 }
0x1243   :  { %7580 = vmatpush1.bf16.msra.mxu1 %v9151_v52  ;;  %7540 = vmatprep.subr.bf16.mxu0 %v9156_v53 }
0x1244   :  { %7581 = vmatprep.subr.bf16.mxu1 %v9159_v54 }
0x1246   :  { %7541 = vmatpush1.bf16.msra.mxu0 %v9154_v1  ;;  %v6386_v1 = vadd.f32 %v9969_v27, %v4994_v46  ;;  %v9166_v27 = vld [vmem:[#allocation13 + $0x600] ss:$8 sps:$4 sm:$0xff]   ;;  %v9196_v46 = vld [vmem:[#allocation13 + $0x650] ss:$8 sps:$4 sm:$0xff]  }
0x1247   :  { %7582 = vmatpush1.bf16.msra.mxu1 %v9157_v55  ;;  %7542 = vmatprep.subr.bf16.mxu0 %v9162_v36 }
0x1248   :  { %7583 = vmatprep.subr.bf16.mxu1 %v9165_v26 }
0x124a   :  { %7543 = vmatpush1.bf16.msra.mxu0 %v9160_v2 }
0x124b   :  { %7584 = vmatpush1.bf16.msra.mxu1 %v9163_v9  ;;  %7594 = vmatprep.subr.bf16.mxu0 %v9168_v10 }
0x124c   :  { %7635 = vmatprep.subr.bf16.mxu1 %v9171_v14 }
0x1260   :  { %v9977_v20 = vpop.f32.mrb[40].mxu0  ;;  %v9979_v21 = vpop.f32.mrb[48].mxu1 }
0x1261   :  { %v9981_v61 = vpop.f32.mrb[41].mxu0  ;;  %v9983_v22 = vpop.f32.mrb[49].mxu1 }
0x1262   :  { %v6471_v3 = vpop.f32.mrb[42].mxu0  ;;  %v6512_v62 = vpop.f32.mrb[50].mxu1 }
0x1263   :  { %v6472_v29 = vpop.f32.mrb[43].mxu0  ;;  %v6513_v31 = vpop.f32.mrb[51].mxu1  ;;  %v6429_v3 = vadd.f32 %v9975_v23, %v5006_v16  ;;  %v9175_v23 = vld [vmem:[#allocation13 + $0x710] ss:$8 sps:$4 sm:$0xff]  }
0x1264   :  { %v9208_v16 = vld [vmem:[#allocation13 + $0x670] ss:$8 sps:$4 sm:$0xff]  }
0x12a0   :  { %v6549_v6 = vpop.f32.mrb[44].mxu0 }
0x12a1   :  { %v6550_v56 = vadd.f32 %v6549_v6, %v5026_v34  ;;  %v6590_v25 = vpop.f32.mrb[52].mxu1  ;;  %v6551_v5 = vpop.f32.mrb[45].mxu0  ;;  %v9174_v6 = vld [vmem:[#allocation13 + $0x614] ss:$8 sps:$4 sm:$0xff]  }
0x12a2   :  { %v6591_v38 = vadd.f32 %v6590_v25, %v5034_v28  ;;  %v6552_v37 = vadd.f32 %v6551_v5, %v5030_v35  ;;  %v6592_v58 = vpop.f32.mrb[53].mxu1  ;;  %v6553_v32 = vpop.f32.mrb[46].mxu0  ;;  %v9180_v25 = vld [vmem:[#allocation13 + $0x624] ss:$8 sps:$4 sm:$0xff]  }
0x12a3   :  { %v6687_v41 = vmul.f32 0.70710677, %v6550_v56  ;;  %v6593_v42 = vadd.f32 %v6592_v58, %v5038_v8  ;;  %v6594_v43 = vpop.f32.mrb[54].mxu1  ;;  %v6554_v0 = vpop.f32.mrb[47].mxu0  ;;  %v6679_v17 = vmul.f32 0.5, %v6550_v56 }
0x12a4   :  { %v6689_v30 = vmul.f32 0.70710677, %v6591_v38  ;;  %v6688_v33 = vmul.f32 0.70710677, %v6552_v37  ;;  %v6595_v44 = vpop.f32.mrb[55].mxu1  ;;  %v6681_v52 = vmul.f32 0.5, %v6591_v38 }
0x12a5   :  { %9294 = verf.f32 %v6687_v41  ;;  %v6690_v7 = vmul.f32 0.70710677, %v6593_v42  ;;  %v6680_v55 = vmul.f32 0.5, %v6552_v37  ;;  %v6682_v2 = vmul.f32 0.5, %v6593_v42  ;;  %v9169_v8 = vld [vmem:[#allocation13 + $0x700] ss:$8 sps:$4 sm:$0xff]  }
0x12a6   :  { %9296 = verf.f32 %v6689_v30  ;;  %v9177_v56 = vld [vmem:[#allocation13 + $0x714] ss:$8 sps:$4 sm:$0xff]   ;;  %v9183_v5 = vld [vmem:[#allocation13 + $0x724] ss:$8 sps:$4 sm:$0xff]   ;;  %v9178_v38 = vld [vmem:[#allocation13 + $0x620] ss:$8 sps:$4 sm:$0xff]  }
0x12a7   :  { %9298 = verf.f32 %v6688_v33  ;;  %v9181_v37 = vld [vmem:[#allocation13 + $0x720] ss:$8 sps:$4 sm:$0xff]   ;;  %v9186_v58 = vld [vmem:[#allocation13 + $0x634] ss:$8 sps:$4 sm:$0xff]   ;;  %v9184_v41 = vld [vmem:[#allocation13 + $0x630] ss:$8 sps:$4 sm:$0xff]  }
0x12a8   :  { %9300 = verf.f32 %v6690_v7  ;;  %v9189_v32 = vld [vmem:[#allocation13 + $0x734] ss:$8 sps:$4 sm:$0xff]   ;;  %v9187_v42 = vld [vmem:[#allocation13 + $0x730] ss:$8 sps:$4 sm:$0xff]   ;;  %v9192_v43 = vld [vmem:[#allocation13 + $0x644] ss:$8 sps:$4 sm:$0xff]  }
0x12a9   :  { %v9195_v0 = vld [vmem:[#allocation13 + $0x744] ss:$8 sps:$4 sm:$0xff]   ;;  %v9190_v30 = vld [vmem:[#allocation13 + $0x640] ss:$8 sps:$4 sm:$0xff]   ;;  %v9198_v7 = vld [vmem:[#allocation13 + $0x654] ss:$8 sps:$4 sm:$0xff]  }
0x12aa   :  { %v9193_v33 = vld [vmem:[#allocation13 + $0x740] ss:$8 sps:$4 sm:$0xff]   ;;  %v9201_v44 = vld [vmem:[#allocation13 + $0x754] ss:$8 sps:$4 sm:$0xff]  }
0x12af   :  { %v9295_v57 = vpop.eup %9294 }
0x12b0   :  { %v9297_v48 = vpop.eup %9296  ;;  %v6703_v50 = vadd.f32 1.0, %v9295_v57  ;;  %v9199_v57 = vld [vmem:[#allocation13 + $0x750] ss:$8 sps:$4 sm:$0xff]  }
0x12b1   :  { %v9299_v51 = vpop.eup %9298  ;;  %v6705_v53 = vadd.f32 1.0, %v9297_v48  ;;  %v9207_v48 = vld [vmem:[#allocation13 + $0x764] ss:$8 sps:$4 sm:$0xff]  }
0x12b2   :  { %v9301_v54 = vpop.eup %9300  ;;  %v6711_v15 = vmul.f32 %v6703_v50, %v6679_v17  ;;  %v6704_v36 = vadd.f32 1.0, %v9299_v51  ;;  %v9205_v17 = vld [vmem:[#allocation13 + $0x760] ss:$8 sps:$4 sm:$0xff]   ;;  %v9210_v50 = vld [vmem:[#allocation13 + $0x674] ss:$8 sps:$4 sm:$0xff]  }
0x12b3   :  { %v6713_v26 = vmul.f32 %v6705_v53, %v6681_v52  ;;  %v6706_v9 = vadd.f32 1.0, %v9301_v54  ;;  %v9213_v51 = vld [vmem:[#allocation13 + $0x774] ss:$8 sps:$4 sm:$0xff]   ;;  %v9211_v52 = vld [vmem:[#allocation13 + $0x770] ss:$8 sps:$4 sm:$0xff]  }
0x12b4   :  { %v6719_v10 = vmul.f32 %v6711_v15, %v6386_v1  ;;  %v6712_v14 = vmul.f32 %v6704_v36, %v6680_v55  ;;  %v9216_v53 = vld [vmem:[#allocation13 + $0x684] ss:$8 sps:$4 sm:$0xff]   ;;  %v9214_v1 = vld [vmem:[#allocation13 + $0x680] ss:$8 sps:$4 sm:$0xff]   ;;  %v9222_v55 = vld [vmem:[#allocation13 + $0x694] ss:$8 sps:$4 sm:$0xff]  }
0x12b5   :  { %v6721_v12 = vmul.f32 %v6713_v26, %v6427_v19  ;;  %v6714_v62 = vmul.f32 %v6706_v9, %v6682_v2  ;;  %v9219_v54 = vld [vmem:[#allocation13 + $0x784] ss:$8 sps:$4 sm:$0xff]   ;;  %v9217_v15 = vld [vmem:[#allocation13 + $0x780] ss:$8 sps:$4 sm:$0xff]   ;;  %v9225_v36 = vld [vmem:[#allocation13 + $0x794] ss:$8 sps:$4 sm:$0xff]   ;;  %v5042_v2 = vrot.slane %v9985_v39, %v9747_v13 }
0x12b6   :  { %v6720_v29 = vmul.f32 %v6712_v14, %v6388_v18  ;;  %v6727_v28 = vpack.c.bf16 %v6719_v10, %v6719_v10  ;;  %v9220_v19 = vld [vmem:[#allocation13 + $0x690] ss:$8 sps:$4 sm:$0xff]   ;;  %v9228_v9 = vld [vmem:[#allocation13 + $0x6a4] ss:$8 sps:$4 sm:$0xff]   ;;  %v5050_v18 = vrot.slane %v9985_v39, %v9828_v60  ;;  %v5046_v10 = vrot.slane %v9985_v39, %v9831_v63 }
0x12b7   :  { %v6722_v31 = vmul.f32 %v6714_v62, %v6429_v3  ;;  %v6729_v24 = vpack.c.bf16 %v6721_v12, %v6721_v12  ;;  %v9223_v26 = vld [vmem:[#allocation13 + $0x790] ss:$8 sps:$4 sm:$0xff]   ;;  %v9231_v14 = vld [vmem:[#allocation13 + $0x7a4] ss:$8 sps:$4 sm:$0xff]   ;;  %v5054_v3 = vrot.slane %v9985_v39, %v9834_v4  ;;  %v9226_v62 = vld [vmem:[#allocation13 + $0x6a0] ss:$8 sps:$4 sm:$0xff]  }
0x12b8   :  { %v6728_v34 = vpack.c.bf16 %v6720_v29, %v6720_v29 }
0x12b9   :  { %v6730_v35 = vpack.c.bf16 %v6722_v31, %v6722_v31 }
0x12ba   :  { %7544 = vmatprep.mubr.bf16.mxu0 %v6728_v34 }
0x12bb   :  { %7585 = vmatprep.mubr.bf16.mxu1 %v6730_v35  ;;  %7545 = vmatmul.mubr.bf16.vlgmr.msra.gmra.mrb[52].mxu0 %v6727_v28  ;;  %v9234_v28 = vld [vmem:[#allocation13 + $0x6b4] ss:$8 sps:$4 sm:$0xff]  }
0x12bc   :  { %7586 = vmatmul.mubr.bf16.vlgmr.msra.gmra.mrb[60].mxu1 %v6729_v24  ;;  %7595 = vmatpush1.bf16.msra.mxu0 %v9166_v27  ;;  %v9229_v27 = vld [vmem:[#allocation13 + $0x7a0] ss:$8 sps:$4 sm:$0xff]  }
0x12bd   :  { %7636 = vmatpush1.bf16.msra.mxu1 %v9169_v8  ;;  %7596 = vmatprep.subr.bf16.mxu0 %v9174_v6 }
0x12be   :  { %7637 = vmatprep.subr.bf16.mxu1 %v9177_v56  ;;  %v9237_v56 = vld [vmem:[#allocation13 + $0x7b4] ss:$8 sps:$4 sm:$0xff]  }
0x12c0   :  { %7597 = vmatpush1.bf16.msra.mxu0 %v9172_v11 }
0x12c1   :  { %7638 = vmatpush1.bf16.msra.mxu1 %v9175_v23  ;;  %7598 = vmatprep.subr.bf16.mxu0 %v9180_v25 }
0x12c2   :  { %7639 = vmatprep.subr.bf16.mxu1 %v9183_v5  ;;  %v9232_v5 = vld [vmem:[#allocation13 + $0x6b0] ss:$8 sps:$4 sm:$0xff]  }
0x12c4   :  { %7599 = vmatpush1.bf16.msra.mxu0 %v9178_v38 }
0x12c5   :  { %7640 = vmatpush1.bf16.msra.mxu1 %v9181_v37  ;;  %7600 = vmatprep.subr.bf16.mxu0 %v9186_v58  ;;  %v9235_v58 = vld [vmem:[#allocation13 + $0x7b0] ss:$8 sps:$4 sm:$0xff]  }
0x12c6   :  { %7641 = vmatprep.subr.bf16.mxu1 %v9189_v32 }
0x12c8   :  { %7601 = vmatpush1.bf16.msra.mxu0 %v9184_v41 }
0x12c9   :  { %7642 = vmatpush1.bf16.msra.mxu1 %v9187_v42  ;;  %7602 = vmatprep.subr.bf16.mxu0 %v9192_v43  ;;  %v9240_v42 = vld [vmem:[#allocation13 + $0x6c4] ss:$8 sps:$4 sm:$0xff]  }
0x12ca   :  { %7643 = vmatprep.subr.bf16.mxu1 %v9195_v0  ;;  %v9243_v43 = vld [vmem:[#allocation13 + $0x7c4] ss:$8 sps:$4 sm:$0xff]   ;;  %v9238_v0 = vld [vmem:[#allocation13 + $0x6c0] ss:$8 sps:$4 sm:$0xff]  }
0x12cc   :  { %7603 = vmatpush1.bf16.msra.mxu0 %v9190_v30  ;;  %v9241_v30 = vld [vmem:[#allocation13 + $0x7c0] ss:$8 sps:$4 sm:$0xff]  }
0x12cd   :  { %7644 = vmatpush1.bf16.msra.mxu1 %v9193_v33  ;;  %7604 = vmatprep.subr.bf16.mxu0 %v9198_v7  ;;  %v9246_v33 = vld [vmem:[#allocation13 + $0x6d4] ss:$8 sps:$4 sm:$0xff]  }
0x12ce   :  { %7645 = vmatprep.subr.bf16.mxu1 %v9201_v44  ;;  %v9249_v7 = vld [vmem:[#allocation13 + $0x7d4] ss:$8 sps:$4 sm:$0xff]   ;;  %v9244_v44 = vld [vmem:[#allocation13 + $0x6d0] ss:$8 sps:$4 sm:$0xff]  }
0x12d0   :  { %7605 = vmatpush1.bf16.msra.mxu0 %v9196_v46  ;;  %v9247_v46 = vld [vmem:[#allocation13 + $0x7d0] ss:$8 sps:$4 sm:$0xff]  }
0x12d1   :  { %7646 = vmatpush1.bf16.msra.mxu1 %v9199_v57  ;;  %7606 = vmatprep.subr.bf16.mxu0 %v9204_v47  ;;  %v9252_v57 = vld [vmem:[#allocation13 + $0x6e4] ss:$8 sps:$4 sm:$0xff]   ;;  %v5010_v47 = vrot.slane %v9995_v45, %v9747_v13 }
0x12d2   :  { %7647 = vmatprep.subr.bf16.mxu1 %v9207_v48  ;;  %v9255_v48 = vld [vmem:[#allocation13 + $0x7e4] ss:$8 sps:$4 sm:$0xff]  }
0x12d4   :  { %7607 = vmatpush1.bf16.msra.mxu0 %v9202_v49 }
0x12d5   :  { %7648 = vmatpush1.bf16.msra.mxu1 %v9205_v17  ;;  %7608 = vmatprep.subr.bf16.mxu0 %v9210_v50  ;;  %v5018_v17 = vrot.slane %v9995_v45, %v9828_v60  ;;  %v6468_v60 = vadd.f32 %v9977_v20, %v5010_v47 }
0x12d6   :  { %7649 = vmatprep.subr.bf16.mxu1 %v9213_v51  ;;  %v5014_v51 = vrot.slane %v9995_v45, %v9831_v63 }
0x12d8   :  { %7609 = vmatpush1.bf16.msra.mxu0 %v9208_v16 }
0x12d9   :  { %7650 = vmatpush1.bf16.msra.mxu1 %v9211_v52  ;;  %7610 = vmatprep.subr.bf16.mxu0 %v9216_v53  ;;  %v9250_v53 = vld [vmem:[#allocation13 + $0x6e0] ss:$8 sps:$4 sm:$0xff]  }
0x12da   :  { %7651 = vmatprep.subr.bf16.mxu1 %v9219_v54 }
0x12dc   :  { %7611 = vmatpush1.bf16.msra.mxu0 %v9214_v1  ;;  %v5022_v1 = vrot.slane %v9995_v45, %v9834_v4  ;;  %v6470_v4 = vadd.f32 %v9981_v61, %v5014_v51 }
0x12dd   :  { %7652 = vmatpush1.bf16.msra.mxu1 %v9217_v15  ;;  %7612 = vmatprep.subr.bf16.mxu0 %v9222_v55  ;;  %v9253_v55 = vld [vmem:[#allocation13 + $0x7e0] ss:$8 sps:$4 sm:$0xff]  }
0x12de   :  { %7653 = vmatprep.subr.bf16.mxu1 %v9225_v36  ;;  %v9258_v36 = vld [vmem:[#allocation13 + $0x6f4] ss:$8 sps:$4 sm:$0xff]  }
0x12e0   :  { %7613 = vmatpush1.bf16.msra.mxu0 %v9220_v19  ;;  %v6631_v12 = vpop.f32.mrb[48].mxu0 }
0x12e1   :  { %7654 = vmatpush1.bf16.msra.mxu1 %v9223_v26  ;;  %v6632_v29 = vadd.f32 %v6631_v12, %v5042_v2  ;;  %v6672_v31 = vpop.f32.mrb[56].mxu1  ;;  %v6633_v34 = vpop.f32.mrb[49].mxu0  ;;  %7614 = vmatprep.subr.bf16.mxu0 %v9228_v9 }
0x12e2   :  { %v6673_v35 = vadd.f32 %v6672_v31, %v5050_v18  ;;  %v6634_v8 = vadd.f32 %v6633_v34, %v5046_v10  ;;  %v6674_v6 = vpop.f32.mrb[57].mxu1  ;;  %v6635_v24 = vpop.f32.mrb[50].mxu0  ;;  %7655 = vmatprep.subr.bf16.mxu1 %v9231_v14  ;;  %v9261_v18 = vld [vmem:[#allocation13 + $0x7f4] ss:$8 sps:$4 sm:$0xff]   ;;  %v6509_v10 = vadd.f32 %v9979_v21, %v5018_v17  ;;  %v6511_v31 = vadd.f32 %v9983_v22, %v5022_v1 }
0x12e3   :  { %v6691_v11 = vmul.f32 0.70710677, %v6632_v29  ;;  %v6675_v23 = vadd.f32 %v6674_v6, %v5054_v3  ;;  %v6676_v25 = vpop.f32.mrb[58].mxu1  ;;  %v6636_v39 = vpop.f32.mrb[51].mxu0  ;;  %v6683_v16 = vmul.f32 0.5, %v6632_v29  ;;  %v9312_v24 = vld [vmem:[#allocation5 + $0x10] sm:$0xff] }
0x12e4   :  { %v6693_v38 = vmul.f32 0.70710677, %v6673_v35  ;;  %v6692_v37 = vmul.f32 0.70710677, %v6634_v8  ;;  %7615 = vmatpush1.bf16.msra.mxu0 %v9226_v62  ;;  %v6677_v41 = vpop.f32.mrb[59].mxu1  ;;  %v6685_v15 = vmul.f32 0.5, %v6673_v35  ;;  %v6867_v22 = vrot.slane %v9312_v24, %v9831_v63 }
0x12e5   :  { %9302 = verf.f32 %v6691_v11  ;;  %v6694_v32 = vmul.f32 0.70710677, %v6675_v23  ;;  %7656 = vmatpush1.bf16.msra.mxu1 %v9229_v27  ;;  %7616 = vmatprep.subr.bf16.mxu0 %v9234_v28  ;;  %v6684_v2 = vmul.f32 0.5, %v6634_v8  ;;  %v6686_v3 = vmul.f32 0.5, %v6675_v23  ;;  %v9256_v29 = vld [vmem:[#allocation13 + $0x6f0] ss:$8 sps:$4 sm:$0xff]  }
0x12e6   :  { %9304 = verf.f32 %v6693_v38  ;;  %7657 = vmatprep.subr.bf16.mxu1 %v9237_v56  ;;  %v9259_v27 = vld [vmem:[#allocation13 + $0x7f0] ss:$8 sps:$4 sm:$0xff]  }
0x12e7   :  { %9306 = verf.f32 %v6692_v37  ;;  %v9313_v56 = vld [vmem:[#allocation5 + $0x18] sm:$0xff] }
0x12e8   :  { %9308 = verf.f32 %v6694_v32  ;;  %7617 = vmatpush1.bf16.msra.mxu0 %v9232_v5  ;;  %v6871_v11 = vrot.slane %v9313_v56, %v9831_v63 }
0x12e9   :  { %7658 = vmatpush1.bf16.msra.mxu1 %v9235_v58  ;;  %7618 = vmatprep.subr.bf16.mxu0 %v9240_v42 }
0x12ea   :  { %7659 = vmatprep.subr.bf16.mxu1 %v9243_v43 }
0x12ec   :  { %7619 = vmatpush1.bf16.msra.mxu0 %v9238_v0 }
0x12ed   :  { %7660 = vmatpush1.bf16.msra.mxu1 %v9241_v30  ;;  %7620 = vmatprep.subr.bf16.mxu0 %v9246_v33 }
0x12ee   :  { %7661 = vmatprep.subr.bf16.mxu1 %v9249_v7 }
0x12ef   :  { %v9303_v49 = vpop.eup %9302 }
0x12f0   :  { %v9305_v50 = vpop.eup %9304  ;;  %v6707_v52 = vadd.f32 1.0, %v9303_v49  ;;  %7621 = vmatpush1.bf16.msra.mxu0 %v9244_v44 }
0x12f1   :  { %v9307_v54 = vpop.eup %9306  ;;  %v6709_v13 = vadd.f32 1.0, %v9305_v50  ;;  %7662 = vmatpush1.bf16.msra.mxu1 %v9247_v46  ;;  %7622 = vmatprep.subr.bf16.mxu0 %v9252_v57 }
0x12f2   :  { %v9309_v19 = vpop.eup %9308  ;;  %v6715_v26 = vmul.f32 %v6707_v52, %v6683_v16  ;;  %v6708_v9 = vadd.f32 1.0, %v9307_v54  ;;  %7663 = vmatprep.subr.bf16.mxu1 %v9255_v48 }
0x12f3   :  { %v6717_v14 = vmul.f32 %v6709_v13, %v6685_v15  ;;  %v6710_v12 = vadd.f32 1.0, %v9309_v19 }
0x12f4   :  { %v6723_v45 = vmul.f32 %v6715_v26, %v6468_v60  ;;  %v6716_v62 = vmul.f32 %v6708_v9, %v6684_v2  ;;  %7623 = vmatpush1.bf16.msra.mxu0 %v9250_v53 }
0x12f5   :  { %v6725_v34 = vmul.f32 %v6717_v14, %v6509_v10  ;;  %v6718_v20 = vmul.f32 %v6710_v12, %v6686_v3  ;;  %7664 = vmatpush1.bf16.msra.mxu1 %v9253_v55  ;;  %7624 = vmatprep.subr.bf16.mxu0 %v9258_v36 }
0x12f6   :  { %7665 = vmatprep.subr.bf16.mxu1 %v9261_v18  ;;  %v6724_v28 = vmul.f32 %v6716_v62, %v6470_v4  ;;  %v6731_v8 = vpack.c.bf16 %v6723_v45, %v6723_v45 }
0x12f7   :  { %v6726_v35 = vmul.f32 %v6718_v20, %v6511_v31  ;;  %v6733_v61 = vpack.c.bf16 %v6725_v34, %v6725_v34 }
0x12f8   :  { %7625 = vmatpush1.bf16.msra.mxu0 %v9256_v29  ;;  %v6732_v21 = vpack.c.bf16 %v6724_v28, %v6724_v28 }
0x12f9   :  { %7666 = vmatpush1.bf16.msra.mxu1 %v9259_v27  ;;  %v6734_v6 = vpack.c.bf16 %v6726_v35, %v6726_v35 }
0x12fa   :  { %7626 = vmatprep.mubr.bf16.mxu0 %v6732_v21 }
0x12fb   :  { %7667 = vmatprep.mubr.bf16.mxu1 %v6734_v6  ;;  %7627 = vmatmul.mubr.bf16.vlgmr.msra.gmra.mrb[56].mxu0 %v6731_v8 }
0x12fc   :  { %7668 = vmatmul.mubr.bf16.vlgmr.msra.gmra.mrb[64].mxu1 %v6733_v61 }
0x138e   :  { %v7546_v23 = vpop.f32.mrb[52].mxu0 }
0x138f   :  { %v7547_v25 = vadd.f32 %v7546_v23, %v6867_v22  ;;  %v7587_v39 = vpop.f32.mrb[60].mxu1  ;;  %v7548_v5 = vpop.f32.mrb[53].mxu0 }
0x1390   :  { %v7549_v38 = vadd.f32 %v7548_v5, %v6871_v11  ;;  %v7589_v37 = vpop.f32.mrb[61].mxu1  ;;  %v7550_v58 = vpop.f32.mrb[54].mxu0 }
0x1391   :  { %v7588_v32 = vadd.f32 %v7587_v39, %v7547_v25  ;;  %v7591_v41 = vpop.f32.mrb[62].mxu1  ;;  %v7551_v42 = vpop.f32.mrb[55].mxu0 }
0x1392   :  { %v7590_v43 = vadd.f32 %v7589_v37, %v7549_v38  ;;  %v7592_v0 = vpop.f32.mrb[63].mxu1 }
0x13ce   :  { %v7628_v30 = vpop.f32.mrb[56].mxu0 }
0x13cf   :  { %v7629_v33 = vadd.f32 %v7628_v30, %v7588_v32  ;;  %v7669_v7 = vpop.f32.mrb[64].mxu1  ;;  %v7630_v44 = vpop.f32.mrb[57].mxu0 }
0x13d0   :  { %v7631_v46 = vadd.f32 %v7630_v44, %v7590_v43  ;;  %v7671_v57 = vpop.f32.mrb[65].mxu1  ;;  %v7632_v47 = vpop.f32.mrb[58].mxu0 }
0x13d1   :  { %v7670_v63 = vadd.f32 %v7669_v7, %v7629_v33  ;;  %v7673_v48 = vpop.f32.mrb[66].mxu1  ;;  %v7633_v49 = vpop.f32.mrb[59].mxu0 }
0x13d2   :  { %v7672_v17 = vadd.f32 %v7671_v57, %v7631_v46  ;;  %v7674_v50 = vpop.f32.mrb[67].mxu1 }
0x13d3   :  { %v7676_v51 = vadd.f32 %v7670_v63, %v9941_v40 }
0x13d4   :  { %v7677_v16 = vadd.f32 %v7672_v17, %v9943_v59 }
0x13d6   :  { %v7680_v52 = vcombine.low %v7676_v51, %v7677_v16 }
0x13d8   :  { %8608 = vst.sshfl [vmem:[#allocation14] sm:$0x33 pattern:$0x76325410] %v7680_v52 }
0x13d9   :  { %9479 = shalt.err (!%p9476_p4)
}
0x13da   :  { %s9480_s20 = scalar_lea.hbm %s10052_s7, 64 }
0x13db   :  { %p9481_p5 = scmp.ne.s32.totalorder %s10052_s7, %s9480_s20  ;;  %p9484_p6 = scmp.lt.u32.totalorder %s9480_s20, %s10052_s7 }
0x13dd   :  { %p9486_p7 = pnand %p9484_p6, %p9481_p5 }
0x13df   :  { %9489 = shalt.err (!%p9486_p7)
}
0x13e0   :  { %7699 = dma.vmem_to_hbm [thread:$0]  %s7697_s16, 64, %s10052_s7, [#allocation4]  }
0x13e1   :  { %9498 = dma.done.wait [#allocation4], 64  }
0x13e2   :  { %9499 = vsyncadd [#allocation4], 4294967232 }
0x13e3   :  { %7703 = vsyncpa [#allocation3], 1 }
0x13e4   :  { %7704 = vsyncpa [#allocation6], 1 }
0x13e5   :  { %7705 = vsyncpa [#allocation9], 1 }
0x13e6   :  { %7706 = vsyncpa [#allocation12], 1 }
0x13e7   :  { %7707 = vsyncpa [#allocation4], 1 }

</bundles_post_ra>
